<compile_context>
chip_gen: v6e
topology: v6e:2x2x1
jax: 0.10.0
libtpu: 0.0.40
codegen_flags: <defaults>
</compile_context>

<pallas_src>
from functools import partial

import jax
import jax.numpy as jnp
from jax.experimental import pallas as pl
from jax.experimental.pallas import tpu as pltpu

EPS = 1e-5


# ----------------------------------------------------------------------------
# Fused kernel: one grid step == one batch element, everything lives in VMEM.
# All activations are channel-major (channels on sublanes, HW on lanes).
# ----------------------------------------------------------------------------
def mbsca_kernel(a_ref, b_ref, c_ref, wall_ref, bns_ref, bnb_ref, spop_ref,
                 sp_ref, wfc1_ref, wfc2t_ref, wfus_ref, wfc_ref, mask9_ref,
                 wfin_ref, fbns_ref, fbnb_ref, out_ref, *, H, W, C, Cout):
    f32 = jnp.float32
    bf16 = jnp.bfloat16
    HW = H * W

    # ---- three 1x1-conv branches fused into ONE MXU dot ---------------------
    x = jnp.concatenate([a_ref[0], b_ref[0], c_ref[0]], axis=0).astype(bf16)
    z = jnp.dot(wall_ref[...], x, preferred_element_type=f32)        # (3C, HW)
    feats = jnp.maximum(z * bns_ref[...] + bnb_ref[...], 0.0)        # folded BN
    feat_ab = feats[:C]
    feat_bc = feats[C:2 * C]
    feat_abc = feats[2 * C:]

    # ---- SpatialAttention (ab & bc): one dot vs precomputed 7x7 operator ----
    sp_in = jnp.concatenate([
        jnp.concatenate([jnp.mean(feat_ab, axis=0, keepdims=True),
                         jnp.max(feat_ab, axis=0, keepdims=True)], axis=1),
        jnp.concatenate([jnp.mean(feat_bc, axis=0, keepdims=True),
                         jnp.max(feat_bc, axis=0, keepdims=True)], axis=1),
    ], axis=0)                                                        # (2, 2HW)
    conv_sp = jnp.dot(sp_in, spop_ref[...], preferred_element_type=f32)
    attn = jax.nn.sigmoid(sp_ref[0] * conv_sp + sp_ref[1])           # (2, HW)

    # attn-weighted spatial means (att_ab / att_bc only consumed via means).
    inv_hw = 1.0 / HW
    m_ab = jnp.sum(feat_ab * attn[0:1, :], axis=1, keepdims=True) * inv_hw
    m_bc = jnp.sum(feat_bc * attn[1:2, :], axis=1, keepdims=True) * inv_hw
    m_cat = jnp.concatenate([m_ab, m_bc], axis=0)                    # (2C, 1)

    # ---- ChannelAttention on feat_abc (tiny FCs on the VPU, f32) ------------
    s_col = (jnp.mean(feat_abc, axis=1, keepdims=True) +
             jnp.max(feat_abc, axis=1, keepdims=True))               # (C, 1)
    # fc1(avg)+fc1(max) == fc1(avg+max)  (bias-free, per the reference module)
    h_row = jnp.maximum(
        jnp.sum(wfc1_ref[...] * s_col, axis=0, keepdims=True), 0.0)  # (1, hid)
    ca = jax.nn.sigmoid(
        jnp.sum(wfc2t_ref[...] * h_row, axis=1, keepdims=True))      # (C, 1)
    att_abc = feat_abc * ca                                          # (C, HW)

    # ---- fusion_conv + spatial mean (linear => conv of the means) -----------
    v_row = jnp.sum(wfus_ref[...] * m_cat, axis=0, keepdims=True)    # (1, C)

    # ---- final 3x3 conv (pad=1) + folded BN + ReLU ---------------------------
    #  * att_abc half: roll-based im2col + one (Cout,9C)x(9C,HW) bf16 dot.
    #  * fusion half (spatially constant v): 9 (Cout,1) tap vectors combined
    #    with precomputed border masks on the VPU (no scratch, no extra dots).
    mask9 = mask9_ref[...]                                           # (9, HW)
    taps = []
    const_acc = jnp.zeros((Cout, HW), f32)
    t = 0
    for dh in (-1, 0, 1):
        for dw in (-1, 0, 1):
            s = dh * W + dw
            r = att_abc if s == 0 else pltpu.roll(att_abc, (-s) % HW, axis=1)
            m_t = mask9[t:t + 1, :]                                  # (1, HW)
            taps.append(r * m_t)
            u_t = jnp.sum(wfc_ref[t] * v_row, axis=1, keepdims=True)  # (Cout,1)
            const_acc = const_acc + u_t * m_t
            t += 1
    im2col = jnp.concatenate(taps, axis=0).astype(bf16)              # (9C, HW)
    conv_att = jnp.dot(wfin_ref[...], im2col, preferred_element_type=f32)

    y = jnp.maximum((conv_att + const_acc) * fbns_ref[...] + fbnb_ref[...], 0.0)
    out_ref[0] = y                                                   # (Cout, HW)


# ----------------------------------------------------------------------------
# Host-side helpers
# ----------------------------------------------------------------------------
def bn_fold(gamma, beta, mean, var, eps=EPS):
    scale = gamma / jnp.sqrt(var + eps)
    return scale, beta - mean * scale


def build_spatial_op(w_sp, H, W):
    """(2HW, HW) operator: conv7x7('same') of the [avg|max] maps becomes
    conv_flat = [avg_flat | max_flat] @ Op  (zero padding baked in)."""
    hi = jnp.arange(H)[:, None, None, None]
    wi = jnp.arange(W)[None, :, None, None]
    ho = jnp.arange(H)[None, None, :, None]
    wo = jnp.arange(W)[None, None, None, :]
    di = hi - ho + 3
    dj = wi - wo + 3
    valid = ((di >= 0) & (di < 7) & (dj >= 0) & (dj < 7)).astype(jnp.float32)
    op = w_sp[:, jnp.clip(di, 0, 6), jnp.clip(dj, 0, 6)] * valid[None]
    return op.reshape(2 * H * W, H * W)                              # (2HW, HW)


def build_tap_masks(H, W):
    """(9, HW) 0/1 masks: tap (dh,dw) samples an in-bounds pixel at p."""
    h_idx = jnp.repeat(jnp.arange(H), W)
    w_idx = jnp.tile(jnp.arange(W), H)
    rows = []
    for dh in (-1, 0, 1):
        for dw in (-1, 0, 1):
            ok = ((h_idx + dh >= 0) & (h_idx + dh < H) &
                  (w_idx + dw >= 0) & (w_idx + dw < W))
            rows.append(ok.astype(jnp.float32))
    return jnp.stack(rows, axis=0)


def make_params(key, C, Cout, reduction=16):
    hidden = max(1, C // reduction)
    ks = jax.random.split(key, 12)

    def nrm(k, shape, s=0.1):
        return (s * jax.random.normal(k, shape)).astype(jnp.float32)

    return dict(
        w_conv1x1=nrm(ks[0], (2 * C, C)),
        # TODO(synk): the reference applies its 2C->C conv1x1 to a 3C concat
        # (shape bug); a dedicated 3C->C weight is used for that branch.
        w_conv1x1_abc=nrm(ks[1], (3 * C, C)),
        bn_gamma=(1.0 + 0.1 * jax.random.normal(ks[2], (C,))).astype(jnp.float32),
        bn_beta=nrm(ks[3], (C,)),
        bn_mean=jnp.zeros((C,), jnp.float32),
        bn_var=jnp.ones((C,), jnp.float32),
        w_sp=nrm(ks[4], (2, 7, 7)),
        spbn_gamma=jnp.ones((1,), jnp.float32),
        spbn_beta=jnp.zeros((1,), jnp.float32),
        spbn_mean=jnp.zeros((1,), jnp.float32),
        spbn_var=jnp.ones((1,), jnp.float32),
        # TODO(synk): ChannelAttention(3C) in the reference is applied to a
        # C-channel tensor; instantiated over C channels (hidden = C//16).
        w_fc1=nrm(ks[5], (C, hidden)),
        w_fc2=nrm(ks[6], (hidden, C)),
        w_fusion=nrm(ks[7], (2 * C, C)),
        w_final=nrm(ks[8], (3, 3, 2 * C, Cout)),
        fbn_gamma=(1.0 + 0.1 * jax.random.normal(ks[9], (Cout,))).astype(jnp.float32),
        fbn_beta=nrm(ks[10], (Cout,)),
        fbn_mean=jnp.zeros((Cout,), jnp.float32),
        fbn_var=jnp.ones((Cout,), jnp.float32),
    )


# ----------------------------------------------------------------------------
# Forward: single fused pallas_call (NCHW in / NCHW out, no wrapper transposes)
# ----------------------------------------------------------------------------
def mbsca_forward(params, feat_a_nchw, feat_b_nchw, feat_c_nchw):
    B, C, H, W = feat_a_nchw.shape
    HW = H * W
    Cout = params["fbn_gamma"].shape[0]
    hid = params["w_fc1"].shape[1]

    bn_s, bn_b = bn_fold(params["bn_gamma"], params["bn_beta"],
                         params["bn_mean"], params["bn_var"])
    sp_s, sp_b = bn_fold(params["spbn_gamma"], params["spbn_beta"],
                         params["spbn_mean"], params["spbn_var"])
    fbn_s, fbn_b = bn_fold(params["fbn_gamma"], params["fbn_beta"],
                           params["fbn_mean"], params["fbn_var"])

    # NCHW -> (B, C, HW) is a free reshape (lane dim = HW, lane-dense).
    a = feat_a_nchw.reshape(B, C, HW).astype(jnp.float32)
    b = feat_b_nchw.reshape(B, C, HW).astype(jnp.float32)
    c = feat_c_nchw.reshape(B, C, HW).astype(jnp.float32)

    # Fused branch weight (out-major): rows [ab | bc | abc] against [a; b; c].
    w1t = params["w_conv1x1"].T                                   # (C, 2C)
    z = jnp.zeros((C, C), jnp.float32)
    wall = jnp.concatenate([
        jnp.concatenate([w1t[:, :C], w1t[:, C:], z], axis=1),     # feat_ab
        jnp.concatenate([z, w1t[:, :C], w1t[:, C:]], axis=1),     # feat_bc
        params["w_conv1x1_abc"].T,                                # feat_abc
    ], axis=0).astype(jnp.bfloat16)                               # (3C, 3C)

    bn_s3 = jnp.tile(bn_s, 3).reshape(3 * C, 1)
    bn_b3 = jnp.tile(bn_b, 3).reshape(3 * C, 1)

    spop = build_spatial_op(params["w_sp"], H, W)                 # (2HW, HW) f32
    sp = jnp.concatenate([sp_s, sp_b]).astype(jnp.float32)        # (2,) SMEM

    wfc1 = params["w_fc1"]                                        # (C, hid)
    wfc2t = params["w_fc2"].T                                     # (C, hid)
    wfus = params["w_fusion"]                                     # (2C, C)

    mask9 = build_tap_masks(H, W)                                 # (9, HW)
    wf = params["w_final"]                                        # (3,3,2C,Cout)
    wfin_att = jnp.transpose(wf[:, :, :C, :], (3, 0, 1, 2)).reshape(
        Cout, 9 * C).astype(jnp.bfloat16)                         # (Cout, 9C)
    wf_const = jnp.transpose(wf[:, :, C:, :], (0, 1, 3, 2)).reshape(
        9, Cout, C)                                               # (9, Cout, C)

    kernel = partial(mbsca_kernel, H=H, W=W, C=C, Cout=Cout)

    def rep(shape):   # grid-resident weight blocks
        n = len(shape)
        return pl.BlockSpec(shape, lambda bi, n=n: (0,) * n)

    out_flat = pl.pallas_call(
        kernel,
        out_shape=jax.ShapeDtypeStruct((B, Cout, HW), jnp.float32),
        grid=(B,),
        in_specs=[
            pl.BlockSpec((1, C, HW), lambda bi: (bi, 0, 0)),       # a
            pl.BlockSpec((1, C, HW), lambda bi: (bi, 0, 0)),       # b
            pl.BlockSpec((1, C, HW), lambda bi: (bi, 0, 0)),       # c
            rep((3 * C, 3 * C)),                                   # wall (bf16)
            rep((3 * C, 1)),                                       # bn scale
            rep((3 * C, 1)),                                       # bn bias
            rep((2 * HW, HW)),                                     # spatial op
            pl.BlockSpec(memory_space=pltpu.MemorySpace.SMEM),     # sp bn (2,)
            rep((C, hid)),                                         # fc1
            rep((C, hid)),                                         # fc2^T
            rep((2 * C, C)),                                       # fusion w
            rep((9, Cout, C)),                                     # final w (const half)
            rep((9, HW)),                                          # tap masks
            rep((Cout, 9 * C)),                                    # final w (att half, bf16)
            rep((Cout, 1)),                                        # final bn s
            rep((Cout, 1)),                                        # final bn b
        ],
        out_specs=pl.BlockSpec((1, Cout, HW), lambda bi: (bi, 0, 0)),
        # batch axis is independent -> lets v7x shard it over its 2 TCs.
        # Resident VMEM ~1.5 MiB, well under the default scoped limit on
        # v5e/v6e/v7x, so no vmem_limit_bytes override is needed.
        compiler_params=pltpu.CompilerParams(
            dimension_semantics=("parallel",)),
    )(a, b, c, wall, bn_s3, bn_b3, spop, sp, wfc1, wfc2t, wfus,
      wf_const, mask9, wfin_att, fbn_s.reshape(Cout, 1), fbn_b.reshape(Cout, 1))

    return out_flat.reshape(B, Cout, H, W)                        # NCHW, free


# ----------------------------------------------------------------------------
# Pure-JAX reference (mirrors the PyTorch graph, folded inference-mode BN)
# ----------------------------------------------------------------------------
def mbsca_reference(params, feat_a_nchw, feat_b_nchw, feat_c_nchw):
    a = jnp.transpose(feat_a_nchw, (0, 2, 3, 1)).astype(jnp.float32)
    b = jnp.transpose(feat_b_nchw, (0, 2, 3, 1)).astype(jnp.float32)
    c = jnp.transpose(feat_c_nchw, (0, 2, 3, 1)).astype(jnp.float32)
    B, H, W, C = a.shape

    bn_s, bn_b = bn_fold(params["bn_gamma"], params["bn_beta"],
                         params["bn_mean"], params["bn_var"])
    sp_s, sp_b = bn_fold(params["spbn_gamma"], params["spbn_beta"],
                         params["spbn_mean"], params["spbn_var"])
    fbn_s, fbn_b = bn_fold(params["fbn_gamma"], params["fbn_beta"],
                           params["fbn_mean"], params["fbn_var"])

    def pw(x, w):
        return jnp.einsum("bhwi,io->bhwo", x, w)

    def spatial_att(x):
        avg = jnp.mean(x, axis=-1)
        mx = jnp.max(x, axis=-1)
        maps = jnp.stack([avg, mx], axis=-1)
        mp = jnp.pad(maps, ((0, 0), (3, 3), (3, 3), (0, 0)))
        conv = jnp.zeros((B, H, W), jnp.float32)
        for ch in range(2):
            for di in range(7):
                for dj in range(7):
                    conv = conv + params["w_sp"][ch, di, dj] * \
                        mp[:, di:di + H, dj:dj + W, ch]
        attn = jax.nn.sigmoid(sp_s[0] * conv + sp_b[0])
        return x * attn[..., None]

    def channel_att(x):
        avg = jnp.mean(x, axis=(1, 2), keepdims=True)
        mx = jnp.max(x, axis=(1, 2), keepdims=True)
        h = jax.nn.relu(pw(avg, params["w_fc1"]) + pw(mx, params["w_fc1"]))
        return x * jax.nn.sigmoid(pw(h, params["w_fc2"]))

    feat_ab = jax.nn.relu(pw(jnp.concatenate([a, b], -1),
                             params["w_conv1x1"]) * bn_s + bn_b)
    att_ab = spatial_att(feat_ab)
    feat_bc = jax.nn.relu(pw(jnp.concatenate([b, c], -1),
                             params["w_conv1x1"]) * bn_s + bn_b)
    att_bc = spatial_att(feat_bc)
    feat_abc = jax.nn.relu(pw(jnp.concatenate([a, b, c], -1),
                              params["w_conv1x1_abc"]) * bn_s + bn_b)
    att_abc = channel_att(feat_abc)

    fusion = pw(jnp.concatenate([att_ab, att_bc], -1), params["w_fusion"])
    fusion = jnp.mean(fusion, axis=(1, 2), keepdims=True)
    final_in = jnp.concatenate(
        [att_abc, jnp.broadcast_to(fusion, att_abc.shape)], -1)
    fp = jnp.pad(final_in, ((0, 0), (1, 1), (1, 1), (0, 0)))
    Cout = params["w_final"].shape[-1]
    acc = jnp.zeros((B, H, W, Cout), jnp.float32)
    for di in range(3):
        for dj in range(3):
            acc = acc + jnp.einsum("bhwi,io->bhwo",
                                   fp[:, di:di + H, dj:dj + W, :],
                                   params["w_final"][di, dj])
    out = jax.nn.relu(acc * fbn_s + fbn_b)
    return jnp.transpose(out, (0, 3, 1, 2))


# ----------------------------------------------------------------------------
if __name__ == "__main__":
    B, C, H, W = 2, 32, 16, 16      # in_channels = 32
    COUT = 32                       # out_channels = 32

    key = jax.random.PRNGKey(0)
    k_par, k_a, k_b, k_c = jax.random.split(key, 4)

    params = make_params(k_par, C, COUT)
    feat_a = jax.random.normal(k_a, (B, C, H, W), dtype=jnp.float32)
    feat_b = jax.random.normal(k_b, (B, C, H, W), dtype=jnp.float32)
    feat_c = jax.random.normal(k_c, (B, C, H, W), dtype=jnp.float32)

    fwd = jax.jit(mbsca_forward)
    out = fwd(params, feat_a, feat_b, feat_c)
    jax.block_until_ready(out)

    ref = jax.jit(mbsca_reference)(params, feat_a, feat_b, feat_c)
    jax.block_until_ready(ref)

    assert out.shape == (B, COUT, H, W), out.shape
    assert bool(jnp.all(jnp.isfinite(out)))
    # bf16 MXU operands (f32 accumulation) vs f32 reference -> loose tol.
    assert bool(jnp.allclose(out, ref, atol=1e-1, rtol=1e-1)), \
        float(jnp.max(jnp.abs(out - ref)))
    print("KERNEL_OK")
</pallas_src>

<mosaic_0001>
module attributes {stable_mosaic.version = 11 : i64} {
  func.func @mbsca_kernel(%arg0: i32, %arg1: memref<1x32x256xf32, #tpu.memory_space<vmem>>, %arg2: memref<1x32x256xf32, #tpu.memory_space<vmem>>, %arg3: memref<1x32x256xf32, #tpu.memory_space<vmem>>, %arg4: memref<96x96xbf16, #tpu.memory_space<vmem>>, %arg5: memref<96x1xf32, #tpu.memory_space<vmem>>, %arg6: memref<96x1xf32, #tpu.memory_space<vmem>>, %arg7: memref<512x256xf32, #tpu.memory_space<vmem>>, %arg8: memref<2xf32, #tpu.memory_space<smem>>, %arg9: memref<32x2xf32, #tpu.memory_space<vmem>>, %arg10: memref<32x2xf32, #tpu.memory_space<vmem>>, %arg11: memref<64x32xf32, #tpu.memory_space<vmem>>, %arg12: memref<9x32x32xf32, #tpu.memory_space<vmem>>, %arg13: memref<9x256xf32, #tpu.memory_space<vmem>>, %arg14: memref<32x288xbf16, #tpu.memory_space<vmem>>, %arg15: memref<32x1xf32, #tpu.memory_space<vmem>>, %arg16: memref<32x1xf32, #tpu.memory_space<vmem>>, %arg17: memref<1x32x256xf32, #tpu.memory_space<vmem>>) attributes {dimension_semantics = [#tpu.dimension_semantics<parallel>], iteration_bounds = array<i64: 2>, scalar_prefetch = 0 : i64, scratch_operands = 0 : i64, tpu.core_type = #tpu.core_type<tc>, window_params = [{transform_indices = @transform_0, window_bounds = array<i64: 1, 32, 256>}, {transform_indices = @transform_1, window_bounds = array<i64: 1, 32, 256>}, {transform_indices = @transform_2, window_bounds = array<i64: 1, 32, 256>}, {pipeline_mode = #tpu.pipeline_mode<synchronous>, transform_indices = @transform_3, window_bounds = array<i64: 96, 96>}, {pipeline_mode = #tpu.pipeline_mode<synchronous>, transform_indices = @transform_4, window_bounds = array<i64: 96, 1>}, {pipeline_mode = #tpu.pipeline_mode<synchronous>, transform_indices = @transform_5, window_bounds = array<i64: 96, 1>}, {pipeline_mode = #tpu.pipeline_mode<synchronous>, transform_indices = @transform_6, window_bounds = array<i64: 512, 256>}, {transform_indices = @transform_7, window_bounds = array<i64: 2>}, {pipeline_mode = #tpu.pipeline_mode<synchronous>, transform_indices = @transform_8, window_bounds = array<i64: 32, 2>}, {pipeline_mode = #tpu.pipeline_mode<synchronous>, transform_indices = @transform_9, window_bounds = array<i64: 32, 2>}, {pipeline_mode = #tpu.pipeline_mode<synchronous>, transform_indices = @transform_10, window_bounds = array<i64: 64, 32>}, {pipeline_mode = #tpu.pipeline_mode<synchronous>, transform_indices = @transform_11, window_bounds = array<i64: 9, 32, 32>}, {pipeline_mode = #tpu.pipeline_mode<synchronous>, transform_indices = @transform_12, window_bounds = array<i64: 9, 256>}, {pipeline_mode = #tpu.pipeline_mode<synchronous>, transform_indices = @transform_13, window_bounds = array<i64: 32, 288>}, {pipeline_mode = #tpu.pipeline_mode<synchronous>, transform_indices = @transform_14, window_bounds = array<i64: 32, 1>}, {pipeline_mode = #tpu.pipeline_mode<synchronous>, transform_indices = @transform_15, window_bounds = array<i64: 32, 1>}, {transform_indices = @transform_16, window_bounds = array<i64: 1, 32, 256>}]} {
    %c0 = arith.constant 0 : index
    %c0_0 = arith.constant 0 : index
    %c0_1 = arith.constant 0 : index
    %0 = vector.load %arg1[%c0, %c0_0, %c0_1] : memref<1x32x256xf32, #tpu.memory_space<vmem>>, vector<1x32x256xf32>
    %1 = vector.shape_cast %0 : vector<1x32x256xf32> to vector<32x256xf32>
    %c0_2 = arith.constant 0 : index
    %c0_3 = arith.constant 0 : index
    %c0_4 = arith.constant 0 : index
    %2 = vector.load %arg2[%c0_2, %c0_3, %c0_4] : memref<1x32x256xf32, #tpu.memory_space<vmem>>, vector<1x32x256xf32>
    %3 = vector.shape_cast %2 : vector<1x32x256xf32> to vector<32x256xf32>
    %c0_5 = arith.constant 0 : index
    %c0_6 = arith.constant 0 : index
    %c0_7 = arith.constant 0 : index
    %4 = vector.load %arg3[%c0_5, %c0_6, %c0_7] : memref<1x32x256xf32, #tpu.memory_space<vmem>>, vector<1x32x256xf32>
    %5 = vector.shape_cast %4 : vector<1x32x256xf32> to vector<32x256xf32>
    %6 = tpu.concatenate %1, %3, %5 in 0 : vector<32x256xf32>, vector<32x256xf32>, vector<32x256xf32> -> vector<96x256xf32>
    %7 = arith.truncf %6 : vector<96x256xf32> to vector<96x256xbf16>
    %c0_8 = arith.constant 0 : index
    %c0_9 = arith.constant 0 : index
    %8 = vector.load %arg4[%c0_8, %c0_9] : memref<96x96xbf16, #tpu.memory_space<vmem>>, vector<96x96xbf16>
    %cst = arith.constant dense<0.000000e+00> : vector<96x256xf32>
    %9 = tpu.matmul %8, %7, %cst {dimension_numbers = #tpu.dot_dimension_numbers<[1], [0], [0], [1], [0, 0, 1, 1], [], []>} : vector<96x96xbf16>, vector<96x256xbf16>, vector<96x256xf32> -> vector<96x256xf32>
    %c0_10 = arith.constant 0 : index
    %c0_11 = arith.constant 0 : index
    %10 = vector.load %arg5[%c0_10, %c0_11] : memref<96x1xf32, #tpu.memory_space<vmem>>, vector<96x1xf32>
    %11 = vector.broadcast %10 : vector<96x1xf32> to vector<96x256xf32>
    %12 = arith.mulf %9, %11 : vector<96x256xf32>
    %c0_12 = arith.constant 0 : index
    %c0_13 = arith.constant 0 : index
    %13 = vector.load %arg6[%c0_12, %c0_13] : memref<96x1xf32, #tpu.memory_space<vmem>>, vector<96x1xf32>
    %14 = vector.broadcast %13 : vector<96x1xf32> to vector<96x256xf32>
    %15 = arith.addf %12, %14 : vector<96x256xf32>
    %cst_14 = arith.constant 0.000000e+00 : f32
    %16 = vector.broadcast %cst_14 : f32 to vector<96x256xf32>
    %17 = arith.maximumf %15, %16 : vector<96x256xf32>
    %18 = vector.extract_strided_slice %17 {offsets = [0, 0], sizes = [32, 256], strides = [1, 1]} : vector<96x256xf32> to vector<32x256xf32>
    %19 = vector.extract_strided_slice %17 {offsets = [32, 0], sizes = [32, 256], strides = [1, 1]} : vector<96x256xf32> to vector<32x256xf32>
    %20 = vector.extract_strided_slice %17 {offsets = [64, 0], sizes = [32, 256], strides = [1, 1]} : vector<96x256xf32> to vector<32x256xf32>
    %cst_15 = arith.constant dense<0.000000e+00> : vector<256xf32>
    %21 = vector.multi_reduction <add>, %18, %cst_15 [0] : vector<32x256xf32> to vector<256xf32>
    %22 = vector.shape_cast %21 : vector<256xf32> to vector<1x256xf32>
    %cst_16 = arith.constant 3.200000e+01 : f32
    %23 = vector.broadcast %cst_16 : f32 to vector<1x256xf32>
    %24 = arith.divf %22, %23 : vector<1x256xf32>
    %cst_17 = arith.constant dense<0xFF800000> : vector<256xf32>
    %25 = vector.multi_reduction <maximumf>, %18, %cst_17 [0] : vector<32x256xf32> to vector<256xf32>
    %26 = vector.shape_cast %25 : vector<256xf32> to vector<1x256xf32>
    %27 = tpu.concatenate %24, %26 in 1 : vector<1x256xf32>, vector<1x256xf32> -> vector<1x512xf32>
    %cst_18 = arith.constant dense<0.000000e+00> : vector<256xf32>
    %28 = vector.multi_reduction <add>, %19, %cst_18 [0] : vector<32x256xf32> to vector<256xf32>
    %29 = vector.shape_cast %28 : vector<256xf32> to vector<1x256xf32>
    %cst_19 = arith.constant 3.200000e+01 : f32
    %30 = vector.broadcast %cst_19 : f32 to vector<1x256xf32>
    %31 = arith.divf %29, %30 : vector<1x256xf32>
    %cst_20 = arith.constant dense<0xFF800000> : vector<256xf32>
    %32 = vector.multi_reduction <maximumf>, %19, %cst_20 [0] : vector<32x256xf32> to vector<256xf32>
    %33 = vector.shape_cast %32 : vector<256xf32> to vector<1x256xf32>
    %34 = tpu.concatenate %31, %33 in 1 : vector<1x256xf32>, vector<1x256xf32> -> vector<1x512xf32>
    %35 = tpu.concatenate %27, %34 in 0 : vector<1x512xf32>, vector<1x512xf32> -> vector<2x512xf32>
    %c0_21 = arith.constant 0 : index
    %c0_22 = arith.constant 0 : index
    %36 = vector.load %arg7[%c0_21, %c0_22] : memref<512x256xf32, #tpu.memory_space<vmem>>, vector<512x256xf32>
    %cst_23 = arith.constant dense<0.000000e+00> : vector<2x256xf32>
    %37 = tpu.matmul %35, %36, %cst_23 {dimension_numbers = #tpu.dot_dimension_numbers<[1], [0], [0], [1], [0, 0, 1, 1], [], []>} : vector<2x512xf32>, vector<512x256xf32>, vector<2x256xf32> -> vector<2x256xf32>
    %c0_24 = arith.constant 0 : index
    %38 = memref.load %arg8[%c0_24] : memref<2xf32, #tpu.memory_space<smem>>
    %39 = vector.broadcast %38 : f32 to vector<2x256xf32>
    %40 = arith.mulf %39, %37 : vector<2x256xf32>
    %c1 = arith.constant 1 : index
    %41 = memref.load %arg8[%c1] : memref<2xf32, #tpu.memory_space<smem>>
    %42 = vector.broadcast %41 : f32 to vector<2x256xf32>
    %43 = arith.addf %40, %42 : vector<2x256xf32>
    %44 = arith.negf %43 : vector<2x256xf32>
    %45 = math.exp %44 : vector<2x256xf32>
    %cst_25 = arith.constant 1.000000e+00 : f32
    %46 = vector.broadcast %cst_25 : f32 to vector<2x256xf32>
    %47 = arith.addf %46, %45 : vector<2x256xf32>
    %48 = arith.divf %46, %47 : vector<2x256xf32>
    %49 = vector.extract_strided_slice %48 {offsets = [0, 0], sizes = [1, 256], strides = [1, 1]} : vector<2x256xf32> to vector<1x256xf32>
    %50 = vector.broadcast %49 : vector<1x256xf32> to vector<32x256xf32>
    %51 = arith.mulf %18, %50 : vector<32x256xf32>
    %cst_26 = arith.constant dense<0.000000e+00> : vector<32xf32>
    %52 = vector.multi_reduction <add>, %51, %cst_26 [1] : vector<32x256xf32> to vector<32xf32>
    %53 = vector.shape_cast %52 : vector<32xf32> to vector<32x1xf32>
    %cst_27 = arith.constant 3.906250e-03 : f32
    %54 = vector.broadcast %cst_27 : f32 to vector<32x1xf32>
    %55 = arith.mulf %53, %54 : vector<32x1xf32>
    %56 = vector.extract_strided_slice %48 {offsets = [1, 0], sizes = [1, 256], strides = [1, 1]} : vector<2x256xf32> to vector<1x256xf32>
    %57 = vector.broadcast %56 : vector<1x256xf32> to vector<32x256xf32>
    %58 = arith.mulf %19, %57 : vector<32x256xf32>
    %cst_28 = arith.constant dense<0.000000e+00> : vector<32xf32>
    %59 = vector.multi_reduction <add>, %58, %cst_28 [1] : vector<32x256xf32> to vector<32xf32>
    %60 = vector.shape_cast %59 : vector<32xf32> to vector<32x1xf32>
    %cst_29 = arith.constant 3.906250e-03 : f32
    %61 = vector.broadcast %cst_29 : f32 to vector<32x1xf32>
    %62 = arith.mulf %60, %61 : vector<32x1xf32>
    %63 = tpu.concatenate %55, %62 in 0 : vector<32x1xf32>, vector<32x1xf32> -> vector<64x1xf32>
    %cst_30 = arith.constant dense<0.000000e+00> : vector<32xf32>
    %64 = vector.multi_reduction <add>, %20, %cst_30 [1] : vector<32x256xf32> to vector<32xf32>
    %65 = vector.shape_cast %64 : vector<32xf32> to vector<32x1xf32>
    %cst_31 = arith.constant 2.560000e+02 : f32
    %66 = vector.broadcast %cst_31 : f32 to vector<32x1xf32>
    %67 = arith.divf %65, %66 : vector<32x1xf32>
    %cst_32 = arith.constant dense<0xFF800000> : vector<32xf32>
    %68 = vector.multi_reduction <maximumf>, %20, %cst_32 [1] : vector<32x256xf32> to vector<32xf32>
    %69 = vector.shape_cast %68 : vector<32xf32> to vector<32x1xf32>
    %70 = arith.addf %67, %69 : vector<32x1xf32>
    %c0_33 = arith.constant 0 : index
    %c0_34 = arith.constant 0 : index
    %71 = vector.load %arg9[%c0_33, %c0_34] : memref<32x2xf32, #tpu.memory_space<vmem>>, vector<32x2xf32>
    %72 = vector.broadcast %70 : vector<32x1xf32> to vector<32x2xf32>
    %73 = arith.mulf %71, %72 : vector<32x2xf32>
    %cst_35 = arith.constant dense<0.000000e+00> : vector<2xf32>
    %74 = vector.multi_reduction <add>, %73, %cst_35 [0] : vector<32x2xf32> to vector<2xf32>
    %75 = vector.shape_cast %74 : vector<2xf32> to vector<1x2xf32>
    %cst_36 = arith.constant 0.000000e+00 : f32
    %76 = vector.broadcast %cst_36 : f32 to vector<1x2xf32>
    %77 = arith.maximumf %75, %76 : vector<1x2xf32>
    %c0_37 = arith.constant 0 : index
    %c0_38 = arith.constant 0 : index
    %78 = vector.load %arg10[%c0_37, %c0_38] : memref<32x2xf32, #tpu.memory_space<vmem>>, vector<32x2xf32>
    %79 = vector.broadcast %77 : vector<1x2xf32> to vector<32x2xf32>
    %80 = arith.mulf %78, %79 : vector<32x2xf32>
    %cst_39 = arith.constant dense<0.000000e+00> : vector<32xf32>
    %81 = vector.multi_reduction <add>, %80, %cst_39 [1] : vector<32x2xf32> to vector<32xf32>
    %82 = vector.shape_cast %81 : vector<32xf32> to vector<32x1xf32>
    %83 = arith.negf %82 : vector<32x1xf32>
    %84 = math.exp %83 : vector<32x1xf32>
    %cst_40 = arith.constant 1.000000e+00 : f32
    %85 = vector.broadcast %cst_40 : f32 to vector<32x1xf32>
    %86 = arith.addf %85, %84 : vector<32x1xf32>
    %87 = arith.divf %85, %86 : vector<32x1xf32>
    %88 = vector.broadcast %87 : vector<32x1xf32> to vector<32x256xf32>
    %89 = arith.mulf %20, %88 : vector<32x256xf32>
    %c0_41 = arith.constant 0 : index
    %c0_42 = arith.constant 0 : index
    %90 = vector.load %arg11[%c0_41, %c0_42] : memref<64x32xf32, #tpu.memory_space<vmem>>, vector<64x32xf32>
    %91 = vector.broadcast %63 : vector<64x1xf32> to vector<64x32xf32>
    %92 = arith.mulf %90, %91 : vector<64x32xf32>
    %cst_43 = arith.constant dense<0.000000e+00> : vector<32xf32>
    %93 = vector.multi_reduction <add>, %92, %cst_43 [0] : vector<64x32xf32> to vector<32xf32>
    %94 = vector.shape_cast %93 : vector<32xf32> to vector<1x32xf32>
    %c0_44 = arith.constant 0 : index
    %c0_45 = arith.constant 0 : index
    %95 = vector.load %arg13[%c0_44, %c0_45] : memref<9x256xf32, #tpu.memory_space<vmem>>, vector<9x256xf32>
    %cst_46 = arith.constant 0.000000e+00 : f32
    %96 = vector.broadcast %cst_46 : f32 to vector<32x256xf32>
    %c17_i32 = arith.constant 17 : i32
    %97 = tpu.dynamic_rotate %89 by %c17_i32 dim 1 : vector<32x256xf32>, i32 -> vector<32x256xf32>
    %98 = vector.extract_strided_slice %95 {offsets = [0, 0], sizes = [1, 256], strides = [1, 1]} : vector<9x256xf32> to vector<1x256xf32>
    %99 = vector.broadcast %98 : vector<1x256xf32> to vector<32x256xf32>
    %100 = arith.mulf %97, %99 : vector<32x256xf32>
    %c0_47 = arith.constant 0 : index
    %c0_48 = arith.constant 0 : index
    %c0_49 = arith.constant 0 : index
    %101 = vector.load %arg12[%c0_47, %c0_48, %c0_49] : memref<9x32x32xf32, #tpu.memory_space<vmem>>, vector<1x32x32xf32>
    %102 = vector.shape_cast %101 : vector<1x32x32xf32> to vector<32x32xf32>
    %103 = vector.broadcast %94 : vector<1x32xf32> to vector<32x32xf32>
    %104 = arith.mulf %102, %103 : vector<32x32xf32>
    %cst_50 = arith.constant dense<0.000000e+00> : vector<32xf32>
    %105 = vector.multi_reduction <add>, %104, %cst_50 [1] : vector<32x32xf32> to vector<32xf32>
    %106 = vector.shape_cast %105 : vector<32xf32> to vector<32x1xf32>
    %107 = vector.broadcast %106 : vector<32x1xf32> to vector<32x256xf32>
    %108 = vector.broadcast %98 : vector<1x256xf32> to vector<32x256xf32>
    %109 = arith.mulf %107, %108 : vector<32x256xf32>
    %110 = arith.addf %96, %109 : vector<32x256xf32>
    %c16_i32 = arith.constant 16 : i32
    %111 = tpu.dynamic_rotate %89 by %c16_i32 dim 1 : vector<32x256xf32>, i32 -> vector<32x256xf32>
    %112 = vector.extract_strided_slice %95 {offsets = [1, 0], sizes = [1, 256], strides = [1, 1]} : vector<9x256xf32> to vector<1x256xf32>
    %113 = vector.broadcast %112 : vector<1x256xf32> to vector<32x256xf32>
    %114 = arith.mulf %111, %113 : vector<32x256xf32>
    %c1_51 = arith.constant 1 : index
    %c0_52 = arith.constant 0 : index
    %c0_53 = arith.constant 0 : index
    %115 = vector.load %arg12[%c1_51, %c0_52, %c0_53] : memref<9x32x32xf32, #tpu.memory_space<vmem>>, vector<1x32x32xf32>
    %116 = vector.shape_cast %115 : vector<1x32x32xf32> to vector<32x32xf32>
    %117 = vector.broadcast %94 : vector<1x32xf32> to vector<32x32xf32>
    %118 = arith.mulf %116, %117 : vector<32x32xf32>
    %cst_54 = arith.constant dense<0.000000e+00> : vector<32xf32>
    %119 = vector.multi_reduction <add>, %118, %cst_54 [1] : vector<32x32xf32> to vector<32xf32>
    %120 = vector.shape_cast %119 : vector<32xf32> to vector<32x1xf32>
    %121 = vector.broadcast %120 : vector<32x1xf32> to vector<32x256xf32>
    %122 = vector.broadcast %112 : vector<1x256xf32> to vector<32x256xf32>
    %123 = arith.mulf %121, %122 : vector<32x256xf32>
    %124 = arith.addf %110, %123 : vector<32x256xf32>
    %c15_i32 = arith.constant 15 : i32
    %125 = tpu.dynamic_rotate %89 by %c15_i32 dim 1 : vector<32x256xf32>, i32 -> vector<32x256xf32>
    %126 = vector.extract_strided_slice %95 {offsets = [2, 0], sizes = [1, 256], strides = [1, 1]} : vector<9x256xf32> to vector<1x256xf32>
    %127 = vector.broadcast %126 : vector<1x256xf32> to vector<32x256xf32>
    %128 = arith.mulf %125, %127 : vector<32x256xf32>
    %c2 = arith.constant 2 : index
    %c0_55 = arith.constant 0 : index
    %c0_56 = arith.constant 0 : index
    %129 = vector.load %arg12[%c2, %c0_55, %c0_56] : memref<9x32x32xf32, #tpu.memory_space<vmem>>, vector<1x32x32xf32>
    %130 = vector.shape_cast %129 : vector<1x32x32xf32> to vector<32x32xf32>
    %131 = vector.broadcast %94 : vector<1x32xf32> to vector<32x32xf32>
    %132 = arith.mulf %130, %131 : vector<32x32xf32>
    %cst_57 = arith.constant dense<0.000000e+00> : vector<32xf32>
    %133 = vector.multi_reduction <add>, %132, %cst_57 [1] : vector<32x32xf32> to vector<32xf32>
    %134 = vector.shape_cast %133 : vector<32xf32> to vector<32x1xf32>
    %135 = vector.broadcast %134 : vector<32x1xf32> to vector<32x256xf32>
    %136 = vector.broadcast %126 : vector<1x256xf32> to vector<32x256xf32>
    %137 = arith.mulf %135, %136 : vector<32x256xf32>
    %138 = arith.addf %124, %137 : vector<32x256xf32>
    %c1_i32 = arith.constant 1 : i32
    %139 = tpu.dynamic_rotate %89 by %c1_i32 dim 1 : vector<32x256xf32>, i32 -> vector<32x256xf32>
    %140 = vector.extract_strided_slice %95 {offsets = [3, 0], sizes = [1, 256], strides = [1, 1]} : vector<9x256xf32> to vector<1x256xf32>
    %141 = vector.broadcast %140 : vector<1x256xf32> to vector<32x256xf32>
    %142 = arith.mulf %139, %141 : vector<32x256xf32>
    %c3 = arith.constant 3 : index
    %c0_58 = arith.constant 0 : index
    %c0_59 = arith.constant 0 : index
    %143 = vector.load %arg12[%c3, %c0_58, %c0_59] : memref<9x32x32xf32, #tpu.memory_space<vmem>>, vector<1x32x32xf32>
    %144 = vector.shape_cast %143 : vector<1x32x32xf32> to vector<32x32xf32>
    %145 = vector.broadcast %94 : vector<1x32xf32> to vector<32x32xf32>
    %146 = arith.mulf %144, %145 : vector<32x32xf32>
    %cst_60 = arith.constant dense<0.000000e+00> : vector<32xf32>
    %147 = vector.multi_reduction <add>, %146, %cst_60 [1] : vector<32x32xf32> to vector<32xf32>
    %148 = vector.shape_cast %147 : vector<32xf32> to vector<32x1xf32>
    %149 = vector.broadcast %148 : vector<32x1xf32> to vector<32x256xf32>
    %150 = vector.broadcast %140 : vector<1x256xf32> to vector<32x256xf32>
    %151 = arith.mulf %149, %150 : vector<32x256xf32>
    %152 = arith.addf %138, %151 : vector<32x256xf32>
    %153 = vector.extract_strided_slice %95 {offsets = [4, 0], sizes = [1, 256], strides = [1, 1]} : vector<9x256xf32> to vector<1x256xf32>
    %154 = vector.broadcast %153 : vector<1x256xf32> to vector<32x256xf32>
    %155 = arith.mulf %89, %154 : vector<32x256xf32>
    %c4 = arith.constant 4 : index
    %c0_61 = arith.constant 0 : index
    %c0_62 = arith.constant 0 : index
    %156 = vector.load %arg12[%c4, %c0_61, %c0_62] : memref<9x32x32xf32, #tpu.memory_space<vmem>>, vector<1x32x32xf32>
    %157 = vector.shape_cast %156 : vector<1x32x32xf32> to vector<32x32xf32>
    %158 = vector.broadcast %94 : vector<1x32xf32> to vector<32x32xf32>
    %159 = arith.mulf %157, %158 : vector<32x32xf32>
    %cst_63 = arith.constant dense<0.000000e+00> : vector<32xf32>
    %160 = vector.multi_reduction <add>, %159, %cst_63 [1] : vector<32x32xf32> to vector<32xf32>
    %161 = vector.shape_cast %160 : vector<32xf32> to vector<32x1xf32>
    %162 = vector.broadcast %161 : vector<32x1xf32> to vector<32x256xf32>
    %163 = vector.broadcast %153 : vector<1x256xf32> to vector<32x256xf32>
    %164 = arith.mulf %162, %163 : vector<32x256xf32>
    %165 = arith.addf %152, %164 : vector<32x256xf32>
    %c255_i32 = arith.constant 255 : i32
    %166 = tpu.dynamic_rotate %89 by %c255_i32 dim 1 : vector<32x256xf32>, i32 -> vector<32x256xf32>
    %167 = vector.extract_strided_slice %95 {offsets = [5, 0], sizes = [1, 256], strides = [1, 1]} : vector<9x256xf32> to vector<1x256xf32>
    %168 = vector.broadcast %167 : vector<1x256xf32> to vector<32x256xf32>
    %169 = arith.mulf %166, %168 : vector<32x256xf32>
    %c5 = arith.constant 5 : index
    %c0_64 = arith.constant 0 : index
    %c0_65 = arith.constant 0 : index
    %170 = vector.load %arg12[%c5, %c0_64, %c0_65] : memref<9x32x32xf32, #tpu.memory_space<vmem>>, vector<1x32x32xf32>
    %171 = vector.shape_cast %170 : vector<1x32x32xf32> to vector<32x32xf32>
    %172 = vector.broadcast %94 : vector<1x32xf32> to vector<32x32xf32>
    %173 = arith.mulf %171, %172 : vector<32x32xf32>
    %cst_66 = arith.constant dense<0.000000e+00> : vector<32xf32>
    %174 = vector.multi_reduction <add>, %173, %cst_66 [1] : vector<32x32xf32> to vector<32xf32>
    %175 = vector.shape_cast %174 : vector<32xf32> to vector<32x1xf32>
    %176 = vector.broadcast %175 : vector<32x1xf32> to vector<32x256xf32>
    %177 = vector.broadcast %167 : vector<1x256xf32> to vector<32x256xf32>
    %178 = arith.mulf %176, %177 : vector<32x256xf32>
    %179 = arith.addf %165, %178 : vector<32x256xf32>
    %c241_i32 = arith.constant 241 : i32
    %180 = tpu.dynamic_rotate %89 by %c241_i32 dim 1 : vector<32x256xf32>, i32 -> vector<32x256xf32>
    %181 = vector.extract_strided_slice %95 {offsets = [6, 0], sizes = [1, 256], strides = [1, 1]} : vector<9x256xf32> to vector<1x256xf32>
    %182 = vector.broadcast %181 : vector<1x256xf32> to vector<32x256xf32>
    %183 = arith.mulf %180, %182 : vector<32x256xf32>
    %c6 = arith.constant 6 : index
    %c0_67 = arith.constant 0 : index
    %c0_68 = arith.constant 0 : index
    %184 = vector.load %arg12[%c6, %c0_67, %c0_68] : memref<9x32x32xf32, #tpu.memory_space<vmem>>, vector<1x32x32xf32>
    %185 = vector.shape_cast %184 : vector<1x32x32xf32> to vector<32x32xf32>
    %186 = vector.broadcast %94 : vector<1x32xf32> to vector<32x32xf32>
    %187 = arith.mulf %185, %186 : vector<32x32xf32>
    %cst_69 = arith.constant dense<0.000000e+00> : vector<32xf32>
    %188 = vector.multi_reduction <add>, %187, %cst_69 [1] : vector<32x32xf32> to vector<32xf32>
    %189 = vector.shape_cast %188 : vector<32xf32> to vector<32x1xf32>
    %190 = vector.broadcast %189 : vector<32x1xf32> to vector<32x256xf32>
    %191 = vector.broadcast %181 : vector<1x256xf32> to vector<32x256xf32>
    %192 = arith.mulf %190, %191 : vector<32x256xf32>
    %193 = arith.addf %179, %192 : vector<32x256xf32>
    %c240_i32 = arith.constant 240 : i32
    %194 = tpu.dynamic_rotate %89 by %c240_i32 dim 1 : vector<32x256xf32>, i32 -> vector<32x256xf32>
    %195 = vector.extract_strided_slice %95 {offsets = [7, 0], sizes = [1, 256], strides = [1, 1]} : vector<9x256xf32> to vector<1x256xf32>
    %196 = vector.broadcast %195 : vector<1x256xf32> to vector<32x256xf32>
    %197 = arith.mulf %194, %196 : vector<32x256xf32>
    %c7 = arith.constant 7 : index
    %c0_70 = arith.constant 0 : index
    %c0_71 = arith.constant 0 : index
    %198 = vector.load %arg12[%c7, %c0_70, %c0_71] : memref<9x32x32xf32, #tpu.memory_space<vmem>>, vector<1x32x32xf32>
    %199 = vector.shape_cast %198 : vector<1x32x32xf32> to vector<32x32xf32>
    %200 = vector.broadcast %94 : vector<1x32xf32> to vector<32x32xf32>
    %201 = arith.mulf %199, %200 : vector<32x32xf32>
    %cst_72 = arith.constant dense<0.000000e+00> : vector<32xf32>
    %202 = vector.multi_reduction <add>, %201, %cst_72 [1] : vector<32x32xf32> to vector<32xf32>
    %203 = vector.shape_cast %202 : vector<32xf32> to vector<32x1xf32>
    %204 = vector.broadcast %203 : vector<32x1xf32> to vector<32x256xf32>
    %205 = vector.broadcast %195 : vector<1x256xf32> to vector<32x256xf32>
    %206 = arith.mulf %204, %205 : vector<32x256xf32>
    %207 = arith.addf %193, %206 : vector<32x256xf32>
    %c239_i32 = arith.constant 239 : i32
    %208 = tpu.dynamic_rotate %89 by %c239_i32 dim 1 : vector<32x256xf32>, i32 -> vector<32x256xf32>
    %209 = vector.extract_strided_slice %95 {offsets = [8, 0], sizes = [1, 256], strides = [1, 1]} : vector<9x256xf32> to vector<1x256xf32>
    %210 = vector.broadcast %209 : vector<1x256xf32> to vector<32x256xf32>
    %211 = arith.mulf %208, %210 : vector<32x256xf32>
    %c8 = arith.constant 8 : index
    %c0_73 = arith.constant 0 : index
    %c0_74 = arith.constant 0 : index
    %212 = vector.load %arg12[%c8, %c0_73, %c0_74] : memref<9x32x32xf32, #tpu.memory_space<vmem>>, vector<1x32x32xf32>
    %213 = vector.shape_cast %212 : vector<1x32x32xf32> to vector<32x32xf32>
    %214 = vector.broadcast %94 : vector<1x32xf32> to vector<32x32xf32>
    %215 = arith.mulf %213, %214 : vector<32x32xf32>
    %cst_75 = arith.constant dense<0.000000e+00> : vector<32xf32>
    %216 = vector.multi_reduction <add>, %215, %cst_75 [1] : vector<32x32xf32> to vector<32xf32>
    %217 = vector.shape_cast %216 : vector<32xf32> to vector<32x1xf32>
    %218 = vector.broadcast %217 : vector<32x1xf32> to vector<32x256xf32>
    %219 = vector.broadcast %209 : vector<1x256xf32> to vector<32x256xf32>
    %220 = arith.mulf %218, %219 : vector<32x256xf32>
    %221 = arith.addf %207, %220 : vector<32x256xf32>
    %222 = tpu.concatenate %100, %114, %128, %142, %155, %169, %183, %197, %211 in 0 : vector<32x256xf32>, vector<32x256xf32>, vector<32x256xf32>, vector<32x256xf32>, vector<32x256xf32>, vector<32x256xf32>, vector<32x256xf32>, vector<32x256xf32>, vector<32x256xf32> -> vector<288x256xf32>
    %223 = arith.truncf %222 : vector<288x256xf32> to vector<288x256xbf16>
    %c0_76 = arith.constant 0 : index
    %c0_77 = arith.constant 0 : index
    %224 = vector.load %arg14[%c0_76, %c0_77] : memref<32x288xbf16, #tpu.memory_space<vmem>>, vector<32x288xbf16>
    %cst_78 = arith.constant dense<0.000000e+00> : vector<32x256xf32>
    %225 = tpu.matmul %224, %223, %cst_78 {dimension_numbers = #tpu.dot_dimension_numbers<[1], [0], [0], [1], [0, 0, 1, 1], [], []>} : vector<32x288xbf16>, vector<288x256xbf16>, vector<32x256xf32> -> vector<32x256xf32>
    %226 = arith.addf %225, %221 : vector<32x256xf32>
    %c0_79 = arith.constant 0 : index
    %c0_80 = arith.constant 0 : index
    %227 = vector.load %arg15[%c0_79, %c0_80] : memref<32x1xf32, #tpu.memory_space<vmem>>, vector<32x1xf32>
    %228 = vector.broadcast %227 : vector<32x1xf32> to vector<32x256xf32>
    %229 = arith.mulf %226, %228 : vector<32x256xf32>
    %c0_81 = arith.constant 0 : index
    %c0_82 = arith.constant 0 : index
    %230 = vector.load %arg16[%c0_81, %c0_82] : memref<32x1xf32, #tpu.memory_space<vmem>>, vector<32x1xf32>
    %231 = vector.broadcast %230 : vector<32x1xf32> to vector<32x256xf32>
    %232 = arith.addf %229, %231 : vector<32x256xf32>
    %cst_83 = arith.constant 0.000000e+00 : f32
    %233 = vector.broadcast %cst_83 : f32 to vector<32x256xf32>
    %234 = arith.maximumf %232, %233 : vector<32x256xf32>
    %c0_84 = arith.constant 0 : index
    %c0_85 = arith.constant 0 : index
    %c0_86 = arith.constant 0 : index
    %235 = vector.load %arg17[%c0_84, %c0_85, %c0_86] : memref<1x32x256xf32, #tpu.memory_space<vmem>>, vector<1x32x256xf32>
    %236 = vector.shape_cast %235 : vector<1x32x256xf32> to vector<32x256xf32>
    %237 = vector.shape_cast %234 : vector<32x256xf32> to vector<1x32x256xf32>
    tpu.vector_store %arg17[%c0_84, %c0_85, %c0_86], %237 {strides = array<i32>} : memref<1x32x256xf32, #tpu.memory_space<vmem>>, vector<1x32x256xf32>,
    return
  }
  func.func @transform_0(%arg0: i32) -> (i32, i32, i32) {
    %c0_i32 = arith.constant 0 : i32
    %c0_i32_0 = arith.constant 0 : i32
    %c0_i32_1 = arith.constant 0 : i32
    return %arg0, %c0_i32, %c0_i32_0 : i32, i32, i32
  }
  func.func @transform_1(%arg0: i32) -> (i32, i32, i32) {
    %c0_i32 = arith.constant 0 : i32
    %c0_i32_0 = arith.constant 0 : i32
    %c0_i32_1 = arith.constant 0 : i32
    return %arg0, %c0_i32, %c0_i32_0 : i32, i32, i32
  }
  func.func @transform_2(%arg0: i32) -> (i32, i32, i32) {
    %c0_i32 = arith.constant 0 : i32
    %c0_i32_0 = arith.constant 0 : i32
    %c0_i32_1 = arith.constant 0 : i32
    return %arg0, %c0_i32, %c0_i32_0 : i32, i32, i32
  }
  func.func @transform_3(%arg0: i32) -> (i32, i32) {
    %c0_i32 = arith.constant 0 : i32
    %c0_i32_0 = arith.constant 0 : i32
    %c0_i32_1 = arith.constant 0 : i32
    return %c0_i32, %c0_i32_0 : i32, i32
  }
  func.func @transform_4(%arg0: i32) -> (i32, i32) {
    %c0_i32 = arith.constant 0 : i32
    %c0_i32_0 = arith.constant 0 : i32
    %c0_i32_1 = arith.constant 0 : i32
    return %c0_i32, %c0_i32_0 : i32, i32
  }
  func.func @transform_5(%arg0: i32) -> (i32, i32) {
    %c0_i32 = arith.constant 0 : i32
    %c0_i32_0 = arith.constant 0 : i32
    %c0_i32_1 = arith.constant 0 : i32
    return %c0_i32, %c0_i32_0 : i32, i32
  }
  func.func @transform_6(%arg0: i32) -> (i32, i32) {
    %c0_i32 = arith.constant 0 : i32
    %c0_i32_0 = arith.constant 0 : i32
    %c0_i32_1 = arith.constant 0 : i32
    return %c0_i32, %c0_i32_0 : i32, i32
  }
  func.func @transform_7(%arg0: i32) -> i32 {
    %c0_i32 = arith.constant 0 : i32
    %c0_i32_0 = arith.constant 0 : i32
    return %c0_i32 : i32
  }
  func.func @transform_8(%arg0: i32) -> (i32, i32) {
    %c0_i32 = arith.constant 0 : i32
    %c0_i32_0 = arith.constant 0 : i32
    %c0_i32_1 = arith.constant 0 : i32
    return %c0_i32, %c0_i32_0 : i32, i32
  }
  func.func @transform_9(%arg0: i32) -> (i32, i32) {
    %c0_i32 = arith.constant 0 : i32
    %c0_i32_0 = arith.constant 0 : i32
    %c0_i32_1 = arith.constant 0 : i32
    return %c0_i32, %c0_i32_0 : i32, i32
  }
  func.func @transform_10(%arg0: i32) -> (i32, i32) {
    %c0_i32 = arith.constant 0 : i32
    %c0_i32_0 = arith.constant 0 : i32
    %c0_i32_1 = arith.constant 0 : i32
    return %c0_i32, %c0_i32_0 : i32, i32
  }
  func.func @transform_11(%arg0: i32) -> (i32, i32, i32) {
    %c0_i32 = arith.constant 0 : i32
    %c0_i32_0 = arith.constant 0 : i32
    %c0_i32_1 = arith.constant 0 : i32
    %c0_i32_2 = arith.constant 0 : i32
    return %c0_i32, %c0_i32_0, %c0_i32_1 : i32, i32, i32
  }
  func.func @transform_12(%arg0: i32) -> (i32, i32) {
    %c0_i32 = arith.constant 0 : i32
    %c0_i32_0 = arith.constant 0 : i32
    %c0_i32_1 = arith.constant 0 : i32
    return %c0_i32, %c0_i32_0 : i32, i32
  }
  func.func @transform_13(%arg0: i32) -> (i32, i32) {
    %c0_i32 = arith.constant 0 : i32
    %c0_i32_0 = arith.constant 0 : i32
    %c0_i32_1 = arith.constant 0 : i32
    return %c0_i32, %c0_i32_0 : i32, i32
  }
  func.func @transform_14(%arg0: i32) -> (i32, i32) {
    %c0_i32 = arith.constant 0 : i32
    %c0_i32_0 = arith.constant 0 : i32
    %c0_i32_1 = arith.constant 0 : i32
    return %c0_i32, %c0_i32_0 : i32, i32
  }
  func.func @transform_15(%arg0: i32) -> (i32, i32) {
    %c0_i32 = arith.constant 0 : i32
    %c0_i32_0 = arith.constant 0 : i32
    %c0_i32_1 = arith.constant 0 : i32
    return %c0_i32, %c0_i32_0 : i32, i32
  }
  func.func @transform_16(%arg0: i32) -> (i32, i32, i32) {
    %c0_i32 = arith.constant 0 : i32
    %c0_i32_0 = arith.constant 0 : i32
    %c0_i32_1 = arith.constant 0 : i32
    return %arg0, %c0_i32, %c0_i32_0 : i32, i32, i32
  }
}

</mosaic_0001>

<bundles_post_ra>
// kernel: tile.18
= control target key start
LH: loop header
LB: loop body
LE: loop exit
PB: predicated region body
PF: predicated region fallthrough
CT: control target
= control target key end

     0   :  { %s22_s0 = inlined_call_operand.vmem [shape: f32[32], index: 0, kind: input, shape index: {}]   ;;  %s23_s1 = inlined_call_operand.vmem [shape: f32[3,32], index: 1, kind: output, shape index: {}]  }
   0x1   :  { %v4_v0 = vld [vmem:[%s22_s0] ss:$0 sm:$0xff] }
   0x2   :  { %5 = vst [vmem:[%s23_s1] sm:$0xf] %v4_v0 }

// kernel: tile.0
= control target key start
LH: loop header
LB: loop body
LE: loop exit
PB: predicated region body
PF: predicated region fallthrough
CT: control target
= control target key end

     0   :  { %s451_s8 = smov 125   ;;  %s452_s9 = smov 126   ;;  %vm8_vm0 = vcmask 7168   ;;  %s878_s0 = inlined_call_operand.vmem [shape: f32[3,32], index: 0, kind: input, shape index: {}]   ;;  %s879_s1 = inlined_call_operand.vmem [shape: f32[96,1], index: 1, kind: output, shape index: {}]  }
   0x1   :  { %v5_v0 = vld [vmem:[%s878_s0] sm:$0xf]  ;;  %s450_s0 = smov 127   ;;  %s453_s10 = smov 124  }
   0x2   :  { %6 = vst [vmem:[#allocation0] sm:$0xf] %v5_v0  ;;  %s454_s11 = smov 123   ;;  %s455_s12 = smov 122  }
   0x3   :  { %s456_s13 = smov 121   ;;  %s457_s14 = smov 120  }
   0x4   :  { %s458_s15 = smov 119   ;;  %s459_s16 = smov 118  }
   0x5   :  { %s460_s17 = smov 117   ;;  %s461_s18 = smov 116  }
   0x6   :  { %s462_s19 = smov 115   ;;  %s463_s20 = smov 114  }
   0x7   :  { %s464_s21 = smov 113   ;;  %s465_s22 = smov 112  }
   0x8   :  { %s466_s23 = smov 111   ;;  %s467_s24 = smov 110  }
   0x9   :  { %v14_v1 = vld [vmem:[#allocation0] sm:$0x7]   ;;  %s468_s25 = smov 109   ;;  %s469_s26 = smov 108  }
   0xa   :  { %v34_v2 = vld [vmem:[#allocation0] sm:$0x7]   ;;  %15 = vrot.lane.b32.xlu0 %v14_v1, %s450_s0  ;;  %s470_s27 = smov 107   ;;  %s471_s28 = smov 106  }
   0xb   :  { %35 = vrot.lane.b32.xlu1 %v34_v2, %s451_s8  ;;  %v24_v3 = vld [vmem:[#allocation0] sm:$0x7]   ;;  %s472_s29 = smov 105   ;;  %s473_s30 = smov 104  }
   0xc   :  { %v44_v4 = vld [vmem:[#allocation0] sm:$0x7]   ;;  %s474_s0 = smov 103   ;;  %s475_s8 = smov 102  }
   0xd   :  { %v54_v5 = vld [vmem:[#allocation0] sm:$0x7]  }
   0xe   :  { %25 = vrot.lane.b32.xlu0 %v24_v3, %s452_s9  ;;  %v64_v6 = vld [vmem:[#allocation0] sm:$0x7]   ;;  %s476_s9 = smov 101  }
   0xf   :  { %45 = vrot.lane.b32.xlu1 %v44_v4, %s453_s10  ;;  %v74_v7 = vld [vmem:[#allocation0] sm:$0x7]   ;;  %s477_s10 = smov 100  }
  0x10   :  { %v84_v8 = vld [vmem:[#allocation0] sm:$0x7]  }
  0x11   :  { %v94_v9 = vld [vmem:[#allocation0] sm:$0x7]  }
  0x12   :  { %55 = vrot.lane.b32.xlu0 %v54_v5, %s454_s11  ;;  %v104_v10 = vld [vmem:[#allocation0] sm:$0x7]   ;;  %s478_s11 = smov 99  }
  0x13   :  { %65 = vrot.lane.b32.xlu1 %v64_v6, %s455_s12  ;;  %v114_v11 = vld [vmem:[#allocation0] sm:$0x7]   ;;  %s479_s12 = smov 98  }
  0x14   :  { %v124_v12 = vld [vmem:[#allocation0] sm:$0x7]  }
  0x15   :  { %v134_v13 = vld [vmem:[#allocation0] sm:$0x7]  }
  0x16   :  { %75 = vrot.lane.b32.xlu0 %v74_v7, %s456_s13  ;;  %v144_v14 = vld [vmem:[#allocation0] sm:$0x7]   ;;  %s480_s13 = smov 97  }
  0x17   :  { %85 = vrot.lane.b32.xlu1 %v84_v8, %s457_s14  ;;  %v154_v15 = vld [vmem:[#allocation0] sm:$0x7]  }
  0x18   :  { %v164_v16 = vld [vmem:[#allocation0] sm:$0x7]  }
  0x19   :  { %v174_v17 = vld [vmem:[#allocation0] sm:$0x7]  }
  0x1a   :  { %95 = vrot.lane.b32.xlu0 %v94_v9, %s458_s15  ;;  %v184_v18 = vld [vmem:[#allocation0] sm:$0x7]  }
  0x1b   :  { %105 = vrot.lane.b32.xlu1 %v104_v10, %s459_s16  ;;  %v194_v19 = vld [vmem:[#allocation0] sm:$0x7]  }
  0x1c   :  { %v204_v20 = vld [vmem:[#allocation0] sm:$0x7]  }
  0x1d   :  { %v214_v21 = vld [vmem:[#allocation0] sm:$0x7]  }
  0x1e   :  { %115 = vrot.lane.b32.xlu0 %v114_v11, %s460_s17  ;;  %v224_v22 = vld [vmem:[#allocation0] sm:$0x7]  }
  0x1f   :  { %125 = vrot.lane.b32.xlu1 %v124_v12, %s461_s18  ;;  %v234_v23 = vld [vmem:[#allocation0] sm:$0x7]  }
  0x20   :  { %v244_v24 = vld [vmem:[#allocation0] sm:$0x7]  }
  0x21   :  { %v254_v25 = vld [vmem:[#allocation0] sm:$0x7]  }
  0x22   :  { %135 = vrot.lane.b32.xlu0 %v134_v13, %s462_s19  ;;  %v264_v26 = vld [vmem:[#allocation0] sm:$0x7]  }
  0x23   :  { %145 = vrot.lane.b32.xlu1 %v144_v14, %s463_s20  ;;  %v7_v27 = vld [vmem:[#allocation0] sm:$0x7]  }
  0x24   :  { %9 = vst.msk [vmem:[%s879_s1] sm:$0x1] %vm8_vm0, %v7_v27   ;;  %324 = vst.msk [vmem:[%s879_s1 + $0x1f] sm:$0x2] %vm8_vm0, %v7_v27   ;;  %v274_v28 = vld [vmem:[#allocation0] sm:$0x7]  }
  0x25   :  { %325 = vst.msk [vmem:[%s879_s1 + $0x3e] sm:$0x4] %vm8_vm0, %v7_v27   ;;  %v284_v29 = vld [vmem:[#allocation0] sm:$0x7]  }
  0x26   :  { %155 = vrot.lane.b32.xlu0 %v154_v15, %s464_s21  ;;  %v294_v30 = vld [vmem:[#allocation0] sm:$0x7]  }
  0x27   :  { %165 = vrot.lane.b32.xlu1 %v164_v16, %s465_s22  ;;  %v304_v31 = vld [vmem:[#allocation0] sm:$0x7]  }
  0x28   :  { %v314_v32 = vld [vmem:[#allocation0] sm:$0x7]  }
  0x2a   :  { %175 = vrot.lane.b32.xlu0 %v174_v17, %s466_s23 }
  0x2b   :  { %185 = vrot.lane.b32.xlu1 %v184_v18, %s467_s24 }
  0x2e   :  { %195 = vrot.lane.b32.xlu0 %v194_v19, %s468_s25 }
  0x2f   :  { %205 = vrot.lane.b32.xlu1 %v204_v20, %s469_s26 }
  0x32   :  { %215 = vrot.lane.b32.xlu0 %v214_v21, %s470_s27 }
  0x33   :  { %225 = vrot.lane.b32.xlu1 %v224_v22, %s471_s28 }
  0x36   :  { %235 = vrot.lane.b32.xlu0 %v234_v23, %s472_s29 }
  0x37   :  { %245 = vrot.lane.b32.xlu1 %v244_v24, %s473_s30 }
  0x3a   :  { %255 = vrot.lane.b32.xlu0 %v254_v25, %s474_s0 }
  0x3b   :  { %265 = vrot.lane.b32.xlu1 %v264_v26, %s475_s8 }
  0x3e   :  { %275 = vrot.lane.b32.xlu0 %v274_v28, %s476_s9 }
  0x3f   :  { %285 = vrot.lane.b32.xlu1 %v284_v29, %s477_s10 }
  0x42   :  { %295 = vrot.lane.b32.xlu0 %v294_v30, %s478_s11 }
  0x43   :  { %305 = vrot.lane.b32.xlu1 %v304_v31, %s479_s12 }
  0x46   :  { %315 = vrot.lane.b32.xlu0 %v314_v32, %s480_s13 }
  0x7c   :  { %v16_v33 = vpop.permute.xlu0 %15  }
  0x7d   :  { %v36_v34 = vpop.permute.xlu1 %35   ;;  %326 = vst.msk [vmem:[%s879_s1 + $0x1] sm:$0x1] %vm8_vm0, %v16_v33   ;;  %327 = vst.msk [vmem:[%s879_s1 + $0x20] sm:$0x2] %vm8_vm0, %v16_v33  }
  0x7e   :  { %328 = vst.msk [vmem:[%s879_s1 + $0x3f] sm:$0x4] %vm8_vm0, %v16_v33   ;;  %332 = vst.msk [vmem:[%s879_s1 + $0x3] sm:$0x1] %vm8_vm0, %v36_v34  }
  0x7f   :  { %333 = vst.msk [vmem:[%s879_s1 + $0x22] sm:$0x2] %vm8_vm0, %v36_v34   ;;  %334 = vst.msk [vmem:[%s879_s1 + $0x41] sm:$0x4] %vm8_vm0, %v36_v34  }
  0x80   :  { %v26_v35 = vpop.permute.xlu0 %25  }
  0x81   :  { %v46_v36 = vpop.permute.xlu1 %45   ;;  %329 = vst.msk [vmem:[%s879_s1 + $0x2] sm:$0x1] %vm8_vm0, %v26_v35   ;;  %330 = vst.msk [vmem:[%s879_s1 + $0x21] sm:$0x2] %vm8_vm0, %v26_v35  }
  0x82   :  { %331 = vst.msk [vmem:[%s879_s1 + $0x40] sm:$0x4] %vm8_vm0, %v26_v35   ;;  %335 = vst.msk [vmem:[%s879_s1 + $0x4] sm:$0x1] %vm8_vm0, %v46_v36  }
  0x83   :  { %336 = vst.msk [vmem:[%s879_s1 + $0x23] sm:$0x2] %vm8_vm0, %v46_v36   ;;  %337 = vst.msk [vmem:[%s879_s1 + $0x42] sm:$0x4] %vm8_vm0, %v46_v36  }
  0x84   :  { %v56_v37 = vpop.permute.xlu0 %55  }
  0x85   :  { %v66_v38 = vpop.permute.xlu1 %65   ;;  %338 = vst.msk [vmem:[%s879_s1 + $0x5] sm:$0x1] %vm8_vm0, %v56_v37   ;;  %339 = vst.msk [vmem:[%s879_s1 + $0x24] sm:$0x2] %vm8_vm0, %v56_v37  }
  0x86   :  { %340 = vst.msk [vmem:[%s879_s1 + $0x43] sm:$0x4] %vm8_vm0, %v56_v37   ;;  %341 = vst.msk [vmem:[%s879_s1 + $0x6] sm:$0x1] %vm8_vm0, %v66_v38  }
  0x87   :  { %342 = vst.msk [vmem:[%s879_s1 + $0x25] sm:$0x2] %vm8_vm0, %v66_v38   ;;  %343 = vst.msk [vmem:[%s879_s1 + $0x44] sm:$0x4] %vm8_vm0, %v66_v38  }
  0x88   :  { %v76_v39 = vpop.permute.xlu0 %75  }
  0x89   :  { %v86_v40 = vpop.permute.xlu1 %85   ;;  %344 = vst.msk [vmem:[%s879_s1 + $0x7] sm:$0x1] %vm8_vm0, %v76_v39   ;;  %345 = vst.msk [vmem:[%s879_s1 + $0x26] sm:$0x2] %vm8_vm0, %v76_v39  }
  0x8a   :  { %346 = vst.msk [vmem:[%s879_s1 + $0x45] sm:$0x4] %vm8_vm0, %v76_v39   ;;  %347 = vst.msk [vmem:[%s879_s1 + $0x8] sm:$0x1] %vm8_vm0, %v86_v40  }
  0x8b   :  { %348 = vst.msk [vmem:[%s879_s1 + $0x27] sm:$0x2] %vm8_vm0, %v86_v40   ;;  %349 = vst.msk [vmem:[%s879_s1 + $0x46] sm:$0x4] %vm8_vm0, %v86_v40  }
  0x8c   :  { %v96_v41 = vpop.permute.xlu0 %95  }
  0x8d   :  { %v106_v42 = vpop.permute.xlu1 %105   ;;  %350 = vst.msk [vmem:[%s879_s1 + $0x9] sm:$0x1] %vm8_vm0, %v96_v41   ;;  %351 = vst.msk [vmem:[%s879_s1 + $0x28] sm:$0x2] %vm8_vm0, %v96_v41  }
  0x8e   :  { %352 = vst.msk [vmem:[%s879_s1 + $0x47] sm:$0x4] %vm8_vm0, %v96_v41   ;;  %353 = vst.msk [vmem:[%s879_s1 + $0xa] sm:$0x1] %vm8_vm0, %v106_v42  }
  0x8f   :  { %354 = vst.msk [vmem:[%s879_s1 + $0x29] sm:$0x2] %vm8_vm0, %v106_v42   ;;  %355 = vst.msk [vmem:[%s879_s1 + $0x48] sm:$0x4] %vm8_vm0, %v106_v42  }
  0x90   :  { %v116_v43 = vpop.permute.xlu0 %115  }
  0x91   :  { %v126_v44 = vpop.permute.xlu1 %125   ;;  %356 = vst.msk [vmem:[%s879_s1 + $0xb] sm:$0x1] %vm8_vm0, %v116_v43   ;;  %357 = vst.msk [vmem:[%s879_s1 + $0x2a] sm:$0x2] %vm8_vm0, %v116_v43  }
  0x92   :  { %358 = vst.msk [vmem:[%s879_s1 + $0x49] sm:$0x4] %vm8_vm0, %v116_v43   ;;  %359 = vst.msk [vmem:[%s879_s1 + $0xc] sm:$0x1] %vm8_vm0, %v126_v44  }
  0x93   :  { %360 = vst.msk [vmem:[%s879_s1 + $0x2b] sm:$0x2] %vm8_vm0, %v126_v44   ;;  %361 = vst.msk [vmem:[%s879_s1 + $0x4a] sm:$0x4] %vm8_vm0, %v126_v44  }
  0x94   :  { %v136_v45 = vpop.permute.xlu0 %135  }
  0x95   :  { %v146_v46 = vpop.permute.xlu1 %145   ;;  %362 = vst.msk [vmem:[%s879_s1 + $0xd] sm:$0x1] %vm8_vm0, %v136_v45   ;;  %363 = vst.msk [vmem:[%s879_s1 + $0x2c] sm:$0x2] %vm8_vm0, %v136_v45  }
  0x96   :  { %364 = vst.msk [vmem:[%s879_s1 + $0x4b] sm:$0x4] %vm8_vm0, %v136_v45   ;;  %365 = vst.msk [vmem:[%s879_s1 + $0xe] sm:$0x1] %vm8_vm0, %v146_v46  }
  0x97   :  { %366 = vst.msk [vmem:[%s879_s1 + $0x2d] sm:$0x2] %vm8_vm0, %v146_v46   ;;  %367 = vst.msk [vmem:[%s879_s1 + $0x4c] sm:$0x4] %vm8_vm0, %v146_v46  }
  0x98   :  { %v156_v47 = vpop.permute.xlu0 %155  }
  0x99   :  { %v166_v48 = vpop.permute.xlu1 %165   ;;  %368 = vst.msk [vmem:[%s879_s1 + $0xf] sm:$0x1] %vm8_vm0, %v156_v47   ;;  %369 = vst.msk [vmem:[%s879_s1 + $0x2e] sm:$0x2] %vm8_vm0, %v156_v47  }
  0x9a   :  { %370 = vst.msk [vmem:[%s879_s1 + $0x4d] sm:$0x4] %vm8_vm0, %v156_v47   ;;  %371 = vst.msk [vmem:[%s879_s1 + $0x10] sm:$0x1] %vm8_vm0, %v166_v48  }
  0x9b   :  { %372 = vst.msk [vmem:[%s879_s1 + $0x2f] sm:$0x2] %vm8_vm0, %v166_v48   ;;  %373 = vst.msk [vmem:[%s879_s1 + $0x4e] sm:$0x4] %vm8_vm0, %v166_v48  }
  0x9c   :  { %v176_v49 = vpop.permute.xlu0 %175  }
  0x9d   :  { %v186_v50 = vpop.permute.xlu1 %185   ;;  %374 = vst.msk [vmem:[%s879_s1 + $0x11] sm:$0x1] %vm8_vm0, %v176_v49   ;;  %375 = vst.msk [vmem:[%s879_s1 + $0x30] sm:$0x2] %vm8_vm0, %v176_v49  }
  0x9e   :  { %376 = vst.msk [vmem:[%s879_s1 + $0x4f] sm:$0x4] %vm8_vm0, %v176_v49   ;;  %377 = vst.msk [vmem:[%s879_s1 + $0x12] sm:$0x1] %vm8_vm0, %v186_v50  }
  0x9f   :  { %378 = vst.msk [vmem:[%s879_s1 + $0x31] sm:$0x2] %vm8_vm0, %v186_v50   ;;  %379 = vst.msk [vmem:[%s879_s1 + $0x50] sm:$0x4] %vm8_vm0, %v186_v50  }
  0xa0   :  { %v196_v51 = vpop.permute.xlu0 %195  }
  0xa1   :  { %v206_v52 = vpop.permute.xlu1 %205   ;;  %380 = vst.msk [vmem:[%s879_s1 + $0x13] sm:$0x1] %vm8_vm0, %v196_v51   ;;  %381 = vst.msk [vmem:[%s879_s1 + $0x32] sm:$0x2] %vm8_vm0, %v196_v51  }
  0xa2   :  { %382 = vst.msk [vmem:[%s879_s1 + $0x51] sm:$0x4] %vm8_vm0, %v196_v51   ;;  %383 = vst.msk [vmem:[%s879_s1 + $0x14] sm:$0x1] %vm8_vm0, %v206_v52  }
  0xa3   :  { %384 = vst.msk [vmem:[%s879_s1 + $0x33] sm:$0x2] %vm8_vm0, %v206_v52   ;;  %385 = vst.msk [vmem:[%s879_s1 + $0x52] sm:$0x4] %vm8_vm0, %v206_v52  }
  0xa4   :  { %v216_v53 = vpop.permute.xlu0 %215  }
  0xa5   :  { %v226_v54 = vpop.permute.xlu1 %225   ;;  %386 = vst.msk [vmem:[%s879_s1 + $0x15] sm:$0x1] %vm8_vm0, %v216_v53   ;;  %387 = vst.msk [vmem:[%s879_s1 + $0x34] sm:$0x2] %vm8_vm0, %v216_v53  }
  0xa6   :  { %388 = vst.msk [vmem:[%s879_s1 + $0x53] sm:$0x4] %vm8_vm0, %v216_v53   ;;  %389 = vst.msk [vmem:[%s879_s1 + $0x16] sm:$0x1] %vm8_vm0, %v226_v54  }
  0xa7   :  { %390 = vst.msk [vmem:[%s879_s1 + $0x35] sm:$0x2] %vm8_vm0, %v226_v54   ;;  %391 = vst.msk [vmem:[%s879_s1 + $0x54] sm:$0x4] %vm8_vm0, %v226_v54  }
  0xa8   :  { %v236_v55 = vpop.permute.xlu0 %235  }
  0xa9   :  { %v246_v56 = vpop.permute.xlu1 %245   ;;  %392 = vst.msk [vmem:[%s879_s1 + $0x17] sm:$0x1] %vm8_vm0, %v236_v55   ;;  %393 = vst.msk [vmem:[%s879_s1 + $0x36] sm:$0x2] %vm8_vm0, %v236_v55  }
  0xaa   :  { %394 = vst.msk [vmem:[%s879_s1 + $0x55] sm:$0x4] %vm8_vm0, %v236_v55   ;;  %395 = vst.msk [vmem:[%s879_s1 + $0x18] sm:$0x1] %vm8_vm0, %v246_v56  }
  0xab   :  { %396 = vst.msk [vmem:[%s879_s1 + $0x37] sm:$0x2] %vm8_vm0, %v246_v56   ;;  %397 = vst.msk [vmem:[%s879_s1 + $0x56] sm:$0x4] %vm8_vm0, %v246_v56  }
  0xac   :  { %v256_v57 = vpop.permute.xlu0 %255  }
  0xad   :  { %v266_v58 = vpop.permute.xlu1 %265   ;;  %398 = vst.msk [vmem:[%s879_s1 + $0x19] sm:$0x1] %vm8_vm0, %v256_v57   ;;  %399 = vst.msk [vmem:[%s879_s1 + $0x38] sm:$0x2] %vm8_vm0, %v256_v57  }
  0xae   :  { %400 = vst.msk [vmem:[%s879_s1 + $0x57] sm:$0x4] %vm8_vm0, %v256_v57   ;;  %401 = vst.msk [vmem:[%s879_s1 + $0x1a] sm:$0x1] %vm8_vm0, %v266_v58  }
  0xaf   :  { %402 = vst.msk [vmem:[%s879_s1 + $0x39] sm:$0x2] %vm8_vm0, %v266_v58   ;;  %403 = vst.msk [vmem:[%s879_s1 + $0x58] sm:$0x4] %vm8_vm0, %v266_v58  }
  0xb0   :  { %v276_v59 = vpop.permute.xlu0 %275  }
  0xb1   :  { %v286_v60 = vpop.permute.xlu1 %285   ;;  %404 = vst.msk [vmem:[%s879_s1 + $0x1b] sm:$0x1] %vm8_vm0, %v276_v59   ;;  %405 = vst.msk [vmem:[%s879_s1 + $0x3a] sm:$0x2] %vm8_vm0, %v276_v59  }
  0xb2   :  { %406 = vst.msk [vmem:[%s879_s1 + $0x59] sm:$0x4] %vm8_vm0, %v276_v59   ;;  %407 = vst.msk [vmem:[%s879_s1 + $0x1c] sm:$0x1] %vm8_vm0, %v286_v60  }
  0xb3   :  { %408 = vst.msk [vmem:[%s879_s1 + $0x3b] sm:$0x2] %vm8_vm0, %v286_v60   ;;  %409 = vst.msk [vmem:[%s879_s1 + $0x5a] sm:$0x4] %vm8_vm0, %v286_v60  }
  0xb4   :  { %v296_v61 = vpop.permute.xlu0 %295  }
  0xb5   :  { %v306_v62 = vpop.permute.xlu1 %305   ;;  %410 = vst.msk [vmem:[%s879_s1 + $0x1d] sm:$0x1] %vm8_vm0, %v296_v61   ;;  %411 = vst.msk [vmem:[%s879_s1 + $0x3c] sm:$0x2] %vm8_vm0, %v296_v61  }
  0xb6   :  { %412 = vst.msk [vmem:[%s879_s1 + $0x5b] sm:$0x4] %vm8_vm0, %v296_v61   ;;  %413 = vst.msk [vmem:[%s879_s1 + $0x1e] sm:$0x1] %vm8_vm0, %v306_v62  }
  0xb7   :  { %414 = vst.msk [vmem:[%s879_s1 + $0x3d] sm:$0x2] %vm8_vm0, %v306_v62   ;;  %415 = vst.msk [vmem:[%s879_s1 + $0x5c] sm:$0x4] %vm8_vm0, %v306_v62  }
  0xb8   :  { %v316_v63 = vpop.permute.xlu0 %315  }
  0xb9   :  { %416 = vst.msk [vmem:[%s879_s1 + $0x1f] sm:$0x1] %vm8_vm0, %v316_v63   ;;  %417 = vst.msk [vmem:[%s879_s1 + $0x3e] sm:$0x2] %vm8_vm0, %v316_v63  }
  0xba   :  { %418 = vst.msk [vmem:[%s879_s1 + $0x5d] sm:$0x4] %vm8_vm0, %v316_v63  }

// kernel: mbsca_forward.1
= control target key start
LH: loop header
LB: loop body
LE: loop exit
PB: predicated region body
PF: predicated region fallthrough
CT: control target
= control target key end

     0   :  { %s4579_s0 = inlined_call_operand.vmem [shape: f32[2,32,256], index: 0, kind: input, shape index: {}]   ;;  %s4580_s1 = inlined_call_operand.vmem [shape: f32[2,32,256], index: 1, kind: input, shape index: {}]   ;;  %s4581_s2 = inlined_call_operand.vmem [shape: f32[2,32,256], index: 2, kind: input, shape index: {}]   ;;  %s4582_s3 = inlined_call_operand.vmem [shape: bf16[96,96], index: 3, kind: input, shape index: {}]   ;;  %s4583_s4 = inlined_call_operand.vmem [shape: f32[96,1], index: 4, kind: input, shape index: {}]   ;;  %s4584_s5 = inlined_call_operand.vmem [shape: f32[96,1], index: 5, kind: input, shape index: {}]   ;;  %s4585_s6 = inlined_call_operand.vmem [shape: f32[512,256], index: 6, kind: input, shape index: {}]   ;;  %s4586_s7 = inlined_call_operand.vmem [shape: f32[2], index: 7, kind: input, shape index: {}]   ;;  %s4587_s8 = inlined_call_operand.vmem [shape: f32[32,2], index: 8, kind: input, shape index: {}]   ;;  %s4588_s9 = inlined_call_operand.vmem [shape: f32[32,2], index: 9, kind: input, shape index: {}]   ;;  %s4589_s10 = inlined_call_operand.vmem [shape: f32[64,32], index: 10, kind: input, shape index: {}]   ;;  %s4590_s11 = inlined_call_operand.vmem [shape: f32[9,32,32], index: 11, kind: input, shape index: {}]   ;;  %s4591_s12 = inlined_call_operand.vmem [shape: f32[9,256], index: 12, kind: input, shape index: {}]   ;;  %s4592_s13 = inlined_call_operand.vmem [shape: bf16[32,288], index: 13, kind: input, shape index: {}]   ;;  %s4593_s14 = inlined_call_operand.vmem [shape: f32[32,1], index: 14, kind: input, shape index: {}]   ;;  %s4594_s15 = inlined_call_operand.vmem [shape: f32[32,1], index: 15, kind: input, shape index: {}]   ;;  %s4595_s16 = inlined_call_operand.vmem [shape: f32[2,32,256], index: 16, kind: output, shape index: {}]  }
   0x1   :  { %4597 = sst [smem:[#allocation6_spill]] %s4579_s0 }
   0x2   :  { %21 = vsyncpa [#allocation3], 0  ;;  %s2928_s21 = smov 0  }
   0x3 LB: > { %s2656_s22 = sadd.s32 4294967295, %s2831_s21   ;;  %p2658_p0 = scmp.ge.s32.totalorder %s2831_s21, 1  ;;  %s2831_s21 = sphi %s2928_s21, %s27_s21  }
   0x4   : > { %p409_p1 = scmp.lt.s32.totalorder %s2831_s21, 3  ;;  %s434_s25 = sshll.u32 %s4586_s7, 4  ;;  %s435_s25 = int_to_ptr.vmem [resolvable:$true] %s434_s25 }
   0x5   : > { %p2746_p3 = scmp.eq.s32.totalorder %s2656_s22, 0  ;;  %s2806_s27 = scalar_lea.vmem %s435_s25, 16 }
   0x6   : > { %p2939_p2 = pnand %p2658_p0, %p409_p1  ;;  %p2807_p6 = scmp.ne.s32.totalorder %s435_s25, %s2806_s27 }
   0x7   : > { %p2814_p10 = scmp.lt.s32.totalorder %s435_s25, %s435_s25  ;;  %p2815_p11 = scmp.lt.s32.totalorder %s2806_s27, %s2806_s27 }
   0x8   : > { %p2742_p4 = pneg %p2939_p2 }
   0x9   : > { %p2816_p12 = por %p2815_p11, %p2814_p10 }
   0xa   : > { %p2743_p5 = pnand %p2746_p3, %p2742_p4 }
   0xc   : > { %p2808_p7 = pneg %p2743_p5 }
   0xe   : > { %p2809_p8 = pnand %p2808_p7, %p2807_p6 }
  0x10   : > { %p2810_p9 = pneg %p2809_p8 }
  0x12   : > { %p2817_p13 = pnand %p2816_p12, %p2810_p9 }
  0x14   : > { %2820 = shalt.err (!%p2817_p13)
}
  0x15   : > { %s2833_s28 = smov [#allocation2]   ;;  %495 = sbr.rel (%p2939_p2) target bundleno = 1179 (0x49b), region = 84 }
  0x16   : > { %2745 = dma.vmem_to_smem (!%p2743_p5), %s435_s25, 16, %s2833_s28, [#allocation3]  }
  0x1a   : > { %2826 = dma.done.wait (%p2746_p3), [#allocation3], 16  }
  0x1b   : > { %2828 = vsyncadd (%p2746_p3), [#allocation3], 4294967280 }
  0x1c   : > { %501 = sfence }
  0x1d   : > { %p556_p0 = scmp.lt.s32.totalorder %s2656_s22, 1  ;;  %v2834_v0 = vmov 0   ;;  %v775_v1 = vld [vmem:[%s4583_s4 + $0x40] sm:$0xff]  ;;  %s4599_s28 = sld [smem:[#allocation6_spill]]  ;;  %v776_v26 = vld [vmem:[%s4583_s4 + $0x48] sm:$0xff]  ;;  %v777_v31 = vld [vmem:[%s4583_s4 + $0x50] sm:$0xff] }
  0x1e   : > { %706 = vmatprep.mubr.bf16.mxu0 %v2834_v0  ;;  %2767 = vset.pattern.permute.xlu1 %v2834_v0  ;;  %v767_v2 = vld [vmem:[%s4583_s4] sm:$0xff]  ;;  %v768_v27 = vld [vmem:[%s4583_s4 + $0x8] sm:$0xff]  ;;  %v778_v39 = vld [vmem:[%s4583_s4 + $0x58] sm:$0xff]  ;;  %vm655_vm0 = vcmask 785408   ;;  %vm1072_vm1 = vcmask 1040384   ;;  %vm1472_vm2 = vcmask 15360  }
  0x1f   : > { %s4603_s22 = smov (!%p556_p0, %s2656_s22), 1  ;;  %2766 = vset.pattern.permute.xlu0 %v2834_v0  ;;  %821 = vperm.xlu1 %2767, %v775_v1   ;;  %v871_v30 = vld [vmem:[%s4584_s5 + $0x40] sm:$0xff]  ;;  %v872_v40 = vld [vmem:[%s4584_s5 + $0x48] sm:$0xff]  ;;  %v874_v44 = vld [vmem:[%s4584_s5 + $0x58] sm:$0xff]  ;;  %s1347_s23 = sld [smem:[#allocation2]]  ;;  %vm1595_vm11 = vcmask 261120  }
  0x20   : > { %s2953_s29 = sshll.u32 %s4603_s22, 6  ;;  %781 = vperm.xlu0 %2766, %v767_v2   ;;  %v873_v45 = vld [vmem:[%s4584_s5 + $0x50] sm:$0xff]  ;;  %v1108_v47 = vld [vmem:[%s4585_s6 + $0xf8] sm:$0xff]  ;;  %v2768_v50 = vld [vmem:[%s4582_s3] sm:$0xff]   ;;  %s2683_s24 = sld [smem:[#allocation2 + $0x1]] }
  0x21   : > { %s570_s17 = scalar_lea.vmem %s4581_s2, %s2953_s29  ;;  %s2963_s20 = scalar_lea.vmem %s4580_s1, %s2953_s29  ;;  %v1107_v48 = vld [vmem:[%s4585_s6 + $0xf0] sm:$0xff]  ;;  %v1172_v49 = vld [vmem:[%s4585_s6 + $0x2f8] sm:$0xff]  ;;  %v772_v51 = vld [vmem:[%s4583_s4 + $0x28] sm:$0xff]  ;;  %1205 = vmatprep.subr.mxu1 %v1108_v47 }
  0x22   : > { %v598_v3 = vld [vmem:[%s570_s17 + $0x28] sm:$0xff]  ;;  %v600_v4 = vld [vmem:[%s570_s17 + $0x38] sm:$0xff]  ;;  %v597_v5 = vld [vmem:[%s570_s17 + $0x20] sm:$0xff]  ;;  %1206 = vmatpush1.msra.mxu1 %v1107_v48  ;;  %s2836_s25 = smov 16   ;;  %s2837_s26 = smov 1  }
  0x23   : > { %v612_v6 = vpack.c.bf16 %v600_v4, %v598_v3  ;;  %v599_v7 = vld [vmem:[%s570_s17 + $0x30] sm:$0xff]  ;;  %v594_v8 = vld [vmem:[%s570_s17 + $0x8] sm:$0xff]  ;;  %v596_v9 = vld [vmem:[%s570_s17 + $0x18] sm:$0xff]  ;;  %s560_s30 = scalar_lea.vmem %s4599_s28, %s2953_s29  ;;  %826 = vperm.xlu1 %2767, %v776_v26   ;;  %s2839_s22 = smov 112  }
  0x24   : > { %v611_v10 = vpack.c.bf16 %v599_v7, %v597_v5  ;;  %v610_v11 = vpack.c.bf16 %v596_v9, %v594_v8  ;;  %v593_v12 = vld [vmem:[%s570_s17] sm:$0xff]  ;;  %v595_v13 = vld [vmem:[%s570_s17 + $0x10] sm:$0xff]  ;;  %v590_v14 = vld [vmem:[%s2963_s20 + $0x28] sm:$0xff]  ;;  %786 = vperm.xlu0 %2766, %v768_v27   ;;  %s2840_s27 = smov 113   ;;  %s2841_s28 = smov 127  }
  0x25   : > { %678 = vmatprep.subr.bf16.mxu0 %v612_v6  ;;  %v592_v15 = vld [vmem:[%s2963_s20 + $0x38] sm:$0xff]  ;;  %v609_v16 = vpack.c.bf16 %v595_v13, %v593_v12  ;;  %v589_v18 = vld [vmem:[%s2963_s20 + $0x20] sm:$0xff]  ;;  %v591_v19 = vld [vmem:[%s2963_s20 + $0x30] sm:$0xff]  ;;  %s2842_s0 = smov 111  }
  0x26   : > { %679 = vmatpush1.bf16.msra.mxu0 %v611_v10  ;;  %v608_v17 = vpack.c.bf16 %v592_v15, %v590_v14  ;;  %v586_v20 = vld [vmem:[%s2963_s20 + $0x8] sm:$0xff]  ;;  %v588_v21 = vld [vmem:[%s2963_s20 + $0x18] sm:$0xff]  ;;  %v607_v22 = vpack.c.bf16 %v591_v19, %v589_v18  ;;  %v585_v23 = vld [vmem:[%s2963_s20] sm:$0xff] }
  0x27   : > { %680 = vmatprep.subr.bf16.mxu0 %v610_v11  ;;  %v606_v24 = vpack.c.bf16 %v588_v21, %v586_v20  ;;  %v587_v25 = vld [vmem:[%s2963_s20 + $0x10] sm:$0xff]  ;;  %v582_v28 = vld [vmem:[%s560_s30 + $0x28] sm:$0xff]  ;;  %v584_v29 = vld [vmem:[%s560_s30 + $0x38] sm:$0xff]  ;;  %917 = vperm.xlu1 %2767, %v871_v30   ;;  %s2838_s20 = smov 15  }
  0x28   : > { %v605_v32 = vpack.c.bf16 %v587_v25, %v585_v23  ;;  %v604_v33 = vpack.c.bf16 %v584_v29, %v582_v28  ;;  %v581_v34 = vld [vmem:[%s560_s30 + $0x20] sm:$0xff]  ;;  %v583_v35 = vld [vmem:[%s560_s30 + $0x30] sm:$0xff]  ;;  %v578_v36 = vld [vmem:[%s560_s30 + $0x8] sm:$0xff]  ;;  %831 = vperm.xlu0 %2766, %v777_v31  }
  0x29   : > { %v580_v37 = vld [vmem:[%s560_s30 + $0x18] sm:$0xff]  ;;  %v577_v38 = vld [vmem:[%s560_s30] sm:$0xff]  ;;  %v603_v41 = vpack.c.bf16 %v583_v35, %v581_v34  ;;  %v579_v42 = vld [vmem:[%s560_s30 + $0x10] sm:$0xff]  ;;  %s2835_s30 = smov 17  }
  0x2a   : > { %681 = vmatpush1.bf16.msra.mxu0 %v609_v16  ;;  %v602_v43 = vpack.c.bf16 %v580_v37, %v578_v36  ;;  %v601_v46 = vpack.c.bf16 %v579_v42, %v577_v38  ;;  %v771_v52 = vld [vmem:[%s4583_s4 + $0x20] sm:$0xff]  ;;  %v1171_v53 = vld [vmem:[%s4585_s6 + $0x2f0] sm:$0xff]  ;;  %v1106_v54 = vld [vmem:[%s4585_s6 + $0xe8] sm:$0xff] }
  0x2b   : > { %682 = vmatprep.subr.bf16.mxu0 %v608_v17  ;;  %836 = vperm.xlu1 %2767, %v778_v39   ;;  %v1170_v55 = vld [vmem:[%s4585_s6 + $0x2e8] sm:$0xff]  ;;  %v1105_v56 = vld [vmem:[%s4585_s6 + $0xe0] sm:$0xff]  ;;  %v773_v58 = vld [vmem:[%s4583_s4 + $0x30] sm:$0xff] }
  0x2c   : > { %922 = vperm.xlu0 %2766, %v872_v40   ;;  %v867_v57 = vld [vmem:[%s4584_s5 + $0x20] sm:$0xff]  ;;  %1207 = vmatprep.subr.mxu1 %v1106_v54  ;;  %v1104_v60 = vld [vmem:[%s4585_s6 + $0xd8] sm:$0xff]  ;;  %v1103_v62 = vld [vmem:[%s4585_s6 + $0xd0] sm:$0xff] }
  0x2d   : > { %v1169_v59 = vld [vmem:[%s4585_s6 + $0x2e0] sm:$0xff]  ;;  %1208 = vmatpush1.msra.mxu1 %v1105_v56  ;;  %v1168_v61 = vld [vmem:[%s4585_s6 + $0x2d8] sm:$0xff]  ;;  %v1167_v63 = vld [vmem:[%s4585_s6 + $0x2d0] sm:$0xff] }
  0x2e   : > { %683 = vmatpush1.bf16.msra.mxu0 %v607_v22  ;;  %v1102_v1 = vld [vmem:[%s4585_s6 + $0xc8] sm:$0xff]  ;;  %v769_v3 = vld [vmem:[%s4583_s4 + $0x10] sm:$0xff]  ;;  %1209 = vmatprep.subr.mxu1 %v1104_v60  ;;  %v863_v6 = vld [vmem:[%s4584_s5] sm:$0xff] }
  0x2f   : > { %684 = vmatprep.subr.bf16.mxu0 %v606_v24  ;;  %932 = vperm.xlu1 %2767, %v874_v44   ;;  %v2769_v2 = vld [vmem:[%s4582_s3 + $0x8] sm:$0xff]   ;;  %v774_v7 = vld [vmem:[%s4583_s4 + $0x38] sm:$0xff]  ;;  %v2770_v8 = vld [vmem:[%s4582_s3 + $0x10] sm:$0xff]  }
  0x30   : > { %927 = vperm.xlu0 %2766, %v873_v45   ;;  %v868_v4 = vld [vmem:[%s4584_s5 + $0x28] sm:$0xff]  ;;  %1210 = vmatpush1.msra.mxu1 %v1103_v62  ;;  %v869_v9 = vld [vmem:[%s4584_s5 + $0x30] sm:$0xff]  ;;  %v770_v12 = vld [vmem:[%s4583_s4 + $0x18] sm:$0xff] }
  0x31   : > { %v1166_v5 = vld [vmem:[%s4585_s6 + $0x2c8] sm:$0xff]  ;;  %1211 = vmatprep.subr.mxu1 %v1102_v1  ;;  %v865_v11 = vld [vmem:[%s4584_s5 + $0x10] sm:$0xff]  ;;  %v2771_v13 = vld [vmem:[%s4582_s3 + $0x18] sm:$0xff]  }
  0x32   : > { %685 = vmatpush1.bf16.msra.mxu0 %v605_v32  ;;  %v864_v10 = vld [vmem:[%s4584_s5 + $0x8] sm:$0xff]  ;;  %v866_v14 = vld [vmem:[%s4584_s5 + $0x18] sm:$0xff]  ;;  %v2772_v16 = vld [vmem:[%s4582_s3 + $0x20] sm:$0xff]  }
  0x33   : > { %686 = vmatprep.subr.bf16.mxu0 %v604_v33  ;;  %806 = vperm.xlu1 %2767, %v772_v51   ;;  %v870_v15 = vld [vmem:[%s4584_s5 + $0x38] sm:$0xff]  ;;  %v2773_v17 = vld [vmem:[%s4582_s3 + $0x28] sm:$0xff]   ;;  %v1101_v18 = vld [vmem:[%s4585_s6 + $0xc0] sm:$0xff] }
  0x34   : > { %801 = vperm.xlu0 %2766, %v771_v52   ;;  %v1165_v19 = vld [vmem:[%s4585_s6 + $0x2c0] sm:$0xff]  ;;  %1212 = vmatpush1.msra.mxu1 %v1101_v18  ;;  %v1100_v20 = vld [vmem:[%s4585_s6 + $0xb8] sm:$0xff]  ;;  %v1099_v22 = vld [vmem:[%s4585_s6 + $0xb0] sm:$0xff] }
  0x35   : > { %v1164_v21 = vld [vmem:[%s4585_s6 + $0x2b8] sm:$0xff]  ;;  %1213 = vmatprep.subr.mxu1 %v1100_v20  ;;  %v1163_v23 = vld [vmem:[%s4585_s6 + $0x2b0] sm:$0xff]  ;;  %v1098_v24 = vld [vmem:[%s4585_s6 + $0xa8] sm:$0xff] }
  0x36   : > { %687 = vmatpush1.bf16.msra.mxu0 %v603_v41  ;;  %1214 = vmatpush1.msra.mxu1 %v1099_v22  ;;  %v1162_v25 = vld [vmem:[%s4585_s6 + $0x2a8] sm:$0xff]  ;;  %v1097_v26 = vld [vmem:[%s4585_s6 + $0xa0] sm:$0xff]  ;;  %v1096_v28 = vld [vmem:[%s4585_s6 + $0x98] sm:$0xff] }
  0x37   : > { %688 = vmatprep.subr.bf16.mxu0 %v602_v43  ;;  %897 = vperm.xlu1 %2767, %v867_v57   ;;  %v1161_v27 = vld [vmem:[%s4585_s6 + $0x2a0] sm:$0xff]  ;;  %v1160_v29 = vld [vmem:[%s4585_s6 + $0x298] sm:$0xff]  ;;  %v1095_v30 = vld [vmem:[%s4585_s6 + $0x90] sm:$0xff] }
  0x38   : > { %811 = vperm.xlu0 %2766, %v773_v58   ;;  %1215 = vmatprep.subr.mxu1 %v1098_v24  ;;  %v1159_v31 = vld [vmem:[%s4585_s6 + $0x290] sm:$0xff]  ;;  %v1094_v32 = vld [vmem:[%s4585_s6 + $0x88] sm:$0xff]  ;;  %v1093_v34 = vld [vmem:[%s4585_s6 + $0x80] sm:$0xff] }
  0x39   : > { %1216 = vmatpush1.msra.mxu1 %v1097_v26  ;;  %v1158_v33 = vld [vmem:[%s4585_s6 + $0x288] sm:$0xff]  ;;  %v1157_v35 = vld [vmem:[%s4585_s6 + $0x280] sm:$0xff]  ;;  %v1092_v36 = vld [vmem:[%s4585_s6 + $0x78] sm:$0xff] }
  0x3a   : > { %689 = vmatpush1.bf16.msra.mxu0 %v601_v46  ;;  %1217 = vmatprep.subr.mxu1 %v1096_v28  ;;  %v1156_v37 = vld [vmem:[%s4585_s6 + $0x278] sm:$0xff]  ;;  %v1091_v38 = vld [vmem:[%s4585_s6 + $0x70] sm:$0xff]  ;;  %v1090_v40 = vld [vmem:[%s4585_s6 + $0x68] sm:$0xff] }
  0x3b   : > { %1276 = vmatprep.subr.mxu0 %v1172_v49  ;;  %791 = vperm.xlu1 %2767, %v769_v3   ;;  %v1155_v39 = vld [vmem:[%s4585_s6 + $0x270] sm:$0xff]  ;;  %v1154_v41 = vld [vmem:[%s4585_s6 + $0x268] sm:$0xff]  ;;  %v1089_v42 = vld [vmem:[%s4585_s6 + $0x60] sm:$0xff] }
  0x3c   : > { %902 = vperm.xlu0 %2766, %v868_v4   ;;  %1218 = vmatpush1.msra.mxu1 %v1095_v30  ;;  %v1153_v43 = vld [vmem:[%s4585_s6 + $0x260] sm:$0xff]  ;;  %v1088_v44 = vld [vmem:[%s4585_s6 + $0x58] sm:$0xff]  ;;  %v1087_v46 = vld [vmem:[%s4585_s6 + $0x50] sm:$0xff] }
  0x3d   : > { %2677 = vmatmul.mubr.msk.bf16.vlgmr.msra.gmra.mxu0 %vm655_vm0, %v2768_v50  ;;  %1219 = vmatprep.subr.mxu1 %v1094_v32  ;;  %v1152_v45 = vld [vmem:[%s4585_s6 + $0x258] sm:$0xff]  ;;  %v1151_v47 = vld [vmem:[%s4585_s6 + $0x250] sm:$0xff]  ;;  %v1086_v48 = vld [vmem:[%s4585_s6 + $0x48] sm:$0xff] }
  0x3e   : > { %716 = vmatprep.mubr.bf16.mxu0 %v2834_v0  ;;  %1277 = vmatpush1.msra.mxu0 %v1171_v53  ;;  %v1150_v49 = vld [vmem:[%s4585_s6 + $0x248] sm:$0xff]  ;;  %v1085_v50 = vld [vmem:[%s4585_s6 + $0x40] sm:$0xff]  ;;  %v1084_v52 = vld [vmem:[%s4585_s6 + $0x38] sm:$0xff] }
  0x3f   : > { %1278 = vmatprep.subr.mxu0 %v1170_v55  ;;  %877 = vperm.xlu1 %2767, %v863_v6   ;;  %v1149_v51 = vld [vmem:[%s4585_s6 + $0x240] sm:$0xff]  ;;  %v1148_v53 = vld [vmem:[%s4585_s6 + $0x238] sm:$0xff]  ;;  %v1083_v54 = vld [vmem:[%s4585_s6 + $0x30] sm:$0xff] }
  0x40   : > { %1279 = vmatpush1.msra.mxu0 %v1169_v59  ;;  %816 = vperm.xlu0 %2766, %v774_v7   ;;  %v1147_v55 = vld [vmem:[%s4585_s6 + $0x230] sm:$0xff]  ;;  %v1082_v56 = vld [vmem:[%s4585_s6 + $0x28] sm:$0xff]  ;;  %v1081_v58 = vld [vmem:[%s4585_s6 + $0x20] sm:$0xff] }
  0x41   : > { %1280 = vmatprep.subr.mxu0 %v1168_v61  ;;  %1220 = vmatpush1.msra.mxu1 %v1093_v34  ;;  %v1146_v57 = vld [vmem:[%s4585_s6 + $0x228] sm:$0xff]  ;;  %v1145_v59 = vld [vmem:[%s4585_s6 + $0x220] sm:$0xff]  ;;  %v1080_v60 = vld [vmem:[%s4585_s6 + $0x18] sm:$0xff] }
  0x42   : > { %1281 = vmatpush1.msra.mxu0 %v1167_v63  ;;  %1221 = vmatprep.subr.mxu1 %v1092_v36  ;;  %v1144_v61 = vld [vmem:[%s4585_s6 + $0x218] sm:$0xff]  ;;  %v1079_v62 = vld [vmem:[%s4585_s6 + $0x10] sm:$0xff]  ;;  %v1078_v1 = vld [vmem:[%s4585_s6 + $0x8] sm:$0xff] }
  0x43   : > { %1282 = vmatprep.subr.mxu0 %v1166_v5  ;;  %907 = vperm.xlu1 %2767, %v869_v9   ;;  %v1143_v63 = vld [vmem:[%s4585_s6 + $0x210] sm:$0xff]  ;;  %v1077_v3 = vld [vmem:[%s4585_s6] sm:$0xff]  ;;  %v1140_v5 = vld [vmem:[%s4585_s6 + $0x1f8] sm:$0xff] }
  0x44   : > { %882 = vperm.xlu0 %2766, %v864_v10   ;;  %1283 = vmatpush1.msra.mxu0 %v1165_v19  ;;  %v1141_v4 = vld [vmem:[%s4585_s6 + $0x200] sm:$0xff]  ;;  %v1204_v6 = vld [vmem:[%s4585_s6 + $0x3f8] sm:$0xff]  ;;  %v1139_v7 = vld [vmem:[%s4585_s6 + $0x1f0] sm:$0xff] }
  0x45   : > { %2678 = vmatmul.mubr.msk.bf16.gmra.mxu0 %vm655_vm0, %v2769_v2  ;;  %1284 = vmatprep.subr.mxu0 %v1164_v21  ;;  %v1142_v2 = vld [vmem:[%s4585_s6 + $0x208] sm:$0xff]  ;;  %v1133_v19 = vld [vmem:[%s4585_s6 + $0x1c0] sm:$0xff]  ;;  %v1132_v21 = vld [vmem:[%s4585_s6 + $0x1b8] sm:$0xff] }
  0x46   : > { %726 = vmatprep.mubr.bf16.mxu0 %v2834_v0  ;;  %1285 = vmatpush1.msra.mxu0 %v1163_v23  ;;  %v1138_v9 = vld [vmem:[%s4585_s6 + $0x1e8] sm:$0xff]  ;;  %v1197_v20 = vld [vmem:[%s4585_s6 + $0x3c0] sm:$0xff]  ;;  %v1196_v22 = vld [vmem:[%s4585_s6 + $0x3b8] sm:$0xff] }
  0x47   : > { %887 = vperm.xlu1 %2767, %v865_v11   ;;  %1286 = vmatprep.subr.mxu0 %v1162_v25  ;;  %v1202_v10 = vld [vmem:[%s4585_s6 + $0x3e8] sm:$0xff]  ;;  %v1137_v11 = vld [vmem:[%s4585_s6 + $0x1e0] sm:$0xff]  ;;  %v1131_v23 = vld [vmem:[%s4585_s6 + $0x1b0] sm:$0xff] }
  0x48   : > { %796 = vperm.xlu0 %2766, %v770_v12   ;;  %1287 = vmatpush1.msra.mxu0 %v1161_v27  ;;  %v1201_v12 = vld [vmem:[%s4585_s6 + $0x3e0] sm:$0xff]  ;;  %v1198_v18 = vld [vmem:[%s4585_s6 + $0x3c8] sm:$0xff]  ;;  %v1195_v24 = vld [vmem:[%s4585_s6 + $0x3b0] sm:$0xff] }
  0x49   : > { %1288 = vmatprep.subr.mxu0 %v1160_v29  ;;  %1222 = vmatpush1.msra.mxu1 %v1091_v38  ;;  %v1130_v25 = vld [vmem:[%s4585_s6 + $0x1a8] sm:$0xff]  ;;  %v1129_v27 = vld [vmem:[%s4585_s6 + $0x1a0] sm:$0xff]  ;;  %v1128_v29 = vld [vmem:[%s4585_s6 + $0x198] sm:$0xff] }
  0x4a   : > { %1289 = vmatpush1.msra.mxu0 %v1159_v31  ;;  %1223 = vmatprep.subr.mxu1 %v1090_v40  ;;  %v1194_v26 = vld [vmem:[%s4585_s6 + $0x3a8] sm:$0xff]  ;;  %v1193_v28 = vld [vmem:[%s4585_s6 + $0x3a0] sm:$0xff]  ;;  %v1192_v30 = vld [vmem:[%s4585_s6 + $0x398] sm:$0xff] }
  0x4b   : > { %892 = vperm.xlu1 %2767, %v866_v14   ;;  %1290 = vmatprep.subr.mxu0 %v1158_v33  ;;  %v1200_v14 = vld [vmem:[%s4585_s6 + $0x3d8] sm:$0xff]  ;;  %v1127_v31 = vld [vmem:[%s4585_s6 + $0x190] sm:$0xff]  ;;  %v1126_v33 = vld [vmem:[%s4585_s6 + $0x188] sm:$0xff] }
  0x4c   : > { %912 = vperm.xlu0 %2766, %v870_v15   ;;  %1291 = vmatpush1.msra.mxu0 %v1157_v35  ;;  %v1135_v15 = vld [vmem:[%s4585_s6 + $0x1d0] sm:$0xff]  ;;  %v1190_v34 = vld [vmem:[%s4585_s6 + $0x388] sm:$0xff]  ;;  %v1125_v35 = vld [vmem:[%s4585_s6 + $0x180] sm:$0xff] }
  0x4d   : > { %2679 = vmatmul.mubr.msk.bf16.gmra.mxu0 %vm655_vm0, %v2770_v8  ;;  %1292 = vmatprep.subr.mxu0 %v1156_v37  ;;  %v1203_v8 = vld [vmem:[%s4585_s6 + $0x3f0] sm:$0xff]  ;;  %v1189_v36 = vld [vmem:[%s4585_s6 + $0x380] sm:$0xff]  ;;  %v1124_v37 = vld [vmem:[%s4585_s6 + $0x178] sm:$0xff] }
  0x4e   : > { %736 = vmatprep.mubr.bf16.mxu0 %v2834_v0  ;;  %1293 = vmatpush1.msra.mxu0 %v1155_v39  ;;  %v1191_v32 = vld [vmem:[%s4585_s6 + $0x390] sm:$0xff]  ;;  %v1188_v38 = vld [vmem:[%s4585_s6 + $0x378] sm:$0xff] }
  0x4f   : > { %1294 = vmatprep.subr.mxu0 %v1154_v41  ;;  %1224 = vmatpush1.msra.mxu1 %v1089_v42  ;;  %v1123_v39 = vld [vmem:[%s4585_s6 + $0x170] sm:$0xff]  ;;  %v1122_v41 = vld [vmem:[%s4585_s6 + $0x168] sm:$0xff] }
  0x50   : > { %1295 = vmatpush1.msra.mxu0 %v1153_v43  ;;  %1225 = vmatprep.subr.mxu1 %v1088_v44  ;;  %v1187_v40 = vld [vmem:[%s4585_s6 + $0x370] sm:$0xff]  ;;  %v1186_v42 = vld [vmem:[%s4585_s6 + $0x368] sm:$0xff]  ;;  %v1121_v43 = vld [vmem:[%s4585_s6 + $0x160] sm:$0xff] }
  0x51   : > { %1296 = vmatprep.subr.mxu0 %v1152_v45  ;;  %1226 = vmatpush1.msra.mxu1 %v1087_v46  ;;  %v1185_v44 = vld [vmem:[%s4585_s6 + $0x360] sm:$0xff]  ;;  %v1120_v45 = vld [vmem:[%s4585_s6 + $0x158] sm:$0xff] }
  0x52   : > { %1297 = vmatpush1.msra.mxu0 %v1151_v47  ;;  %1227 = vmatprep.subr.mxu1 %v1086_v48  ;;  %v1184_v46 = vld [vmem:[%s4585_s6 + $0x358] sm:$0xff]  ;;  %v1119_v47 = vld [vmem:[%s4585_s6 + $0x150] sm:$0xff] }
  0x53   : > { %1298 = vmatprep.subr.mxu0 %v1150_v49  ;;  %1228 = vmatpush1.msra.mxu1 %v1085_v50  ;;  %v1183_v48 = vld [vmem:[%s4585_s6 + $0x350] sm:$0xff]  ;;  %v1118_v49 = vld [vmem:[%s4585_s6 + $0x148] sm:$0xff] }
  0x54   : > { %1299 = vmatpush1.msra.mxu0 %v1149_v51  ;;  %1229 = vmatprep.subr.mxu1 %v1084_v52  ;;  %v1182_v50 = vld [vmem:[%s4585_s6 + $0x348] sm:$0xff]  ;;  %v1117_v51 = vld [vmem:[%s4585_s6 + $0x140] sm:$0xff] }
  0x55   : > { %2680 = vmatmul.mubr.msk.bf16.gmra.mxu0 %vm655_vm0, %v2771_v13  ;;  %1300 = vmatprep.subr.mxu0 %v1148_v53  ;;  %v1136_v13 = vld [vmem:[%s4585_s6 + $0x1d8] sm:$0xff]  ;;  %v1181_v52 = vld [vmem:[%s4585_s6 + $0x340] sm:$0xff] }
  0x56   : > { %746 = vmatprep.mubr.bf16.mxu0 %v2834_v0  ;;  %1230 = vmatpush1.msra.mxu1 %v1083_v54  ;;  %v1116_v53 = vld [vmem:[%s4585_s6 + $0x138] sm:$0xff] }
  0x57   : > { %1301 = vmatpush1.msra.mxu0 %v1147_v55  ;;  %1231 = vmatprep.subr.mxu1 %v1082_v56  ;;  %v1180_v54 = vld [vmem:[%s4585_s6 + $0x338] sm:$0xff]  ;;  %v1115_v55 = vld [vmem:[%s4585_s6 + $0x130] sm:$0xff] }
  0x58   : > { %1302 = vmatprep.subr.mxu0 %v1146_v57  ;;  %1232 = vmatpush1.msra.mxu1 %v1081_v58  ;;  %v1179_v56 = vld [vmem:[%s4585_s6 + $0x330] sm:$0xff]  ;;  %v1114_v57 = vld [vmem:[%s4585_s6 + $0x128] sm:$0xff] }
  0x59   : > { %1303 = vmatpush1.msra.mxu0 %v1145_v59  ;;  %1233 = vmatprep.subr.mxu1 %v1080_v60  ;;  %v1178_v58 = vld [vmem:[%s4585_s6 + $0x328] sm:$0xff]  ;;  %v1113_v59 = vld [vmem:[%s4585_s6 + $0x120] sm:$0xff] }
  0x5a   : > { %1304 = vmatprep.subr.mxu0 %v1144_v61  ;;  %1234 = vmatpush1.msra.mxu1 %v1079_v62  ;;  %v1177_v60 = vld [vmem:[%s4585_s6 + $0x320] sm:$0xff]  ;;  %v1112_v61 = vld [vmem:[%s4585_s6 + $0x118] sm:$0xff] }
  0x5b   : > { %1305 = vmatpush1.msra.mxu0 %v1143_v63  ;;  %1235 = vmatprep.subr.mxu1 %v1078_v1  ;;  %v1176_v62 = vld [vmem:[%s4585_s6 + $0x318] sm:$0xff]  ;;  %v1111_v63 = vld [vmem:[%s4585_s6 + $0x110] sm:$0xff] }
  0x5c   : > { %1306 = vmatprep.subr.mxu0 %v1142_v2  ;;  %1236 = vmatpush1.msra.mxu1 %v1077_v3  ;;  %v1175_v1 = vld [vmem:[%s4585_s6 + $0x310] sm:$0xff]  ;;  %v1110_v2 = vld [vmem:[%s4585_s6 + $0x108] sm:$0xff] }
  0x5d   : > { %2681 = vmatmul.mubr.msk.bf16.gmra.mxu0 %vm655_vm0, %v2772_v16  ;;  %1237 = vmatprep.subr.mxu1 %v1140_v5  ;;  %v1199_v16 = vld [vmem:[%s4585_s6 + $0x3d0] sm:$0xff]  ;;  %v1174_v3 = vld [vmem:[%s4585_s6 + $0x308] sm:$0xff]  ;;  %v1173_v5 = vld [vmem:[%s4585_s6 + $0x300] sm:$0xff] }
  0x5e   : > { %756 = vmatprep.mubr.bf16.mxu0 %v2834_v0  ;;  %1307 = vmatpush1.msra.mxu0 %v1141_v4  ;;  %v1109_v4 = vld [vmem:[%s4585_s6 + $0x100] sm:$0xff] }
  0x5f   : > { %1308 = vmatprep.subr.mxu0 %v1204_v6  ;;  %1238 = vmatpush2.msra.mxu1 %v1139_v7 }
  0x60   : > { %1309 = vmatpush2.msra.mxu0 %v1203_v8  ;;  %1239 = vmatprep.subr.mxu1 %v1138_v9 }
  0x61   : > { %1310 = vmatprep.subr.mxu0 %v1202_v10  ;;  %1240 = vmatpush2.msra.mxu1 %v1137_v11 }
  0x62   : > { %1311 = vmatpush2.msra.mxu0 %v1201_v12  ;;  %1241 = vmatprep.subr.mxu1 %v1136_v13 }
  0x63   : > { %1312 = vmatprep.subr.mxu0 %v1200_v14  ;;  %1242 = vmatpush2.msra.mxu1 %v1135_v15 }
  0x64   : > { %1313 = vmatpush2.msra.mxu0 %v1199_v16 }
  0x65   : > { %2682 = vmatmul.mubr.msk.bf16.gmra.mxu0 %vm655_vm0, %v2773_v17  ;;  %v1134_v17 = vld [vmem:[%s4585_s6 + $0x1c8] sm:$0xff]  ;;  %1314 = vmatprep.subr.mxu0 %v1198_v18 }
  0x66   : > { %1243 = vmatprep.subr.mxu1 %v1134_v17  ;;  %1315 = vmatpush2.msra.mxu0 %v1197_v20 }
  0x67   : > { %1244 = vmatpush2.msra.mxu1 %v1133_v19  ;;  %1316 = vmatprep.subr.mxu0 %v1196_v22 }
  0x68   : > { %1245 = vmatprep.subr.mxu1 %v1132_v21  ;;  %1317 = vmatpush2.msra.mxu0 %v1195_v24 }
  0x69   : > { %1246 = vmatpush2.msra.mxu1 %v1131_v23  ;;  %1318 = vmatprep.subr.mxu0 %v1194_v26 }
  0x6a   : > { %1247 = vmatprep.subr.mxu1 %v1130_v25  ;;  %1319 = vmatpush2.msra.mxu0 %v1193_v28 }
  0x6b   : > { %1248 = vmatpush2.msra.mxu1 %v1129_v27  ;;  %1320 = vmatprep.subr.mxu0 %v1192_v30 }
  0x6c   : > { %1249 = vmatprep.subr.mxu1 %v1128_v29  ;;  %1321 = vmatpush2.msra.mxu0 %v1191_v32 }
  0x6d   : > { %1250 = vmatpush2.msra.mxu1 %v1127_v31  ;;  %1322 = vmatprep.subr.mxu0 %v1190_v34 }
  0x6e   : > { %1251 = vmatprep.subr.mxu1 %v1126_v33  ;;  %1323 = vmatpush2.msra.mxu0 %v1189_v36 }
  0x6f   : > { %1252 = vmatpush2.msra.mxu1 %v1125_v35  ;;  %1324 = vmatprep.subr.mxu0 %v1188_v38 }
  0x70   : > { %1253 = vmatprep.subr.mxu1 %v1124_v37  ;;  %1325 = vmatpush2.msra.mxu0 %v1187_v40 }
  0x71   : > { %1254 = vmatpush2.msra.mxu1 %v1123_v39  ;;  %1326 = vmatprep.subr.mxu0 %v1186_v42 }
  0x72   : > { %1255 = vmatprep.subr.mxu1 %v1122_v41  ;;  %1327 = vmatpush2.msra.mxu0 %v1185_v44 }
  0x73   : > { %1256 = vmatpush2.msra.mxu1 %v1121_v43  ;;  %1328 = vmatprep.subr.mxu0 %v1184_v46 }
  0x74   : > { %1257 = vmatprep.subr.mxu1 %v1120_v45  ;;  %1329 = vmatpush2.msra.mxu0 %v1183_v48 }
  0x75   : > { %1258 = vmatpush2.msra.mxu1 %v1119_v47  ;;  %1330 = vmatprep.subr.mxu0 %v1182_v50 }
  0x76   : > { %1259 = vmatprep.subr.mxu1 %v1118_v49  ;;  %1331 = vmatpush2.msra.mxu0 %v1181_v52 }
  0x77   : > { %1260 = vmatpush2.msra.mxu1 %v1117_v51  ;;  %1332 = vmatprep.subr.mxu0 %v1180_v54 }
  0x78   : > { %1261 = vmatprep.subr.mxu1 %v1116_v53  ;;  %1333 = vmatpush2.msra.mxu0 %v1179_v56 }
  0x79   : > { %1262 = vmatpush2.msra.mxu1 %v1115_v55  ;;  %1334 = vmatprep.subr.mxu0 %v1178_v58 }
  0x7a   : > { %1263 = vmatprep.subr.mxu1 %v1114_v57  ;;  %1335 = vmatpush2.msra.mxu0 %v1177_v60 }
  0x7b   : > { %1264 = vmatpush2.msra.mxu1 %v1113_v59  ;;  %1336 = vmatprep.subr.mxu0 %v1176_v62 }
  0x7c   : > { %1265 = vmatprep.subr.mxu1 %v1112_v61  ;;  %1337 = vmatpush2.msra.mxu0 %v1175_v1 }
  0x7d   : > { %1266 = vmatpush2.msra.mxu1 %v1111_v63  ;;  %1338 = vmatprep.subr.mxu0 %v1174_v3 }
  0x7e   : > { %1267 = vmatprep.subr.mxu1 %v1110_v2  ;;  %1339 = vmatpush2.msra.mxu0 %v1173_v5 }
  0x7f   : > { %1268 = vmatpush2.msra.mxu1 %v1109_v4 }
  0x9a   : > { %v3462_v6 = vpop.permute.xlu1 %821 }
  0x9b   : > { %v782_v7 = vpop.permute.xlu0 %781 }
  0x9e   : > { %v3464_v8 = vpop.permute.xlu1 %826 }
  0x9f   : > { %v787_v9 = vpop.permute.xlu0 %786 }
  0xa2   : > { %v3466_v10 = vpop.permute.xlu1 %917 }
  0xa3   : > { %v3468_v11 = vpop.permute.xlu0 %831 }
  0xa6   : > { %v3470_v12 = vpop.permute.xlu1 %836 }
  0xa7   : > { %v3472_v13 = vpop.permute.xlu0 %922 }
  0xaa   : > { %v3474_v14 = vpop.permute.xlu1 %932 }
  0xab   : > { %v3476_v15 = vpop.permute.xlu0 %927 }
  0xae   : > { %v3478_v16 = vpop.permute.xlu1 %806 }
  0xaf   : > { %v3480_v17 = vpop.permute.xlu0 %801 }
  0xb2   : > { %v3482_v18 = vpop.permute.xlu1 %897 }
  0xb3   : > { %v3484_v19 = vpop.permute.xlu0 %811 }
  0xb6   : > { %v792_v20 = vpop.permute.xlu1 %791 }
  0xb7   : > { %v3486_v21 = vpop.permute.xlu0 %902 }
  0xba   : > { %v878_v22 = vpop.permute.xlu1 %877 }
  0xbb   : > { %v3488_v23 = vpop.permute.xlu0 %816 }
  0xbe   : > { %v3490_v25 = vpop.permute.xlu1 %907 }
  0xbf   : > { %v883_v28 = vpop.permute.xlu0 %882 }
  0xc2   : > { %v888_v32 = vpop.permute.xlu1 %887 }
  0xc3   : > { %v797_v41 = vpop.permute.xlu0 %796 }
  0xc6   : > { %v893_v47 = vpop.permute.xlu1 %892 }
  0xfd   : > { %v708_v24 = vpop.f32.mrf.mxu0 }
  0xfe   : > { %v839_v29 = vmul.f32 %v782_v7, %v708_v24 }
  0xff   : > { %v710_v26 = vpop.f32.mrf.mxu0 }
 0x100   : > { %v840_v35 = vmul.f32 %v782_v7, %v710_v26  ;;  %v935_v37 = vadd.f32 %v878_v22, %v839_v29 }
 0x101   : > { %v712_v27 = vpop.f32.mrf.mxu0 }
 0x102   : > { %v841_v30 = vmul.f32 %v787_v9, %v712_v27  ;;  %v936_v45 = vadd.f32 %v878_v22, %v840_v35  ;;  %v3494_v48 = vmax.f32 %v935_v37, 0.0 }
 0x103   : > { %v714_v31 = vpop.f32.mrf.mxu0 }
 0x104   : > { %v937_v33 = vadd.f32 %v883_v28, %v841_v30  ;;  %v842_v34 = vmul.f32 %v787_v9, %v714_v31  ;;  %v3502_v56 = vmax.f32 %v936_v45, 0.0 }
 0x105   : > { %v718_v36 = vpop.f32.mrf.mxu0 }
 0x106   : > { %v843_v38 = vmul.f32 %v792_v20, %v718_v36  ;;  %v938_v39 = vadd.f32 %v883_v28, %v842_v34  ;;  %v3492_v42 = vmax.f32 %v937_v33, 0.0 }
 0x107   : > { %v720_v40 = vpop.f32.mrf.mxu0 }
 0x108   : > { %v939_v43 = vadd.f32 %v888_v32, %v843_v38  ;;  %v844_v44 = vmul.f32 %v792_v20, %v720_v40  ;;  %v3498_v52 = vmax.f32 %v938_v39, 0.0  ;;  %v983_v54 = vadd.f32 %v3492_v42, %v3494_v48 }
 0x109   : > { %v722_v46 = vpop.f32.mrf.mxu0 }
 0x10a   : > { %v3496_v49 = vmax.f32 %v939_v43, 0.0  ;;  %v940_v50 = vadd.f32 %v888_v32, %v844_v44  ;;  %v845_v51 = vmul.f32 %v797_v41, %v722_v46  ;;  %v992_v62 = vadd.f32 %v3498_v52, %v3502_v56 }
 0x10b   : > { %v724_v53 = vpop.f32.mrf.mxu0 }
 0x10c   : > { %v941_v55 = vadd.f32 %v893_v47, %v845_v51  ;;  %v3504_v57 = vmax.f32 %v940_v50, 0.0  ;;  %v846_v58 = vmul.f32 %v797_v41, %v724_v53  ;;  %v984_v60 = vadd.f32 %v983_v54, %v3496_v49 }
 0x10d   : > { %v728_v59 = vpop.f32.mrf.mxu0  ;;  %v1004_v2 = vmax.f32 %v3494_v48, %v3496_v49 }
 0x10e   : > { %v3507_v61 = vmax.f32 %v941_v55, 0.0  ;;  %v942_v63 = vadd.f32 %v893_v47, %v846_v58  ;;  %v847_v5 = vmul.f32 %v3480_v17, %v728_v59  ;;  %v993_v7 = vadd.f32 %v992_v62, %v3504_v57 }
 0x10f   : > { %v730_v1 = vpop.f32.mrf.mxu0  ;;  %v1013_v26 = vmax.f32 %v3502_v56, %v3504_v57 }
 0x110   : > { %v985_v3 = vadd.f32 %v984_v60, %v3507_v61  ;;  %v1005_v4 = vmax.f32 %v3492_v42, %v3507_v61  ;;  %v3518_v9 = vmax.f32 %v942_v63, 0.0  ;;  %v943_v31 = vadd.f32 %v3482_v18, %v847_v5 }
 0x111   : > { %v732_v20 = vpop.f32.mrf.mxu0  ;;  %v848_v32 = vmul.f32 %v3480_v17, %v730_v1 }
 0x112   : > { %v986_v22 = vrot.slane %v985_v3, 4  ;;  %v1006_v24 = vmax.f32 %v1004_v2, %v1005_v4  ;;  %v994_v27 = vadd.f32 %v993_v7, %v3518_v9  ;;  %v1014_v28 = vmax.f32 %v3498_v52, %v3518_v9 }
 0x113   : > { %v849_v29 = vmul.f32 %v3478_v16, %v732_v20  ;;  %v734_v30 = vpop.f32.mrf.mxu0  ;;  %v944_v45 = vadd.f32 %v3482_v18, %v848_v32  ;;  %v3537_v50 = vmax.f32 %v943_v31, 0.0  ;;  %v913_v18 = vpop.permute.xlu0 %912 }
 0x114   : > { %v850_v33 = vmul.f32 %v3478_v16, %v734_v30  ;;  %v987_v34 = vadd.f32 %v986_v22, %v985_v3  ;;  %v995_v35 = vrot.slane %v994_v27, 4  ;;  %v1015_v36 = vmax.f32 %v1013_v26, %v1014_v28 }
 0x115   : > { %v945_v37 = vadd.f32 %v3486_v21, %v849_v29  ;;  %v738_v38 = vpop.f32.mrf.mxu0  ;;  %v1007_v39 = vrot.slane %v1006_v24, 4  ;;  %v3545_v63 = vmax.f32 %v944_v45, 0.0 }
 0x116   : > { %v851_v40 = vmul.f32 %v3484_v19, %v738_v38  ;;  %v946_v41 = vadd.f32 %v3486_v21, %v850_v33  ;;  %v996_v44 = vadd.f32 %v995_v35, %v994_v27  ;;  %v1016_v47 = vrot.slane %v1015_v36, 4 }
 0x117   : > { %v740_v43 = vpop.f32.mrf.mxu0  ;;  %v3533_v46 = vmax.f32 %v945_v37, 0.0  ;;  %v988_v53 = vrot.slane %v987_v34, 2  ;;  %v1008_v54 = vmax.f32 %v1006_v24, %v1007_v39 }
 0x118   : > { %v947_v17 = vadd.f32 %v3490_v25, %v851_v40  ;;  %v852_v16 = vmul.f32 %v3484_v19, %v740_v43  ;;  %v3543_v59 = vmax.f32 %v946_v41, 0.0  ;;  %v997_v62 = vrot.slane %v996_v44, 2 }
 0x119   : > { %v742_v51 = vpop.f32.mrf.mxu0  ;;  %v1022_v19 = vadd.f32 %v3533_v46, %v3537_v50  ;;  %v1017_v5 = vmax.f32 %v1015_v36, %v1016_v47  ;;  %v1009_v24 = vrot.slane %v1008_v54, 2 }
 0x11a   : > { %v3539_v55 = vmax.f32 %v947_v17, 0.0  ;;  %v948_v21 = vadd.f32 %v3490_v25, %v852_v16  ;;  %v853_v58 = vmul.f32 %v3488_v23, %v742_v51  ;;  %v3552_v25 = vadd.f32 %v988_v53, %v987_v34 }
 0x11b   : > { %v744_v60 = vpop.f32.mrf.mxu0  ;;  %v1031_v26 = vadd.f32 %v3543_v59, %v3545_v63  ;;  %v1018_v37 = vrot.slane %v1017_v5, 2  ;;  %v3574_v43 = vmax.f32 %v1008_v54, %v1009_v24 }
 0x11c   : > { %v949_v1 = vadd.f32 %v913_v18, %v853_v58  ;;  %v3549_v2 = vmax.f32 %v948_v21, 0.0  ;;  %v854_v3 = vmul.f32 %v3488_v23, %v744_v60  ;;  %v1023_v7 = vadd.f32 %v1022_v19, %v3539_v55 }
 0x11d   : > { %v748_v4 = vpop.f32.mrf.mxu0  ;;  %v1042_v27 = vmax.f32 %v3537_v50, %v3539_v55  ;;  %v3562_v23 = vadd.f32 %v997_v62, %v996_v44  ;;  %v990_v38 = vrot.slane %v3552_v25, 1 }
 0x11e   : > { %v3555_v20 = vmax.f32 %v949_v1, 0.0  ;;  %v855_v22 = vmul.f32 %v3462_v6, %v748_v4  ;;  %v950_v28 = vadd.f32 %v913_v18, %v854_v3  ;;  %v1032_v34 = vadd.f32 %v1031_v26, %v3549_v2 }
 0x11f   : > { %v750_v29 = vpop.f32.mrf.mxu0  ;;  %v1051_v44 = vmax.f32 %v3545_v63, %v3549_v2 }
 0x120   : > { %v1024_v30 = vadd.f32 %v1023_v7, %v3555_v20  ;;  %v1043_v31 = vmax.f32 %v3533_v46, %v3555_v20  ;;  %v951_v32 = vadd.f32 %v3466_v10, %v855_v22  ;;  %v856_v33 = vmul.f32 %v3462_v6, %v750_v29 }
 0x121   : > { %v3570_v35 = vmax.f32 %v950_v28, 0.0  ;;  %v752_v36 = vpop.f32.mrf.mxu0 }
 0x122   : > { %v1025_v39 = vrot.slane %v1024_v30, 4  ;;  %v1044_v40 = vmax.f32 %v1042_v27, %v1043_v31  ;;  %v952_v41 = vadd.f32 %v3466_v10, %v856_v33  ;;  %v857_v17 = vmul.f32 %v3464_v8, %v752_v36 }
 0x123   : > { %v1033_v45 = vadd.f32 %v1032_v34, %v3570_v35  ;;  %v1052_v6 = vmax.f32 %v3543_v59, %v3570_v35  ;;  %v754_v16 = vpop.f32.mrf.mxu0  ;;  %v3582_v51 = vmax.f32 %v951_v32, 0.0  ;;  %v1019_v31 = vmax.f32 %v1017_v5, %v1018_v37 }
 0x124   : > { %v1045_v47 = vrot.slane %v1044_v40, 4  ;;  %v3584_v53 = vmax.f32 %v952_v41, 0.0  ;;  %v858_v10 = vmul.f32 %v3464_v8, %v754_v16  ;;  %v1026_v54 = vadd.f32 %v1025_v39, %v1024_v30 }
 0x125   : > { %v1034_v21 = vrot.slane %v1033_v45, 4  ;;  %v1053_v58 = vmax.f32 %v1051_v44, %v1052_v6  ;;  %v953_v18 = vadd.f32 %v3472_v13, %v857_v17  ;;  %v758_v60 = vpop.f32.mrf.mxu0  ;;  %v999_v8 = vrot.slane %v3562_v23, 1 }
 0x126   : > { %v1046_v62 = vmax.f32 %v1044_v40, %v1045_v47  ;;  %v954_v19 = vadd.f32 %v3472_v13, %v858_v10  ;;  %v859_v1 = vmul.f32 %v3468_v11, %v758_v60  ;;  %v1431_v3 = vadd.f32 %v3584_v53, %v3582_v51 }
 0x127   : > { %v1054_v4 = vrot.slane %v1053_v58, 4  ;;  %v3592_v7 = vmax.f32 %v953_v18, 0.0  ;;  %v760_v22 = vpop.f32.mrf.mxu0  ;;  %v1035_v24 = vadd.f32 %v1034_v21, %v1033_v45  ;;  %v1027_v33 = vrot.slane %v1026_v54, 2 }
 0x128   : > { %v1047_v26 = vrot.slane %v1046_v62, 2  ;;  %v3595_v27 = vmax.f32 %v954_v19, 0.0  ;;  %v955_v28 = vadd.f32 %v3476_v15, %v859_v1  ;;  %v860_v29 = vmul.f32 %v3468_v11, %v760_v22  ;;  %1432 = vadd.xlane.f32.xlu0 %v1431_v3 }
 0x129   : > { %v762_v13 = vpop.f32.mrf.mxu0  ;;  %v1036_v30 = vrot.slane %v1035_v24, 2  ;;  %v1055_v32 = vmax.f32 %v1053_v58, %v1054_v4  ;;  %v1448_v39 = vmax.f32 %v3582_v51, %v3584_v53  ;;  %v1028_v6 = vadd.f32 %v1027_v33, %v1026_v54 }
 0x12a   : > { %v956_v34 = vadd.f32 %v3476_v15, %v860_v29  ;;  %v861_v36 = vmul.f32 %v3470_v12, %v762_v13  ;;  %v1434_v40 = vadd.f32 %v3595_v27, %v3592_v7  ;;  %v3605_v41 = vmax.f32 %v955_v28, 0.0 }
 0x12b   : > { %v764_v44 = vpop.f32.mrf.mxu0  ;;  %v1037_v11 = vadd.f32 %v1036_v30, %v1035_v24  ;;  %v1056_v45 = vrot.slane %v1055_v32, 2  ;;  %v1048_v17 = vmax.f32 %v1046_v62, %v1047_v26  ;;  %v1000_v16 = vadd.f32 %v999_v8, %v3562_v23 }
 0x12c   : > { %v3607_v5 = vmax.f32 %v956_v34, 0.0  ;;  %v957_v37 = vadd.f32 %v3474_v14, %v861_v36  ;;  %v862_v15 = vmul.f32 %v3470_v12, %v764_v44  ;;  %1449 = vmax.xlane.f32.xlu0 %v1448_v39  ;;  %1435 = vadd.xlane.f32.xlu1 %v1434_v40  ;;  %v1029_v21 = vrot.slane %v1028_v6, 1 }
 0x12d   : > { %v1038_v47 = vrot.slane %v1037_v11, 1  ;;  %v1057_v10 = vmax.f32 %v1055_v32, %v1056_v45  ;;  %v1451_v18 = vmax.f32 %v3592_v7, %v3595_v27  ;;  %v1020_v60 = vrot.slane %v1019_v31, 1 }
 0x12e   : > { %v958_v58 = vadd.f32 %v3474_v14, %v862_v15  ;;  %v1437_v54 = vadd.f32 %v3607_v5, %v3605_v41  ;;  %v1030_v12 = vadd.f32 %v1029_v21, %v1028_v6  ;;  %v1049_v3 = vrot.slane %v1048_v17, 1 }
 0x12f   : > { %v1039_v19 = vadd.f32 %v1038_v47, %v1037_v11  ;;  %v1058_v1 = vrot.slane %v1057_v10, 1  ;;  %v3617_v4 = vmax.f32 %v957_v37, 0.0  ;;  %v991_v14 = vadd.f32 %v990_v38, %v3552_v25 }
 0x130   : > { %v3619_v62 = vmax.f32 %v958_v58, 0.0  ;;  %1452 = vmax.xlane.f32.xlu1 %v1451_v18  ;;  %1438 = vadd.xlane.f32.xlu0 %v1437_v54  ;;  %v1011_v23 = vrot.slane %v3574_v43, 1  ;;  %v1040_v24 = vmul.f32 0.03125, %v1030_v12  ;;  %v1050_v26 = vmax.f32 %v1048_v17, %v1049_v3  ;;  %v1465_v17 = vld [vmem:[%s4587_s8 + $0x8] sm:$0xff]  ;;  %v1464_v58 = vld [vmem:[%s4587_s8] sm:$0xff] }
 0x131   : > { %v1041_v22 = vmul.f32 0.03125, %v1039_v19  ;;  %v1059_v8 = vmax.f32 %v1057_v10, %v1058_v1  ;;  %v1454_v28 = vmax.f32 %v3605_v41, %v3607_v5  ;;  %v1003_v13 = vmul.f32 0.03125, %v1000_v16 }
 0x132   : > { %v1440_v29 = vadd.f32 %v3619_v62, %v3617_v4  ;;  %v1021_v30 = vmax.f32 %v1019_v31, %v1020_v60  ;;  %v1064_v34 = vrot.slane %v1040_v24, 7  ;;  %v1066_v36 = vrot.slane %v1050_v26, 7  ;;  %v1466_v60 = vld [vmem:[%s4587_s8 + $0x10] sm:$0xff] }
 0x133   : > { %v1065_v32 = vrot.slane %v1041_v22, 7  ;;  %v1067_v33 = vrot.slane %v1059_v8, 7  ;;  %v1002_v25 = vmul.f32 0.03125, %v991_v14  ;;  %v1012_v38 = vmax.f32 %v3574_v43, %v1011_v23  ;;  %v1467_v8 = vld [vmem:[%s4587_s8 + $0x18] sm:$0xff] }
 0x134   : > { %1455 = vmax.xlane.f32.xlu1 %v1454_v28  ;;  %1441 = vadd.xlane.f32.xlu0 %v1440_v29  ;;  %v1457_v31 = vmax.f32 %v3617_v4, %v3619_v62 }
 0x135   : > { %v1074_v39 = vsel %vm1072_vm1, %v1003_v13, %v1065_v32  ;;  %v1076_v40 = vsel %vm1072_vm1, %v1021_v30, %v1067_v33  ;;  %v1073_v44 = vsel %vm1072_vm1, %v1002_v25, %v1064_v34  ;;  %v1075_v11 = vsel %vm1072_vm1, %v1012_v38, %v1066_v36 }
 0x136   : > { %1269 = vmatprep.mubr.f32.mxu1 %v1074_v39  ;;  %1340 = vmatprep.mubr.f32.mxu0 %v1076_v40 }
 0x137   : > { %1270 = vmatmul.mubr.f32.vlgmr.msra.gmra.mxu1 %v1073_v44  ;;  %1341 = vmatmul.mubr.f32.vlgmr.msra.gmra.mxu0 %v1075_v11  ;;  %v1488_v11 = vld [vmem:[%s4588_s9 + $0x8] sm:$0xff] }
 0x138   : > { %1458 = vmax.xlane.f32.xlu0 %v1457_v31  ;;  %2464 = vmatprep.mubr.bf16.mxu0 %v2834_v0  ;;  %v1487_v31 = vld [vmem:[%s4588_s9] sm:$0xff] }
 0x1b1   : > { %v1433_v45 = vpop.xlane.xlu0 %1432 }
 0x1b2   : > { %v1444_v37 = vmul.f32 0.00390625, %v1433_v45 }
 0x1b5   : > { %v1450_v43 = vpop.xlane.xlu0 %1449  ;;  %v1436_v6 = vpop.xlane.xlu1 %1435 }
 0x1b6   : > { %v1445_v15 = vmul.f32 0.00390625, %v1436_v6  ;;  %v1460_v10 = vadd.f32 %v1450_v43, %v1444_v37  ;;  %v1490_v43 = vld [vmem:[%s4588_s9 + $0x18] sm:$0xff]  ;;  %v1489_v6 = vld [vmem:[%s4588_s9 + $0x10] sm:$0xff] }
 0x1b8   : > { %v1468_v12 = vmul.f32 %v1464_v58, %v1460_v10 }
 0x1b9   : > { %v1453_v16 = vpop.xlane.xlu1 %1452  ;;  %v1439_v47 = vpop.xlane.xlu0 %1438 }
 0x1ba   : > { %v1461_v21 = vadd.f32 %v1453_v16, %v1445_v15  ;;  %v1446_v54 = vmul.f32 0.00390625, %v1439_v47  ;;  %v1473_v26 = vsel %vm1472_vm2, %v1468_v12, 0.0 }
 0x1bc   : > { %v1469_v18 = vmul.f32 %v1465_v17, %v1461_v21 }
 0x1bd   : > { %v1456_v19 = vpop.xlane.xlu1 %1455  ;;  %v1442_v1 = vpop.xlane.xlu0 %1441 }
 0x1be   : > { %v1462_v3 = vadd.f32 %v1456_v19, %v1446_v54  ;;  %v1474_v14 = vsel %vm1472_vm2, %v1469_v18, 0.0  ;;  %v1447_v22 = vmul.f32 0.00390625, %v1442_v1  ;;  %v1352_v1 = vstv %s2683_s24 }
 0x1bf   : > { %v1475_v13 = vadd.f32 %v1474_v14, %v1473_v26 }
 0x1c0   : > { %v1470_v23 = vmul.f32 %v1466_v60, %v1462_v3  ;;  %v1348_v60 = vstv %s1347_s23 }
 0x1c1   : > { %v1459_v24 = vpop.xlane.xlu0 %1458 }
 0x1c2   : > { %v1476_v28 = vsel %vm1472_vm2, %v1470_v23, 0.0  ;;  %v1463_v29 = vadd.f32 %v1459_v24, %v1447_v22 }
 0x1c3   : > { %v1477_v32 = vadd.f32 %v1476_v28, %v1475_v13 }
 0x1c4   : > { %v1471_v30 = vmul.f32 %v1467_v8, %v1463_v29 }
 0x1c6   : > { %v1478_v33 = vsel %vm1472_vm2, %v1471_v30, 0.0 }
 0x1c7   : > { %v1479_v34 = vadd.f32 %v1478_v33, %v1477_v32  ;;  %v1367_v33 = vlaneseq }
 0x1c9   : > { %v1480_v36 = vrot.slane %v1479_v34, 4 }
 0x1cb   : > { %v1481_v25 = vadd.f32 %v1480_v36, %v1479_v34  ;;  %v3670_v34 = vshrl.u32 %v1367_v33, 7 }
 0x1cd   : > { %v1482_v38 = vrot.slane %v1481_v25, 2  ;;  %v3673_v36 = vsub.s32 0, %v3670_v34 }
 0x1cf   : > { %v1483_v39 = vadd.f32 %v1482_v38, %v1481_v25 }
 0x1d1   : > { %v1484_v40 = vrot.slane %v1483_v39, 1 }
 0x1d3   : > { %v1485_v44 = vadd.f32 %v1484_v40, %v1483_v39 }
 0x1d5   : > { %v1486_v45 = vmax.f32 %v1485_v44, 0.0  ;;  %v3678_v44 = vsub.s32 1, %v3670_v34 }
 0x1d7   : > { %v1492_v37 = vmul.f32 %v1488_v11, %v1486_v45  ;;  %v1491_v15 = vmul.f32 %v1487_v31, %v1486_v45  ;;  %v1494_v47 = vmul.f32 %v1490_v43, %v1486_v45  ;;  %v1493_v10 = vmul.f32 %v1489_v6, %v1486_v45 }
 0x1d9   : > { %v1498_v17 = vsel %vm1472_vm2, %v1492_v37, 0.0  ;;  %v1495_v16 = vsel %vm1472_vm2, %v1491_v15, 0.0  ;;  %v1504_v21 = vsel %vm1472_vm2, %v1494_v47, 0.0  ;;  %v1501_v58 = vsel %vm1472_vm2, %v1493_v10, 0.0 }
 0x1da   : > { %1499 = vadd.xlane.f32.xlu0 %v1498_v17  ;;  %1496 = vadd.xlane.f32.xlu1 %v1495_v16 }
 0x1de   : > { %1505 = vadd.xlane.f32.xlu0 %v1504_v21  ;;  %1502 = vadd.xlane.f32.xlu1 %v1501_v58 }
 0x1f7   : > { %v1271_v18 = vpop.f32.mrf.mxu1  ;;  %v1342_v54 = vpop.f32.mrf.mxu0 }
 0x1f8   : > { %v1343_v19 = vadd.f32 %v1342_v54, %v1271_v18 }
 0x1f9   : > { %v1273_v12 = vpop.f32.mrf.mxu1  ;;  %v1344_v3 = vpop.f32.mrf.mxu0 }
 0x1fa   : > { %v1349_v14 = vmul.f32 %v1348_v60, %v1343_v19  ;;  %v1345_v23 = vadd.f32 %v1344_v3, %v1273_v12 }
 0x1fc   : > { %v1353_v22 = vadd.f32 %v1352_v1, %v1349_v14  ;;  %v1350_v8 = vmul.f32 %v1348_v60, %v1345_v23 }
 0x1fe   : > { %v2684_v24 = vmul.f32 -1.442695, %v1353_v22  ;;  %v1354_v26 = vadd.f32 %v1352_v1, %v1350_v8 }
 0x200   : > { %2782 = vpow2.f32 %v2684_v24  ;;  %v2685_v28 = vmul.f32 -1.442695, %v1354_v26 }
 0x202   : > { %2784 = vpow2.f32 %v2685_v28 }
 0x20d   : > { %v2783_v29 = vpop.eup %2782 }
 0x20e   : > { %v1361_v13 = vadd.f32 1.0, %v2783_v29 }
 0x20f   : > { %v2785_v30 = vpop.eup %2784 }
 0x210   : > { %2786 = vrcp.f32 %v1361_v13  ;;  %v1362_v32 = vadd.f32 1.0, %v2785_v30 }
 0x212   : > { %2788 = vrcp.f32 %v1362_v32 }
 0x21d   : > { %v2787_v25 = vpop.eup %2786 }
 0x21e   : > { %v1370_v38 = vrot.slane %v2787_v25, %v3673_v36 }
 0x21f   : > { %v2789_v39 = vpop.eup %2788 }
 0x220   : > { %v1374_v40 = vrot.slane %v2789_v39, %v3673_v36  ;;  %v1377_v11 = vmul.f32 %v1370_v38, %v3492_v42  ;;  %v1375_v45 = vmul.f32 %v1370_v38, %v3494_v48  ;;  %v1406_v6 = vrot.slane %v2789_v39, %v3678_v44 }
 0x221   : > { %v1381_v47 = vmul.f32 %v1370_v38, %v3507_v61  ;;  %v1379_v42 = vmul.f32 %v1370_v38, %v3496_v49 }
 0x222   : > { %v1378_v31 = vmul.f32 %v1374_v40, %v3498_v52  ;;  %v1376_v43 = vmul.f32 %v1374_v40, %v3502_v56  ;;  %v1382_v17 = vmul.f32 %v1374_v40, %v3518_v9  ;;  %v1380_v16 = vmul.f32 %v1374_v40, %v3504_v57 }
 0x223   : > { %v1402_v52 = vrot.slane %v2787_v25, %v3678_v44  ;;  %v1410_v56 = vmul.f32 %v1406_v6, %v3543_v59  ;;  %v1408_v21 = vmul.f32 %v1406_v6, %v3545_v63  ;;  %v1414_v61 = vmul.f32 %v1406_v6, %v3570_v35 }
 0x224   : > { %v1386_v37 = vadd.f32 %v1378_v31, %v1377_v11  ;;  %v1383_v15 = vadd.f32 %v1376_v43, %v1375_v45  ;;  %v1392_v10 = vadd.f32 %v1382_v17, %v1381_v47  ;;  %v1389_v48 = vadd.f32 %v1380_v16, %v1379_v42  ;;  %v2486_v16 = vld [vmem:[%s4593_s14 + $0x8] sm:$0xff] }
 0x225   : > { %v1409_v9 = vmul.f32 %v1402_v52, %v3533_v46  ;;  %v1407_v57 = vmul.f32 %v1402_v52, %v3537_v50  ;;  %v1412_v49 = vmul.f32 %v1406_v6, %v3549_v2  ;;  %v1413_v54 = vmul.f32 %v1402_v52, %v3555_v20 }
 0x226   : > { %1387 = vadd.xlane.f32.xlu0 %v1386_v37  ;;  %1384 = vadd.xlane.f32.xlu1 %v1383_v15  ;;  %v1411_v59 = vmul.f32 %v1402_v52, %v3539_v55  ;;  %v2517_v52 = vld [vmem:[%s4594_s15] sm:$0xff] }
 0x227   : > { %v1418_v58 = vadd.f32 %v1410_v56, %v1409_v9  ;;  %v1415_v18 = vadd.f32 %v1408_v21, %v1407_v57  ;;  %v1424_v60 = vadd.f32 %v1414_v61, %v1413_v54  ;;  %v2487_v57 = vld [vmem:[%s4593_s14 + $0x10] sm:$0xff] }
 0x228   : > { %v1421_v63 = vadd.f32 %v1412_v49, %v1411_v59  ;;  %v2488_v49 = vld [vmem:[%s4593_s14 + $0x18] sm:$0xff] }
 0x22a   : > { %1393 = vadd.xlane.f32.xlu0 %v1392_v10  ;;  %1390 = vadd.xlane.f32.xlu1 %v1389_v48  ;;  %v2485_v48 = vld [vmem:[%s4593_s14] sm:$0xff] }
 0x22e   : > { %1419 = vadd.xlane.f32.xlu0 %v1418_v58  ;;  %1416 = vadd.xlane.f32.xlu1 %v1415_v18 }
 0x232   : > { %1425 = vadd.xlane.f32.xlu0 %v1424_v60  ;;  %1422 = vadd.xlane.f32.xlu1 %v1421_v63 }
 0x263   : > { %v1500_v19 = vpop.xlane.xlu0 %1499  ;;  %v1497_v46 = vpop.xlane.xlu1 %1496 }
 0x264   : > { %v2687_v1 = vmul.f32 -1.442695, %v1500_v19  ;;  %v2686_v50 = vmul.f32 -1.442695, %v1497_v46 }
 0x266   : > { %2790 = vpow2.f32 %v2687_v1 }
 0x267   : > { %2792 = vpow2.f32 %v2686_v50  ;;  %v1506_v12 = vpop.xlane.xlu0 %1505  ;;  %v1503_v35 = vpop.xlane.xlu1 %1502 }
 0x268   : > { %v2689_v3 = vmul.f32 -1.442695, %v1506_v12  ;;  %v2688_v2 = vmul.f32 -1.442695, %v1503_v35  ;;  %v3838_v35 = vand.u32 127, %v1367_v33 }
 0x26a   : > { %2794 = vpow2.f32 %v2689_v3  ;;  %v1883_v3 = vsub.s32 3, %v3670_v34  ;;  %vm1872_vm3 = vcmp.lt.s32.totalorder %v3838_v35, 1  ;;  %vm1794_vm4 = vcmp.lt.s32.totalorder %v3838_v35, 15 }
 0x26b   : > { %2796 = vpow2.f32 %v2688_v2  ;;  %vm1716_vm5 = vcmp.lt.s32.totalorder %v3838_v35, 16  ;;  %vm1639_vm6 = vcmp.lt.s32.totalorder %v3838_v35, 17  ;;  %vm2159_vm7 = vcmp.lt.s32.totalorder %v3838_v35, 112 }
 0x26c   : > { %vm2081_vm8 = vcmp.lt.s32.totalorder %v3838_v35, 113  ;;  %vm2003_vm9 = vcmp.lt.s32.totalorder %v3838_v35, 127  ;;  %vm2237_vm10 = vcmp.lt.s32.totalorder %v3838_v35, 111  ;;  %v2780_v35 = vld [vmem:[%s4592_s13 + $0x18] ss:$12 sps:$4 sm:$0xff]  }
 0x273   : > { %v2791_v14 = vpop.eup %2790 }
 0x274   : > { %v2793_v20 = vpop.eup %2792  ;;  %v1520_v23 = vadd.f32 1.0, %v2791_v14 }
 0x275   : > { %v1519_v55 = vadd.f32 1.0, %v2793_v20  ;;  %v3845_v20 = vld [vmem:[%s4591_s12] sm:$0xff] }
 0x276   : > { %2798 = vrcp.f32 %v1520_v23  ;;  %v3850_v23 = vld [vmem:[%s4591_s12 + $0x8] sm:$0xff]  ;;  %v3853_v33 = vrot.slane %v3845_v20, %v1883_v3 }
 0x277   : > { %v2795_v22 = vpop.eup %2794  ;;  %2800 = vrcp.f32 %v1519_v55 }
 0x278   : > { %v2797_v8 = vpop.eup %2796  ;;  %v1522_v24 = vadd.f32 1.0, %v2795_v22  ;;  %v3856_v22 = vrot.slane %v3850_v23, %v1883_v3 }
 0x279   : > { %v1521_v26 = vadd.f32 1.0, %v2797_v8 }
 0x27a   : > { %2802 = vrcp.f32 %v1522_v24 }
 0x27b   : > { %2804 = vrcp.f32 %v1521_v26 }
 0x283   : > { %v2799_v28 = vpop.eup %2798 }
 0x284   : > { %v2801_v29 = vpop.eup %2800  ;;  %v3699_v13 = vmul.f32 %v2799_v28, %v3592_v7 }
 0x285   : > { %v3702_v30 = vmul.f32 %v2801_v29, %v3582_v51  ;;  %v3715_v51 = vmul.f32 %v2799_v28, %v3595_v27  ;;  %v3718_v7 = vmul.f32 %v2801_v29, %v3584_v53 }
 0x286   : > { %1623 = vrot.lane.b32.xlu1 %v3699_v13, %s2835_s30 }
 0x287   : > { %v2803_v32 = vpop.eup %2802  ;;  %1621 = vrot.lane.b32.xlu0 %v3702_v30, %s2835_s30 }
 0x288   : > { %v2805_v25 = vpop.eup %2804  ;;  %v3707_v38 = vmul.f32 %v2803_v32, %v3617_v4  ;;  %v3723_v4 = vmul.f32 %v2803_v32, %v3619_v62 }
 0x289   : > { %v3710_v39 = vmul.f32 %v2805_v25, %v3605_v41  ;;  %v3726_v41 = vmul.f32 %v2805_v25, %v3607_v5 }
 0x28a   : > { %1627 = vrot.lane.b32.xlu1 %v3707_v38, %s2835_s30 }
 0x28b   : > { %1625 = vrot.lane.b32.xlu0 %v3710_v39, %s2835_s30 }
 0x28e   : > { %1631 = vrot.lane.b32.xlu1 %v3715_v51, %s2835_s30 }
 0x28f   : > { %1629 = vrot.lane.b32.xlu0 %v3718_v7, %s2835_s30 }
 0x292   : > { %1635 = vrot.lane.b32.xlu1 %v3723_v4, %s2835_s30 }
 0x293   : > { %1633 = vrot.lane.b32.xlu0 %v3726_v41, %s2835_s30 }
 0x296   : > { %1700 = vrot.lane.b32.xlu1 %v3702_v30, %s2836_s25 }
 0x297   : > { %1702 = vrot.lane.b32.xlu0 %v3699_v13, %s2836_s25 }
 0x29a   : > { %1704 = vrot.lane.b32.xlu1 %v3710_v39, %s2836_s25 }
 0x29b   : > { %1708 = vrot.lane.b32.xlu0 %v3718_v7, %s2836_s25 }
 0x29e   : > { %1706 = vrot.lane.b32.xlu1 %v3707_v38, %s2836_s25 }
 0x29f   : > { %1712 = vrot.lane.b32.xlu0 %v3726_v41, %s2836_s25 }
 0x2a2   : > { %1710 = vrot.lane.b32.xlu1 %v3715_v51, %s2836_s25 }
 0x2a3   : > { %1860 = vrot.lane.b32.xlu0 %v3710_v39, %s2837_s26 }
 0x2a6   : > { %1714 = vrot.lane.b32.xlu1 %v3723_v4, %s2836_s25 }
 0x2a7   : > { %1868 = vrot.lane.b32.xlu0 %v3726_v41, %s2837_s26 }
 0x2aa   : > { %1862 = vrot.lane.b32.xlu1 %v3707_v38, %s2837_s26 }
 0x2ab   : > { %1856 = vrot.lane.b32.xlu0 %v3702_v30, %s2837_s26 }
 0x2ae   : > { %1870 = vrot.lane.b32.xlu1 %v3723_v4, %s2837_s26 }
 0x2af   : > { %1864 = vrot.lane.b32.xlu0 %v3718_v7, %s2837_s26  ;;  %v1385_v53 = vpop.xlane.xlu1 %1384  ;;  %v1388_v27 = vpop.xlane.xlu0 %1387 }
 0x2b0   : > { %v1396_v21 = vmul.f32 0.00390625, %v1388_v27  ;;  %v1395_v63 = vmul.f32 0.00390625, %v1385_v53 }
 0x2b2   : > { %1858 = vrot.lane.b32.xlu1 %v3699_v13, %s2837_s26 }
 0x2b3   : > { %1782 = vrot.lane.b32.xlu0 %v3710_v39, %s2838_s20  ;;  %v1391_v5 = vpop.xlane.xlu1 %1390  ;;  %v1394_v62 = vpop.xlane.xlu0 %1393 }
 0x2b4   : > { %v1397_v1 = vmul.f32 0.00390625, %v1391_v5  ;;  %v1398_v2 = vmul.f32 0.00390625, %v1394_v62 }
 0x2b6   : > { %1866 = vrot.lane.b32.xlu1 %v3715_v51, %s2837_s26 }
 0x2b7   : > { %1790 = vrot.lane.b32.xlu0 %v3726_v41, %s2838_s20  ;;  %v1417_v40 = vpop.xlane.xlu1 %1416  ;;  %v3775_v11 = vpop.xlane.xlu0 %1419 }
 0x2b8   : > { %v1427_v18 = vmul.f32 0.00390625, %v1417_v40  ;;  %v1428_v26 = vmul.f32 0.00390625, %v3775_v11 }
 0x2ba   : > { %1784 = vrot.lane.b32.xlu1 %v3707_v38, %s2838_s20 }
 0x2bb   : > { %1778 = vrot.lane.b32.xlu0 %v3702_v30, %s2838_s20  ;;  %v1423_v31 = vpop.xlane.xlu1 %1422  ;;  %v3780_v45 = vpop.xlane.xlu0 %1425 }
 0x2bc   : > { %v1429_v59 = vmul.f32 0.00390625, %v1423_v31  ;;  %v1430_v40 = vmul.f32 0.00390625, %v3780_v45  ;;  %v1805_v45 = vsub.s32 2, %v3670_v34 }
 0x2be   : > { %1792 = vrot.lane.b32.xlu1 %v3723_v4, %s2838_s20 }
 0x2bf   : > { %1786 = vrot.lane.b32.xlu0 %v3718_v7, %s2838_s20 }
 0x2c2   : > { %1780 = vrot.lane.b32.xlu1 %v3699_v13, %s2838_s20 }
 0x2c3   : > { %2147 = vrot.lane.b32.xlu0 %v3710_v39, %s2839_s22 }
 0x2c6   : > { %1788 = vrot.lane.b32.xlu1 %v3715_v51, %s2838_s20 }
 0x2c7   : > { %2155 = vrot.lane.b32.xlu0 %v3726_v41, %s2839_s22 }
 0x2ca   : > { %2149 = vrot.lane.b32.xlu1 %v3707_v38, %s2839_s22 }
 0x2cb   : > { %2143 = vrot.lane.b32.xlu0 %v3702_v30, %s2839_s22 }
 0x2ce   : > { %2157 = vrot.lane.b32.xlu1 %v3723_v4, %s2839_s22 }
 0x2cf   : > { %2151 = vrot.lane.b32.xlu0 %v3718_v7, %s2839_s22 }
 0x2d2   : > { %2145 = vrot.lane.b32.xlu1 %v3699_v13, %s2839_s22 }
 0x2d3   : > { %2069 = vrot.lane.b32.xlu0 %v3710_v39, %s2840_s27 }
 0x2d6   : > { %2153 = vrot.lane.b32.xlu1 %v3715_v51, %s2839_s22  ;;  %s4544_s22 = scalar_lea.vmem %s4595_s16, %s2953_s29 }
 0x2d7   : > { %2077 = vrot.lane.b32.xlu0 %v3726_v41, %s2840_s27 }
 0x2da   : > { %2071 = vrot.lane.b32.xlu1 %v3707_v38, %s2840_s27 }
 0x2db   : > { %2065 = vrot.lane.b32.xlu0 %v3702_v30, %s2840_s27 }
 0x2de   : > { %2079 = vrot.lane.b32.xlu1 %v3723_v4, %s2840_s27 }
 0x2df   : > { %2073 = vrot.lane.b32.xlu0 %v3718_v7, %s2840_s27 }
 0x2e2   : > { %2067 = vrot.lane.b32.xlu1 %v3699_v13, %s2840_s27 }
 0x2e3   : > { %1991 = vrot.lane.b32.xlu0 %v3710_v39, %s2841_s28 }
 0x2e6   : > { %2075 = vrot.lane.b32.xlu1 %v3715_v51, %s2840_s27 }
 0x2e7   : > { %1999 = vrot.lane.b32.xlu0 %v3726_v41, %s2841_s28 }
 0x2ea   : > { %1993 = vrot.lane.b32.xlu1 %v3707_v38, %s2841_s28 }
 0x2eb   : > { %1987 = vrot.lane.b32.xlu0 %v3702_v30, %s2841_s28 }
 0x2ee   : > { %2001 = vrot.lane.b32.xlu1 %v3723_v4, %s2841_s28 }
 0x2ef   : > { %1995 = vrot.lane.b32.xlu0 %v3718_v7, %s2841_s28 }
 0x2f2   : > { %1989 = vrot.lane.b32.xlu1 %v3699_v13, %s2841_s28 }
 0x2f3   : > { %2225 = vrot.lane.b32.xlu0 %v3710_v39, %s2842_s0 }
 0x2f6   : > { %1997 = vrot.lane.b32.xlu1 %v3715_v51, %s2841_s28 }
 0x2f7   : > { %2233 = vrot.lane.b32.xlu0 %v3726_v41, %s2842_s0 }
 0x2f8   : > { %v3784_v43 = vpop.permute.xlu1 %1623 }
 0x2f9   : > { %v3786_v6 = vpop.permute.xlu0 %1621 }
 0x2fa   : > { %2227 = vrot.lane.b32.xlu1 %v3707_v38, %s2842_s0 }
 0x2fb   : > { %2221 = vrot.lane.b32.xlu0 %v3702_v30, %s2842_s0 }
 0x2fc   : > { %v3790_v37 = vpop.permute.xlu1 %1627 }
 0x2fd   : > { %v3792_v15 = vpop.permute.xlu0 %1625 }
 0x2fe   : > { %2235 = vrot.lane.b32.xlu1 %v3723_v4, %s2842_s0 }
 0x2ff   : > { %2229 = vrot.lane.b32.xlu0 %v3718_v7, %s2842_s0 }
 0x300   : > { %v3796_v17 = vpop.permute.xlu1 %1631 }
 0x301   : > { %v3801_v47 = vpop.permute.xlu0 %1629 }
 0x302   : > { %2223 = vrot.lane.b32.xlu1 %v3699_v13, %s2842_s0 }
 0x303   : > { %2496 = vperm.xlu0 %2766, %v2486_v16  }
 0x304   : > { %v3804_v42 = vpop.permute.xlu1 %1635 }
 0x305   : > { %v3809_v10 = vpop.permute.xlu0 %1633 }
 0x306   : > { %2231 = vrot.lane.b32.xlu1 %v3715_v51, %s2842_s0 }
 0x307   : > { %2523 = vperm.xlu0 %2766, %v2517_v52  }
 0x308   : > { %v3815_v56 = vpop.permute.xlu1 %1700 }
 0x309   : > { %v3817_v9 = vpop.permute.xlu0 %1702 }
 0x30a   : > { %2491 = vperm.xlu1 %2767, %v2485_v48  }
 0x30b   : > { %1554 = vperm.xlu0 %2766, %v1396_v21  }
 0x30c   : > { %v3822_v58 = vpop.permute.xlu1 %1704 }
 0x30d   : > { %v3824_v61 = vpop.permute.xlu0 %1708 }
 0x30e   : > { %2501 = vperm.xlu1 %2767, %v2487_v57   ;;  %v2518_v57 = vld [vmem:[%s4594_s15 + $0x8] sm:$0xff] }
 0x30f   : > { %1569 = vperm.xlu0 %2766, %v1427_v18  }
 0x310   : > { %v3829_v54 = vpop.permute.xlu1 %1706 }
 0x311   : > { %v3831_v60 = vpop.permute.xlu0 %1712 }
 0x312   : > { %2506 = vperm.xlu1 %2767, %v2488_v49  }
 0x313   : > { %1579 = vperm.xlu0 %2766, %v1429_v59  }
 0x314   : > { %v3833_v19 = vpop.permute.xlu1 %1710 }
 0x315   : > { %v1861_v46 = vpop.permute.xlu0 %1860 }
 0x316   : > { %1549 = vperm.xlu1 %2767, %v1395_v63  }
 0x318   : > { %v3835_v50 = vpop.permute.xlu1 %1714 }
 0x319   : > { %v1869_v12 = vpop.permute.xlu0 %1868 }
 0x31a   : > { %1559 = vperm.xlu1 %2767, %v1397_v1   ;;  %v1875_v8 = vsel %vm1872_vm3, %v1861_v46, %v1869_v12  ;;  %v1879_v24 = vsel %vm1872_vm3, %v1869_v12, %v1861_v46 }
 0x31b   : > { %v1893_v53 = vmul.f32 %v3853_v33, %v1879_v24  ;;  %v1894_v27 = vmul.f32 %v3856_v22, %v1875_v8  ;;  %v3890_v24 = vrot.slane %v3845_v20, %v1805_v45 }
 0x31c   : > { %v1863_v14 = vpop.permute.xlu1 %1862 }
 0x31d   : > { %v1857_v55 = vpop.permute.xlu0 %1856 }
 0x31e   : > { %1564 = vperm.xlu1 %2767, %v1398_v2  }
 0x320   : > { %v1871_v28 = vpop.permute.xlu1 %1870 }
 0x321   : > { %v1865_v29 = vpop.permute.xlu0 %1864  ;;  %v1876_v32 = vsel %vm1872_vm3, %v1863_v14, %v1871_v28  ;;  %v1880_v25 = vsel %vm1872_vm3, %v1871_v28, %v1863_v14 }
 0x322   : > { %v1895_v5 = vmul.f32 %v3853_v33, %v1880_v25  ;;  %v1896_v62 = vmul.f32 %v3856_v22, %v1876_v32  ;;  %1574 = vperm.xlu1 %2767, %v1428_v26   ;;  %v1873_v48 = vsel %vm1872_vm3, %v1857_v55, %v1865_v29  ;;  %v1877_v21 = vsel %vm1872_vm3, %v1865_v29, %v1857_v55 }
 0x323   : > { %v1889_v46 = vmul.f32 %v3853_v33, %v1877_v21  ;;  %v1890_v1 = vmul.f32 %v3856_v22, %v1873_v48  ;;  %v3893_v26 = vrot.slane %v3850_v23, %v1805_v45 }
 0x324   : > { %v2313_v11 = vpack.c.bf16 %v1895_v5, %v1893_v53  ;;  %v1859_v31 = vpop.permute.xlu1 %1858  ;;  %v2314_v16 = vpack.c.bf16 %v1896_v62, %v1894_v27  ;;  %v2776_v5 = vld [vmem:[%s4592_s13 + $0x4] ss:$12 sps:$4 sm:$0xff]  }
 0x325   : > { %v1783_v52 = vpop.permute.xlu0 %1782  ;;  %2411 = vmatprep.mubr.bf16.mxu1 %v2776_v5 }
 0x326   : > { %1584 = vperm.xlu1 %2767, %v1430_v40   ;;  %2379 = vmatprep.subr.bf16.mxu1 %v2314_v16 }
 0x327   : > { %2380 = vmatpush1.bf16.msra.mxu1 %v2313_v11 }
 0x328   : > { %v1867_v18 = vpop.permute.xlu1 %1866 }
 0x329   : > { %v1791_v49 = vpop.permute.xlu0 %1790  ;;  %v1874_v59 = vsel %vm1872_vm3, %v1859_v31, %v1867_v18  ;;  %v1878_v63 = vsel %vm1872_vm3, %v1867_v18, %v1859_v31  ;;  %v3919_v18 = vrot.slane %v3850_v23, %v3678_v44 }
 0x32a   : > { %v1891_v12 = vmul.f32 %v3853_v33, %v1878_v63  ;;  %v1892_v3 = vmul.f32 %v3856_v22, %v1874_v59  ;;  %2528 = vperm.xlu1 %2767, %v2518_v57   ;;  %v1797_v28 = vsel %vm1794_vm4, %v1783_v52, %v1791_v49  ;;  %v1801_v29 = vsel %vm1794_vm4, %v1791_v49, %v1783_v52 }
 0x32b   : > { %v1815_v62 = vmul.f32 %v3890_v24, %v1801_v29  ;;  %v1816_v40 = vmul.f32 %v3893_v26, %v1797_v28  ;;  %v1720_v57 = vsel %vm1716_vm5, %v3829_v54, %v3835_v50  ;;  %v1719_v59 = vsel %vm1716_vm5, %v3822_v58, %v3831_v60 }
 0x32c   : > { %v2311_v2 = vpack.c.bf16 %v1891_v12, %v1889_v46  ;;  %v1785_v14 = vpop.permute.xlu1 %1784  ;;  %v2312_v55 = vpack.c.bf16 %v1892_v3, %v1890_v1  ;;  %v1724_v46 = vsel %vm1716_vm5, %v3835_v50, %v3829_v54  ;;  %v1740_v1 = vmul.f32 %v3919_v18, %v1720_v57 }
 0x32d   : > { %v1779_v8 = vpop.permute.xlu0 %1778  ;;  %v3946_v54 = vrot.slane %v3845_v20, %v3678_v44  ;;  %v1718_v50 = vsel %vm1716_vm5, %v3817_v9, %v3833_v19  ;;  %v1723_v29 = vsel %vm1716_vm5, %v3831_v60, %v3822_v58  ;;  %v1717_v44 = vsel %vm1716_vm5, %v3815_v56, %v3824_v61 }
 0x32e   : > { %2381 = vmatprep.subr.bf16.mxu1 %v2312_v55  ;;  %v1722_v58 = vsel %vm1716_vm5, %v3833_v19, %v3817_v9  ;;  %v1736_v60 = vmul.f32 %v3919_v18, %v1718_v50  ;;  %v3981_v9 = vrot.slane %v3850_v23, %v3673_v36  ;;  %v1721_v19 = vsel %vm1716_vm5, %v3824_v61, %v3815_v56 }
 0x32f   : > { %2382 = vmatpush1.bf16.msra.mxu1 %v2311_v2  ;;  %v1739_v5 = vmul.f32 %v3946_v54, %v1724_v46  ;;  %v1647_v57 = vsel %vm1639_vm6, %v3804_v42, %v3790_v37 }
 0x330   : > { %v1793_v32 = vpop.permute.xlu1 %1792 }
 0x331   : > { %v1787_v25 = vpop.permute.xlu0 %1786  ;;  %v1798_v53 = vsel %vm1794_vm4, %v1785_v14, %v1793_v32  ;;  %v1802_v27 = vsel %vm1794_vm4, %v1793_v32, %v1785_v14  ;;  %v1738_v32 = vmul.f32 %v3919_v18, %v1719_v59 }
 0x332   : > { %v1817_v11 = vmul.f32 %v3890_v24, %v1802_v27  ;;  %v1818_v31 = vmul.f32 %v3893_v26, %v1798_v53  ;;  %v1795_v45 = vsel %vm1794_vm4, %v1779_v8, %v1787_v25  ;;  %v1799_v49 = vsel %vm1794_vm4, %v1787_v25, %v1779_v8 }
 0x333   : > { %v1811_v14 = vmul.f32 %v3890_v24, %v1799_v49  ;;  %v1812_v55 = vmul.f32 %v3893_v26, %v1795_v45  ;;  %v1735_v45 = vmul.f32 %v3946_v54, %v1722_v58 }
 0x334   : > { %v2309_v16 = vpack.c.bf16 %v1817_v11, %v1815_v62  ;;  %v1781_v52 = vpop.permute.xlu1 %1780  ;;  %v2310_v48 = vpack.c.bf16 %v1818_v31, %v1816_v40  ;;  %v2306_v40 = vpack.c.bf16 %v1740_v1, %v1738_v32  ;;  %v1642_v11 = vsel %vm1639_vm6, %v3792_v15, %v3809_v10 }
 0x335   : > { %v3911_v21 = vpop.permute.xlu0 %2147  ;;  %v1643_v31 = vsel %vm1639_vm6, %v3790_v37, %v3804_v42  ;;  %v1661_v56 = vmul.f32 %v3981_v9, %v1642_v11  ;;  %v4001_v1 = vrot.slane %v3845_v20, %v3673_v36  ;;  %v1640_v37 = vsel %vm1639_vm6, %v3786_v6, %v3801_v47 }
 0x336   : > { %2383 = vmatprep.subr.bf16.mxu1 %v2310_v48  ;;  %v1663_v61 = vmul.f32 %v3981_v9, %v1643_v31  ;;  %v1641_v42 = vsel %vm1639_vm6, %v3784_v43, %v3796_v17  ;;  %v1657_v50 = vmul.f32 %v3981_v9, %v1640_v37 }
 0x337   : > { %2384 = vmatpush1.bf16.msra.mxu1 %v2309_v16  ;;  %v1737_v16 = vmul.f32 %v3946_v54, %v1723_v29  ;;  %v1659_v29 = vmul.f32 %v3981_v9, %v1641_v42 }
 0x338   : > { %v1789_v63 = vpop.permute.xlu1 %1788  ;;  %v2302_v32 = vpack.c.bf16 %v1663_v61, %v1661_v56 }
 0x339   : > { %v3934_v12 = vpop.permute.xlu0 %2155  ;;  %v1796_v3 = vsel %vm1794_vm4, %v1781_v52, %v1789_v63  ;;  %v1800_v2 = vsel %vm1794_vm4, %v1789_v63, %v1781_v52  ;;  %v1734_v52 = vmul.f32 %v3919_v18, %v1717_v44  ;;  %v2305_v49 = vpack.c.bf16 %v1739_v5, %v1737_v16 }
 0x33a   : > { %v1813_v8 = vmul.f32 %v3890_v24, %v1800_v2  ;;  %v1814_v28 = vmul.f32 %v3893_v26, %v1796_v3  ;;  %v1646_v63 = vsel %vm1639_vm6, %v3809_v10, %v3792_v15  ;;  %v1733_v15 = vmul.f32 %v3946_v54, %v1721_v19 }
 0x33b   : > { %v2304_v46 = vpack.c.bf16 %v1736_v60, %v1734_v52  ;;  %v2170_v10 = vsub.s32 7, %v3670_v34  ;;  %v1645_v3 = vsel %vm1639_vm6, %v3796_v17, %v3784_v43  ;;  %v1660_v2 = vmul.f32 %v4001_v1, %v1646_v63 }
 0x33c   : > { %v2307_v25 = vpack.c.bf16 %v1813_v8, %v1811_v14  ;;  %v2150_v53 = vpop.permute.xlu1 %2149  ;;  %v2308_v27 = vpack.c.bf16 %v1814_v28, %v1812_v55  ;;  %v1662_v14 = vmul.f32 %v4001_v1, %v1647_v57  ;;  %v2303_v55 = vpack.c.bf16 %v1735_v45, %v1733_v15 }
 0x33d   : > { %v3962_v62 = vpop.permute.xlu0 %2143  ;;  %v1644_v28 = vsel %vm1639_vm6, %v3801_v47, %v3786_v6  ;;  %v4029_v43 = vrot.slane %v3850_v23, %v2170_v10  ;;  %v1658_v44 = vmul.f32 %v4001_v1, %v1645_v3  ;;  %v2166_v6 = vsel %vm2159_vm7, %v3934_v12, %v3911_v21 }
 0x33e   : > { %2385 = vmatprep.subr.bf16.mxu1 %v2308_v27  ;;  %v1656_v27 = vmul.f32 %v4001_v1, %v1644_v28  ;;  %v2301_v5 = vpack.c.bf16 %v1662_v14, %v1660_v2  ;;  %v4041_v11 = vrot.slane %v3845_v20, %v2170_v10  ;;  %v2162_v16 = vsel %vm2159_vm7, %v3911_v21, %v3934_v12 }
 0x33f   : > { %2386 = vmatpush1.bf16.msra.mxu1 %v2307_v25  ;;  %v2181_v19 = vmul.f32 %v4029_v43, %v2166_v6  ;;  %v2092_v52 = vsub.s32 6, %v3670_v34 }
 0x340   : > { %2387 = vmatprep.subr.bf16.mxu1 %v2306_v40  ;;  %v2158_v48 = vpop.permute.xlu1 %2157  ;;  %v2300_v40 = vpack.c.bf16 %v1659_v29, %v1657_v50  ;;  %v2180_v56 = vmul.f32 %v4041_v11, %v2162_v16 }
 0x341   : > { %v2152_v59 = vpop.permute.xlu0 %2151  ;;  %v2167_v25 = vsel %vm2159_vm7, %v2158_v48, %v2150_v53  ;;  %v2163_v58 = vsel %vm2159_vm7, %v2150_v53, %v2158_v48  ;;  %v2299_v48 = vpack.c.bf16 %v1658_v44, %v1656_v27  ;;  %v4065_v37 = vrot.slane %v3850_v23, %v2092_v52 }
 0x342   : > { %v2183_v60 = vmul.f32 %v4029_v43, %v2167_v25  ;;  %v2164_v57 = vsel %vm2159_vm7, %v2152_v59, %v3962_v62  ;;  %v2182_v45 = vmul.f32 %v4041_v11, %v2163_v58  ;;  %v2160_v61 = vsel %vm2159_vm7, %v3962_v62, %v2152_v59 }
 0x343   : > { %2388 = vmatpush1.bf16.msra.mxu1 %v2305_v49  ;;  %v4077_v28 = vrot.slane %v3845_v20, %v2092_v52 }
 0x344   : > { %2389 = vmatprep.subr.bf16.mxu1 %v2304_v46  ;;  %v2146_v36 = vpop.permute.xlu1 %2145  ;;  %v2330_v12 = vpack.c.bf16 %v2183_v60, %v2181_v19  ;;  %v2177_v46 = vmul.f32 %v4029_v43, %v2164_v57  ;;  %v2329_v15 = vpack.c.bf16 %v2182_v45, %v2180_v56  ;;  %v2014_v60 = vsub.s32 5, %v3670_v34 }
 0x345   : > { %v2070_v8 = vpop.permute.xlu0 %2069 }
 0x347   : > { %2390 = vmatpush1.bf16.msra.mxu1 %v2303_v55  ;;  %v2176_v55 = vmul.f32 %v4041_v11, %v2160_v61 }
 0x348   : > { %2391 = vmatprep.subr.bf16.mxu1 %v2302_v32  ;;  %v2154_v17 = vpop.permute.xlu1 %2153 }
 0x349   : > { %v2078_v47 = vpop.permute.xlu0 %2077  ;;  %v2165_v31 = vsel %vm2159_vm7, %v2154_v17, %v2146_v36  ;;  %v2161_v63 = vsel %vm2159_vm7, %v2146_v36, %v2154_v17 }
 0x34a   : > { %v2179_v21 = vmul.f32 %v4029_v43, %v2165_v31  ;;  %v2088_v10 = vsel %vm2081_vm8, %v2078_v47, %v2070_v8  ;;  %v2178_v36 = vmul.f32 %v4041_v11, %v2161_v63  ;;  %v2084_v50 = vsel %vm2081_vm8, %v2070_v8, %v2078_v47 }
 0x34b   : > { %2392 = vmatpush1.bf16.msra.mxu1 %v2301_v5  ;;  %v2103_v29 = vmul.f32 %v4065_v37, %v2088_v10  ;;  %v2102_v5 = vmul.f32 %v4077_v28, %v2084_v50 }
 0x34c   : > { %2393 = vmatprep.subr.bf16.mxu1 %v2300_v40  ;;  %v2072_v53 = vpop.permute.xlu1 %2071  ;;  %v2328_v14 = vpack.c.bf16 %v2179_v21, %v2177_v46  ;;  %v2327_v25 = vpack.c.bf16 %v2178_v36, %v2176_v55  ;;  %v4099_v21 = vrot.slane %v3845_v20, %v2014_v60 }
 0x34d   : > { %v2066_v49 = vpop.permute.xlu0 %2065 }
 0x34f   : > { %2394 = vmatpush1.bf16.msra.mxu1 %v2299_v48 }
 0x350   : > { %2395 = vmatprep.subr.bf16.mxu1 %v2330_v12  ;;  %v2080_v42 = vpop.permute.xlu1 %2079  ;;  %v4102_v12 = vrot.slane %v3850_v23, %v2014_v60 }
 0x351   : > { %v2074_v3 = vpop.permute.xlu0 %2073  ;;  %v2089_v2 = vsel %vm2081_vm8, %v2080_v42, %v2072_v53  ;;  %v2085_v62 = vsel %vm2081_vm8, %v2072_v53, %v2080_v42 }
 0x352   : > { %v2105_v59 = vmul.f32 %v4065_v37, %v2089_v2  ;;  %v2104_v17 = vmul.f32 %v4077_v28, %v2085_v62  ;;  %v2082_v6 = vsel %vm2081_vm8, %v2066_v49, %v2074_v3  ;;  %v2086_v58 = vsel %vm2081_vm8, %v2074_v3, %v2066_v49 }
 0x353   : > { %2396 = vmatpush2.bf16.msra.mxu1 %v2329_v15  ;;  %v2098_v19 = vmul.f32 %v4077_v28, %v2082_v6  ;;  %v2099_v52 = vmul.f32 %v4065_v37, %v2086_v58 }
 0x354   : > { %2397 = vmatprep.subr.bf16.mxu1 %v2328_v14  ;;  %v2068_v32 = vpop.permute.xlu1 %2067  ;;  %v2326_v44 = vpack.c.bf16 %v2105_v59, %v2103_v29  ;;  %v2325_v47 = vpack.c.bf16 %v2104_v17, %v2102_v5  ;;  %v1936_v59 = vsub.s32 4, %v3670_v34 }
 0x355   : > { %v1992_v27 = vpop.permute.xlu0 %1991 }
 0x356   : > { %v4122_v17 = vrot.slane %v3850_v23, %v1936_v59 }
 0x357   : > { %2398 = vmatpush2.bf16.msra.mxu1 %v2327_v25 }
 0x358   : > { %2399 = vmatprep.subr.bf16.mxu1 %v2326_v44  ;;  %v2076_v8 = vpop.permute.xlu1 %2075  ;;  %v1947_v6 = vmul.f32 %v4122_v17, %v3726_v41  ;;  %v1949_v58 = vmul.f32 %v4122_v17, %v3723_v4 }
 0x359   : > { %v2000_v40 = vpop.permute.xlu0 %1999  ;;  %v2083_v31 = vsel %vm2081_vm8, %v2068_v32, %v2076_v8  ;;  %v2087_v16 = vsel %vm2081_vm8, %v2076_v8, %v2068_v32 }
 0x35a   : > { %v2100_v53 = vmul.f32 %v4077_v28, %v2083_v31  ;;  %v2101_v48 = vmul.f32 %v4065_v37, %v2087_v16  ;;  %v2006_v56 = vsel %vm2003_vm9, %v1992_v27, %v2000_v40  ;;  %v2010_v61 = vsel %vm2003_vm9, %v2000_v40, %v1992_v27 }
 0x35b   : > { %2400 = vmatpush2.bf16.msra.mxu1 %v2325_v47  ;;  %v2024_v36 = vmul.f32 %v4099_v21, %v2006_v56  ;;  %v2025_v3 = vmul.f32 %v4102_v12, %v2010_v61  ;;  %v4137_v40 = vrot.slane %v3845_v20, %v1936_v59  ;;  %v2318_v20 = vpack.c.bf16 %v1949_v58, %v1947_v6  ;;  %v2774_v59 = vld [vmem:[%s4592_s13] ss:$12 sps:$4 sm:$0xff]  }
 0x35c   : > { %v2323_v57 = vpack.c.bf16 %v2100_v53, %v2098_v19  ;;  %v1994_v45 = vpop.permute.xlu1 %1993  ;;  %v2324_v49 = vpack.c.bf16 %v2101_v48, %v2099_v52  ;;  %v1943_v52 = vmul.f32 %v4122_v17, %v3718_v7  ;;  %v1945_v53 = vmul.f32 %v4122_v17, %v3715_v51 }
 0x35d   : > { %v1988_v63 = vpop.permute.xlu0 %1987  ;;  %v1946_v41 = vmul.f32 %v4137_v40, %v3710_v39  ;;  %v1948_v4 = vmul.f32 %v4137_v40, %v3707_v38  ;;  %v4156_v39 = vld [vmem:[%s4591_s12 + $0x18] ss:$0 sm:$0xff] }
 0x35e   : > { %2401 = vmatprep.subr.bf16.mxu1 %v2324_v49  ;;  %v1944_v49 = vmul.f32 %v4137_v40, %v3699_v13 }
 0x35f   : > { %2402 = vmatpush2.bf16.msra.mxu1 %v2323_v57  ;;  %v4151_v57 = vld [vmem:[%s4591_s12 + $0x10] ss:$0 sm:$0xff]  ;;  %v2317_v61 = vpack.c.bf16 %v1948_v4, %v1946_v41  ;;  %v1539_v4 = vld [vmem:[%s4589_s10] sm:$0xff] }
 0x360   : > { %v2002_v46 = vpop.permute.xlu1 %2001 }
 0x361   : > { %v1996_v42 = vpop.permute.xlu0 %1995  ;;  %v2007_v15 = vsel %vm2003_vm9, %v1994_v45, %v2002_v46  ;;  %v2011_v10 = vsel %vm2003_vm9, %v2002_v46, %v1994_v45  ;;  %v1942_v45 = vmul.f32 %v4137_v40, %v3702_v30  ;;  %v2316_v46 = vpack.c.bf16 %v1945_v53, %v1943_v52 }
 0x362   : > { %v2026_v2 = vmul.f32 %v4099_v21, %v2007_v15  ;;  %v2027_v62 = vmul.f32 %v4102_v12, %v2011_v10  ;;  %v2004_v32 = vsel %vm2003_vm9, %v1988_v63, %v1996_v42  ;;  %v2008_v25 = vsel %vm2003_vm9, %v1996_v42, %v1988_v63 }
 0x363   : > { %v2020_v8 = vmul.f32 %v4099_v21, %v2004_v32  ;;  %v2021_v47 = vmul.f32 %v4102_v12, %v2008_v25 }
 0x364   : > { %v2321_v14 = vpack.c.bf16 %v2026_v2, %v2024_v36  ;;  %v1990_v55 = vpop.permute.xlu1 %1989  ;;  %v2322_v50 = vpack.c.bf16 %v2027_v62, %v2025_v3  ;;  %v2315_v62 = vpack.c.bf16 %v1944_v49, %v1942_v45  ;;  %v1543_v49 = vld [vmem:[%s4589_s10 + $0x20] sm:$0xff] }
 0x365   : > { %v2226_v29 = vpop.permute.xlu0 %2225 }
 0x366   : > { %2403 = vmatprep.subr.bf16.mxu1 %v2322_v50  ;;  %v2778_v50 = vld [vmem:[%s4592_s13 + $0x1c] ss:$12 sps:$4 sm:$0xff]  }
 0x367   : > { %2404 = vmatpush2.bf16.msra.mxu1 %v2321_v14 }
 0x368   : > { %v1998_v27 = vpop.permute.xlu1 %1997 }
 0x369   : > { %v2234_v44 = vpop.permute.xlu0 %2233  ;;  %v2005_v34 = vsel %vm2003_vm9, %v1990_v55, %v1998_v27  ;;  %v2009_v5 = vsel %vm2003_vm9, %v1998_v27, %v1990_v55 }
 0x36a   : > { %v2022_v23 = vmul.f32 %v4099_v21, %v2005_v34  ;;  %v2023_v60 = vmul.f32 %v4102_v12, %v2009_v5  ;;  %v2240_v38 = vsel %vm2237_vm10, %v2226_v29, %v2234_v44  ;;  %v2244_v7 = vsel %vm2237_vm10, %v2234_v44, %v2226_v29 }
 0x36b   : > { %v2258_v42 = vmul.f32 %v4151_v57, %v2240_v38  ;;  %v2259_v15 = vmul.f32 %v4156_v39, %v2244_v7 }
 0x36c   : > { %v2319_v31 = vpack.c.bf16 %v2022_v23, %v2020_v8  ;;  %v2228_v16 = vpop.permute.xlu1 %2227  ;;  %v2320_v19 = vpack.c.bf16 %v2023_v60, %v2021_v47  ;;  %v2777_v8 = vld [vmem:[%s4592_s13 + $0x8] ss:$12 sps:$4 sm:$0xff]   ;;  %v2781_v60 = vld [vmem:[%s4592_s13 + $0x20] ss:$12 sps:$4 sm:$0xff]  }
 0x36d   : > { %v2222_v48 = vpop.permute.xlu0 %2221 }
 0x36e   : > { %2405 = vmatprep.subr.bf16.mxu1 %v2320_v19 }
 0x36f   : > { %2406 = vmatpush2.bf16.msra.mxu1 %v2319_v31 }
 0x370   : > { %2407 = vmatprep.subr.bf16.mxu1 %v2318_v20  ;;  %v2236_v51 = vpop.permute.xlu1 %2235 }
 0x371   : > { %v2241_v63 = vsel %vm2237_vm10, %v2228_v16, %v2236_v51  ;;  %v2245_v56 = vsel %vm2237_vm10, %v2236_v51, %v2228_v16  ;;  %v2230_v30 = vpop.permute.xlu0 %2229 }
 0x372   : > { %v2260_v10 = vmul.f32 %v4151_v57, %v2241_v63  ;;  %v2261_v36 = vmul.f32 %v4156_v39, %v2245_v56  ;;  %v2238_v14 = vsel %vm2237_vm10, %v2222_v48, %v2230_v30  ;;  %v2242_v55 = vsel %vm2237_vm10, %v2230_v30, %v2222_v48  ;;  %v1541_v48 = vld [vmem:[%s4589_s10 + $0x10] sm:$0xff]  ;;  %v1542_v63 = vld [vmem:[%s4589_s10 + $0x18] sm:$0xff] }
 0x373   : > { %2408 = vmatpush2.bf16.msra.mxu1 %v2317_v61  ;;  %v2254_v27 = vmul.f32 %v4151_v57, %v2238_v14  ;;  %v2255_v44 = vmul.f32 %v4156_v39, %v2242_v55 }
 0x374   : > { %v2333_v3 = vpack.c.bf16 %v2260_v10, %v2258_v42  ;;  %2409 = vmatprep.subr.bf16.mxu1 %v2316_v46  ;;  %v2224_v13 = vpop.permute.xlu1 %2223  ;;  %v2334_v2 = vpack.c.bf16 %v2261_v36, %v2259_v15  ;;  %v1545_v36 = vld [vmem:[%s4589_s10 + $0x30] sm:$0xff] }
 0x376   : > { %2444 = vmatprep.subr.bf16.mxu0 %v2334_v2 }
 0x377   : > { %2410 = vmatpush2.bf16.msra.mxu1 %v2315_v62  ;;  %2445 = vmatpush1.bf16.msra.mxu0 %v2333_v3 }
 0x378   : > { %v2232_v29 = vpop.permute.xlu1 %2231 }
 0x379   : > { %v2239_v32 = vsel %vm2237_vm10, %v2224_v13, %v2232_v29  ;;  %v2243_v25 = vsel %vm2237_vm10, %v2232_v29, %v2224_v13  ;;  %v1544_v13 = vld [vmem:[%s4589_s10 + $0x28] sm:$0xff] }
 0x37a   : > { %v2256_v34 = vmul.f32 %v4151_v57, %v2239_v32  ;;  %v2257_v5 = vmul.f32 %v4156_v39, %v2243_v25  ;;  %2412 = vmatmul.mubr.bf16.vlgmr.msra.gmra.mxu1 %v2774_v59  ;;  %v1546_v32 = vld [vmem:[%s4589_s10 + $0x38] sm:$0xff] }
 0x37b   : > { %2421 = vmatprep.mubr.bf16.mxu1 %v2778_v50 }
 0x37c   : > { %v2331_v6 = vpack.c.bf16 %v2256_v34, %v2254_v27  ;;  %v2332_v58 = vpack.c.bf16 %v2257_v5, %v2255_v44 }
 0x37e   : > { %2446 = vmatprep.subr.bf16.mxu0 %v2332_v58  ;;  %v4199_v47 = vpop.permute.xlu0 %2496 }
 0x37f   : > { %2447 = vmatpush1.bf16.msra.mxu0 %v2331_v6 }
 0x382   : > { %2730 = vmatmul.mubr.msk.bf16.vlgmr.msra.gmra.mxu0 %vm1595_vm11, %v2777_v8  ;;  %2422 = vmatmul.mubr.bf16.gmra.mxu1 %v2780_v35  ;;  %v4207_v31 = vpop.permute.xlu0 %2523 }
 0x383   : > { %2474 = vmatprep.mubr.bf16.mxu0 %v2834_v0  ;;  %v1540_v0 = vld [vmem:[%s4589_s10 + $0x8] sm:$0xff] }
 0x385   : > { %v4202_v23 = vpop.permute.xlu1 %2491 }
 0x386   : > { %v1555_v41 = vpop.permute.xlu0 %1554 }
 0x387   : > { %v1588_v20 = vmul.f32 %v1555_v41, %v1540_v0 }
 0x389   : > { %v4209_v16 = vpop.permute.xlu1 %2501  ;;  %v1597_v56 = vsel %vm1595_vm11, %v1588_v20, 0.0  ;;  %v2691_v20 = vld [vmem:[%s4590_s11 + $0x28] sm:$0xff] }
 0x38a   : > { %2731 = vmatmul.mubr.msk.bf16.gmra.mxu0 %vm1595_vm11, %v2781_v60  ;;  %v1570_v38 = vpop.permute.xlu0 %1569 }
 0x38b   : > { %v1591_v15 = vmul.f32 %v1570_v38, %v1543_v49  ;;  %v1666_v38 = vld [vmem:[%s4590_s11 + $0x10] sm:$0xff] }
 0x38d   : > { %v4212_v19 = vpop.permute.xlu1 %2506  ;;  %v1603_v14 = vsel %vm1595_vm11, %v1591_v15, 0.0 }
 0x38e   : > { %4600 = vst [vmem:[#allocation5_spill] sm:$0xff] %v4212_v19  ;;  %v1580_v30 = vpop.permute.xlu0 %1579 }
 0x38f   : > { %v1593_v55 = vmul.f32 %v1580_v30, %v1545_v36  ;;  %v2696_v30 = vld [vmem:[%s4590_s11 + $0x50] sm:$0xff] }
 0x391   : > { %v1550_v52 = vpop.permute.xlu1 %1549  ;;  %v1607_v34 = vsel %vm1595_vm11, %v1593_v55, 0.0  ;;  %v2692_v55 = vld [vmem:[%s4590_s11 + $0x30] sm:$0xff] }
 0x392   : > { %v1587_v53 = vmul.f32 %v1550_v52, %v1539_v4  ;;  %v1665_v52 = vld [vmem:[%s4590_s11 + $0x8] sm:$0xff] }
 0x394   : > { %v1596_v51 = vsel %vm1595_vm11, %v1587_v53, 0.0  ;;  %v1664_v53 = vld [vmem:[%s4590_s11] sm:$0xff] }
 0x395   : > { %v1560_v7 = vpop.permute.xlu1 %1559  ;;  %v1598_v46 = vadd.f32 %v1597_v56, %v1596_v51 }
 0x396   : > { %v1589_v45 = vmul.f32 %v1560_v7, %v1541_v48 }
 0x398   : > { %v1599_v61 = vsel %vm1595_vm11, %v1589_v45, 0.0 }
 0x399   : > { %v1565_v42 = vpop.permute.xlu1 %1564  ;;  %v1600_v3 = vadd.f32 %v1599_v61, %v1598_v46  ;;  %v2693_v61 = vld [vmem:[%s4590_s11 + $0x38] sm:$0xff] }
 0x39a   : > { %v1590_v10 = vmul.f32 %v1565_v42, %v1542_v63  ;;  %v1667_v46 = vld [vmem:[%s4590_s11 + $0x18] sm:$0xff] }
 0x39c   : > { %v1601_v2 = vsel %vm1595_vm11, %v1590_v10, 0.0 }
 0x39d   : > { %v1602_v62 = vadd.f32 %v1601_v2, %v1600_v3  ;;  %v1575_v59 = vpop.permute.xlu1 %1574  ;;  %v2690_v3 = vld [vmem:[%s4590_s11 + $0x20] sm:$0xff] }
 0x39e   : > { %v1592_v50 = vmul.f32 %v1575_v59, %v1544_v13 }
 0x39f   : > { %v1604_v29 = vadd.f32 %v1603_v14, %v1602_v62  ;;  %v2698_v14 = vld [vmem:[%s4590_s11 + $0x60] sm:$0xff] }
 0x3a0   : > { %v1605_v25 = vsel %vm1595_vm11, %v1592_v50, 0.0 }
 0x3a1   : > { %v1606_v27 = vadd.f32 %v1605_v25, %v1604_v29  ;;  %v1585_v44 = vpop.permute.xlu1 %1584 }
 0x3a2   : > { %v1594_v5 = vmul.f32 %v1585_v44, %v1546_v32  ;;  %v2694_v44 = vld [vmem:[%s4590_s11 + $0x40] sm:$0xff] }
 0x3a3   : > { %v1608_v6 = vadd.f32 %v1607_v34, %v1606_v27  ;;  %v2700_v27 = vld [vmem:[%s4590_s11 + $0x70] sm:$0xff] }
 0x3a4   : > { %v1609_v58 = vsel %vm1595_vm11, %v1594_v5, 0.0 }
 0x3a5   : > { %v1610_v8 = vadd.f32 %v1609_v58, %v1608_v6 }
 0x3a7   : > { %v1611_v35 = vrot.slane %v1610_v8, 4 }
 0x3a9   : > { %v1612_v60 = vadd.f32 %v1611_v35, %v1610_v8  ;;  %v2702_v8 = vld [vmem:[%s4590_s11 + $0x80] sm:$0xff]  ;;  %v2695_v35 = vld [vmem:[%s4590_s11 + $0x48] sm:$0xff] }
 0x3ab   : > { %v1613_v41 = vrot.slane %v1612_v60, 2 }
 0x3ad   : > { %v1614_v4 = vadd.f32 %v1613_v41, %v1612_v60 }
 0x3af   : > { %v1615_v0 = vrot.slane %v1614_v4, 1 }
 0x3b1   : > { %v4252_v48 = vadd.f32 %v1615_v0, %v1614_v4 }
 0x3b3   : > { %v1669_v7 = vmul.f32 %v1665_v52, %v4252_v48  ;;  %v1668_v51 = vmul.f32 %v1664_v53, %v4252_v48  ;;  %v1747_v63 = vmul.f32 %v2691_v20, %v4252_v48  ;;  %v1670_v56 = vmul.f32 %v1666_v38, %v4252_v48  ;;  %v2704_v52 = vld [vmem:[%s4590_s11 + $0x90] sm:$0xff]  ;;  %v2697_v53 = vld [vmem:[%s4590_s11 + $0x58] sm:$0xff] }
 0x3b4   : > { %v1749_v10 = vmul.f32 %v2693_v61, %v4252_v48  ;;  %v1671_v36 = vmul.f32 %v1667_v46, %v4252_v48  ;;  %v1826_v62 = vmul.f32 %v2696_v30, %v4252_v48  ;;  %v1746_v59 = vmul.f32 %v2690_v3, %v4252_v48 }
 0x3b5   : > { %v1675_v45 = vsel %vm1595_vm11, %v1669_v7, 0.0  ;;  %v1672_v49 = vsel %vm1595_vm11, %v1668_v51, 0.0  ;;  %v1753_v42 = vsel %vm1595_vm11, %v1747_v63, 0.0  ;;  %v1678_v15 = vsel %vm1595_vm11, %v1670_v56, 0.0 }
 0x3b6   : > { %1676 = vadd.xlane.f32.xlu1 %v1675_v45  ;;  %1673 = vadd.xlane.f32.xlu0 %v1672_v49  ;;  %v1759_v13 = vsel %vm1595_vm11, %v1749_v10, 0.0  ;;  %v1681_v2 = vsel %vm1595_vm11, %v1671_v36, 0.0  ;;  %v1834_v50 = vsel %vm1595_vm11, %v1826_v62, 0.0  ;;  %v1750_v29 = vsel %vm1595_vm11, %v1746_v59, 0.0  ;;  %v2706_v45 = vld [vmem:[%s4590_s11 + $0xa0] sm:$0xff]  ;;  %v2699_v49 = vld [vmem:[%s4590_s11 + $0x68] sm:$0xff] }
 0x3b7   : > { %v1902_v32 = vmul.f32 %v2698_v14, %v4252_v48  ;;  %v1748_v25 = vmul.f32 %v2692_v55, %v4252_v48  ;;  %v1904_v6 = vmul.f32 %v2700_v27, %v4252_v48  ;;  %v1824_v58 = vmul.f32 %v2694_v44, %v4252_v48 }
 0x3b8   : > { %v1955_v4 = vmul.f32 %v2702_v8, %v4252_v48  ;;  %v1825_v0 = vmul.f32 %v2695_v35, %v4252_v48  ;;  %v1957_v7 = vmul.f32 %v2704_v52, %v4252_v48  ;;  %v1827_v51 = vmul.f32 %v2697_v53, %v4252_v48 }
 0x3b9   : > { %v1906_v34 = vsel %vm1595_vm11, %v1902_v32, 0.0  ;;  %v1756_v5 = vsel %vm1595_vm11, %v1748_v25, 0.0  ;;  %v1912_v60 = vsel %vm1595_vm11, %v1904_v6, 0.0  ;;  %v1828_v41 = vsel %vm1595_vm11, %v1824_v58, 0.0 }
 0x3ba   : > { %1754 = vadd.xlane.f32.xlu1 %v1753_v42  ;;  %1679 = vadd.xlane.f32.xlu0 %v1678_v15  ;;  %v1959_v20 = vsel %vm1595_vm11, %v1955_v4, 0.0  ;;  %v1831_v38 = vsel %vm1595_vm11, %v1825_v0, 0.0  ;;  %v1965_v63 = vsel %vm1595_vm11, %v1957_v7, 0.0  ;;  %v1837_v56 = vsel %vm1595_vm11, %v1827_v51, 0.0  ;;  %v2708_v42 = vld [vmem:[%s4590_s11 + $0xb0] sm:$0xff]  ;;  %v2701_v15 = vld [vmem:[%s4590_s11 + $0x78] sm:$0xff] }
 0x3bb   : > { %v2033_v61 = vmul.f32 %v2706_v45, %v4252_v48  ;;  %v1903_v46 = vmul.f32 %v2699_v49, %v4252_v48  ;;  %v2035_v30 = vmul.f32 %v2708_v42, %v4252_v48  ;;  %v1905_v3 = vmul.f32 %v2701_v15, %v4252_v48 }
 0x3bd   : > { %v2037_v10 = vsel %vm1595_vm11, %v2033_v61, 0.0  ;;  %v1909_v36 = vsel %vm1595_vm11, %v1903_v46, 0.0  ;;  %v2043_v62 = vsel %vm1595_vm11, %v2035_v30, 0.0  ;;  %v1915_v59 = vsel %vm1595_vm11, %v1905_v3, 0.0 }
 0x3be   : > { %1760 = vadd.xlane.f32.xlu1 %v1759_v13  ;;  %1682 = vadd.xlane.f32.xlu0 %v1681_v2  ;;  %v2710_v13 = vld [vmem:[%s4590_s11 + $0xc0] sm:$0xff]  ;;  %v2703_v2 = vld [vmem:[%s4590_s11 + $0x88] sm:$0xff] }
 0x3bf   : > { %v2111_v14 = vmul.f32 %v2710_v13, %v4252_v48  ;;  %v1956_v55 = vmul.f32 %v2703_v2, %v4252_v48  ;;  %v2717_v13 = vld [vmem:[%s4590_s11 + $0xf8] sm:$0xff] }
 0x3c1   : > { %v2115_v32 = vsel %vm1595_vm11, %v2111_v14, 0.0  ;;  %v1962_v25 = vsel %vm1595_vm11, %v1956_v55, 0.0 }
 0x3c2   : > { %1835 = vadd.xlane.f32.xlu1 %v1834_v50  ;;  %1751 = vadd.xlane.f32.xlu0 %v1750_v29  ;;  %v2712_v50 = vld [vmem:[%s4590_s11 + $0xd0] sm:$0xff]  ;;  %v2705_v29 = vld [vmem:[%s4590_s11 + $0x98] sm:$0xff] }
 0x3c3   : > { %v2113_v27 = vmul.f32 %v2712_v50, %v4252_v48  ;;  %v1958_v44 = vmul.f32 %v2705_v29, %v4252_v48  ;;  %v2723_v50 = vld [vmem:[%s4590_s11 + $0x118] sm:$0xff] }
 0x3c5   : > { %v2121_v6 = vsel %vm1595_vm11, %v2113_v27, 0.0  ;;  %v1968_v58 = vsel %vm1595_vm11, %v1958_v44, 0.0  ;;  %v2519_v44 = vld [vmem:[%s4594_s15 + $0x10] sm:$0xff] }
 0x3c6   : > { %1907 = vadd.xlane.f32.xlu1 %v1906_v34  ;;  %1757 = vadd.xlane.f32.xlu0 %v1756_v5  ;;  %v2714_v34 = vld [vmem:[%s4590_s11 + $0xe0] sm:$0xff]  ;;  %v2707_v5 = vld [vmem:[%s4590_s11 + $0xa8] sm:$0xff] }
 0x3c7   : > { %v2189_v8 = vmul.f32 %v2714_v34, %v4252_v48  ;;  %v2034_v35 = vmul.f32 %v2707_v5, %v4252_v48  ;;  %v4434_v34 = vpop.permute.xlu1 %2528 }
 0x3c9   : > { %v2193_v4 = vsel %vm1595_vm11, %v2189_v8, 0.0  ;;  %v2040_v0 = vsel %vm1595_vm11, %v2034_v35, 0.0 }
 0x3ca   : > { %1913 = vadd.xlane.f32.xlu1 %v1912_v60  ;;  %1829 = vadd.xlane.f32.xlu0 %v1828_v41  ;;  %v2716_v60 = vld [vmem:[%s4590_s11 + $0xf0] sm:$0xff]  ;;  %v2709_v41 = vld [vmem:[%s4590_s11 + $0xb8] sm:$0xff] }
 0x3cb   : > { %v2191_v52 = vmul.f32 %v2716_v60, %v4252_v48  ;;  %v2036_v53 = vmul.f32 %v2709_v41, %v4252_v48 }
 0x3cd   : > { %v2199_v7 = vsel %vm1595_vm11, %v2191_v52, 0.0  ;;  %v2046_v51 = vsel %vm1595_vm11, %v2036_v53, 0.0 }
 0x3ce   : > { %1960 = vadd.xlane.f32.xlu1 %v1959_v20  ;;  %1832 = vadd.xlane.f32.xlu0 %v1831_v38  ;;  %v2720_v20 = vld [vmem:[%s4590_s11 + $0x100] sm:$0xff]  ;;  %v2711_v38 = vld [vmem:[%s4590_s11 + $0xc8] sm:$0xff] }
 0x3cf   : > { %v2267_v45 = vmul.f32 %v2720_v20, %v4252_v48  ;;  %v2112_v49 = vmul.f32 %v2711_v38, %v4252_v48 }
 0x3d1   : > { %v2271_v61 = vsel %vm1595_vm11, %v2267_v45, 0.0  ;;  %v2118_v46 = vsel %vm1595_vm11, %v2112_v49, 0.0 }
 0x3d2   : > { %1966 = vadd.xlane.f32.xlu1 %v1965_v63  ;;  %1838 = vadd.xlane.f32.xlu0 %v1837_v56  ;;  %v2722_v63 = vld [vmem:[%s4590_s11 + $0x110] sm:$0xff]  ;;  %v2713_v56 = vld [vmem:[%s4590_s11 + $0xd8] sm:$0xff] }
 0x3d3   : > { %v2269_v42 = vmul.f32 %v2722_v63, %v4252_v48  ;;  %v2114_v15 = vmul.f32 %v2713_v56, %v4252_v48 }
 0x3d5   : > { %v2124_v30 = vsel %vm1595_vm11, %v2114_v15, 0.0 }
 0x3d6   : > { %2038 = vadd.xlane.f32.xlu1 %v2037_v10  ;;  %1910 = vadd.xlane.f32.xlu0 %v1909_v36  ;;  %v2715_v10 = vld [vmem:[%s4590_s11 + $0xe8] sm:$0xff]  ;;  %v2277_v36 = vsel %vm1595_vm11, %v2269_v42, 0.0 }
 0x3d7   : > { %v2190_v3 = vmul.f32 %v2715_v10, %v4252_v48 }
 0x3d9   : > { %v2196_v2 = vsel %vm1595_vm11, %v2190_v3, 0.0 }
 0x3da   : > { %2044 = vadd.xlane.f32.xlu1 %v2043_v62  ;;  %1916 = vadd.xlane.f32.xlu0 %v1915_v59  ;;  %v2192_v62 = vmul.f32 %v2717_v13, %v4252_v48  ;;  %v2721_v59 = vld [vmem:[%s4590_s11 + $0x108] sm:$0xff] }
 0x3db   : > { %v2268_v55 = vmul.f32 %v2721_v59, %v4252_v48 }
 0x3dc   : > { %v2202_v14 = vsel %vm1595_vm11, %v2192_v62, 0.0 }
 0x3dd   : > { %v2274_v29 = vsel %vm1595_vm11, %v2268_v55, 0.0 }
 0x3de   : > { %2116 = vadd.xlane.f32.xlu1 %v2115_v32  ;;  %1963 = vadd.xlane.f32.xlu0 %v1962_v25  ;;  %v2270_v32 = vmul.f32 %v2723_v50, %v4252_v48  ;;  %v2520_v25 = vld [vmem:[%s4594_s15 + $0x18] sm:$0xff] }
 0x3e0   : > { %v2280_v27 = vsel %vm1595_vm11, %v2270_v32, 0.0 }
 0x3e2   : > { %2122 = vadd.xlane.f32.xlu1 %v2121_v6  ;;  %1969 = vadd.xlane.f32.xlu0 %v1968_v58 }
 0x3e6   : > { %2194 = vadd.xlane.f32.xlu1 %v2193_v4  ;;  %2041 = vadd.xlane.f32.xlu0 %v2040_v0 }
 0x3ea   : > { %2200 = vadd.xlane.f32.xlu1 %v2199_v7  ;;  %2047 = vadd.xlane.f32.xlu0 %v2046_v51 }
 0x3ee   : > { %2272 = vadd.xlane.f32.xlu1 %v2271_v61  ;;  %2119 = vadd.xlane.f32.xlu0 %v2118_v46 }
 0x3f2   : > { %2278 = vadd.xlane.f32.xlu1 %v2277_v36  ;;  %2125 = vadd.xlane.f32.xlu0 %v2124_v30 }
 0x3f6   : > { %2197 = vadd.xlane.f32.xlu0 %v2196_v2 }
 0x3fa   : > { %2203 = vadd.xlane.f32.xlu0 %v2202_v14 }
 0x3fe   : > { %2275 = vadd.xlane.f32.xlu0 %v2274_v29 }
 0x402   : > { %2281 = vadd.xlane.f32.xlu0 %v2280_v27 }
 0x403   : > { %2538 = vperm.xlu1 %2767, %v2520_v25  }
 0x418   : > { %2533 = vperm.xlu0 %2766, %v2519_v44  }
 0x43f   : > { %v1674_v5 = vpop.xlane.xlu0 %1673  ;;  %v1677_v6 = vpop.xlane.xlu1 %1676 }
 0x440   : > { %v1684_v42 = vmul.f32 %v1674_v5, %v4001_v1  ;;  %v1685_v15 = vmul.f32 %v1674_v5, %v3981_v9 }
 0x443   : > { %v1680_v58 = vpop.xlane.xlu0 %1679  ;;  %v1755_v48 = vpop.xlane.xlu1 %1754 }
 0x444   : > { %v1688_v14 = vmul.f32 %v1680_v58, %v4001_v1  ;;  %v1689_v55 = vmul.f32 %v1680_v58, %v3981_v9  ;;  %v1764_v32 = vmul.f32 %v1755_v48, %v3946_v54  ;;  %v1765_v25 = vmul.f32 %v1755_v48, %v3919_v18 }
 0x445   : > { %v1687_v58 = vmul.f32 %v1677_v6, %v3981_v9 }
 0x447   : > { %v1683_v8 = vpop.xlane.xlu0 %1682  ;;  %v1761_v35 = vpop.xlane.xlu1 %1760 }
 0x44b   : > { %v1752_v60 = vpop.xlane.xlu0 %1751  ;;  %v1836_v41 = vpop.xlane.xlu1 %1835 }
 0x44c   : > { %v1762_v63 = vmul.f32 %v1752_v60, %v3946_v54  ;;  %v1763_v56 = vmul.f32 %v1752_v60, %v3919_v18 }
 0x44e   : > { %v1770_v30 = vadd.f32 %v1762_v63, %v1684_v42  ;;  %v1771_v3 = vadd.f32 %v1763_v56, %v1685_v15  ;;  %v1686_v63 = vmul.f32 %v1677_v6, %v4001_v1  ;;  %v1844_v56 = vmul.f32 %v1836_v41, %v3890_v24 }
 0x44f   : > { %v1758_v4 = vpop.xlane.xlu0 %1757  ;;  %v1908_v0 = vpop.xlane.xlu1 %1907  ;;  %v1845_v42 = vmul.f32 %v1836_v41, %v3893_v26  ;;  %v1769_v6 = vmul.f32 %v1761_v35, %v3919_v18 }
 0x450   : > { %v1766_v13 = vmul.f32 %v1758_v4, %v3946_v54  ;;  %v1767_v2 = vmul.f32 %v1758_v4, %v3919_v18  ;;  %v1918_v5 = vmul.f32 %v1908_v0, %v3853_v33  ;;  %v1919_v60 = vmul.f32 %v1908_v0, %v3856_v22 }
 0x451   : > { %v1773_v0 = vadd.f32 %v1765_v25, %v1687_v58 }
 0x452   : > { %v1774_v27 = vadd.f32 %v1766_v13, %v1688_v14  ;;  %v1775_v44 = vadd.f32 %v1767_v2, %v1689_v55  ;;  %v1691_v13 = vmul.f32 %v1683_v8, %v3981_v9  ;;  %v1768_v2 = vmul.f32 %v1761_v35, %v3946_v54 }
 0x453   : > { %v1830_v52 = vpop.xlane.xlu0 %1829  ;;  %v1914_v53 = vpop.xlane.xlu1 %1913 }
 0x454   : > { %v1840_v10 = vmul.f32 %v1830_v52, %v3890_v24  ;;  %v1841_v36 = vmul.f32 %v1830_v52, %v3893_v26  ;;  %v1852_v14 = vadd.f32 %v1844_v56, %v1774_v27  ;;  %v1853_v55 = vadd.f32 %v1845_v42, %v1775_v44 }
 0x456   : > { %v1848_v50 = vadd.f32 %v1840_v10, %v1770_v30  ;;  %v1849_v29 = vadd.f32 %v1841_v36, %v1771_v3  ;;  %v1772_v30 = vadd.f32 %v1764_v32, %v1686_v63  ;;  %v1690_v3 = vmul.f32 %v1683_v8, %v4001_v1 }
 0x457   : > { %v1833_v20 = vpop.xlane.xlu0 %1832  ;;  %v1961_v38 = vpop.xlane.xlu1 %1960 }
 0x458   : > { %v1926_v15 = vadd.f32 %v1918_v5, %v1848_v50  ;;  %v1927_v48 = vadd.f32 %v1919_v60, %v1849_v29  ;;  %v1971_v10 = vmul.f32 %v1961_v38, %v4137_v40  ;;  %v1972_v36 = vmul.f32 %v1961_v38, %v4122_v17 }
 0x459   : > { %v1922_v50 = vmul.f32 %v1914_v53, %v3853_v33  ;;  %v1923_v29 = vmul.f32 %v1914_v53, %v3856_v22  ;;  %v1842_v1 = vmul.f32 %v1833_v20, %v3890_v24  ;;  %v1843_v9 = vmul.f32 %v1833_v20, %v3893_v26 }
 0x45a   : > { %v1979_v54 = vadd.f32 %v1971_v10, %v1926_v15  ;;  %v1980_v8 = vadd.f32 %v1972_v36, %v1927_v48  ;;  %v1776_v44 = vadd.f32 %v1768_v2, %v1690_v3  ;;  %v1777_v53 = vadd.f32 %v1769_v6, %v1691_v13 }
 0x45b   : > { %v1839_v7 = vpop.xlane.xlu0 %1838  ;;  %v1967_v51 = vpop.xlane.xlu1 %1966  ;;  %v1930_v56 = vadd.f32 %v1922_v50, %v1852_v14  ;;  %v1931_v42 = vadd.f32 %v1923_v29, %v1853_v55  ;;  %v1851_v15 = vadd.f32 %v1843_v9, %v1773_v0 }
 0x45c   : > { %v1846_v18 = vmul.f32 %v1839_v7, %v3890_v24  ;;  %v1847_v35 = vmul.f32 %v1839_v7, %v3893_v26  ;;  %v1975_v5 = vmul.f32 %v1967_v51, %v4137_v40  ;;  %v2413_v7 = vpop.f32.mrf.mxu1 }
 0x45e   : > { %v1854_v48 = vadd.f32 %v1846_v18, %v1776_v44  ;;  %v1855_v10 = vadd.f32 %v1847_v35, %v1777_v53  ;;  %v1983_v13 = vadd.f32 %v1975_v5, %v1930_v56  ;;  %v2415_v55 = vpop.f32.mrf.mxu1 }
 0x45f   : > { %v4436_v45 = vpop.xlane.xlu0 %1910  ;;  %v2039_v49 = vpop.xlane.xlu1 %2038 }
 0x460   : > { %v2049_v38 = vmul.f32 %v2039_v49, %v4099_v21  ;;  %v2050_v32 = vmul.f32 %v2039_v49, %v4102_v12  ;;  %v1976_v49 = vmul.f32 %v1967_v51, %v4122_v17  ;;  %v2466_v51 = vpop.f32.mrf.mxu0  ;;  %v1920_v6 = vmul.f32 %v4436_v45, %v3853_v33 }
 0x462   : > { %v2057_v20 = vadd.f32 %v2049_v38, %v1979_v54  ;;  %v2058_v58 = vadd.f32 %v2050_v32, %v1980_v8  ;;  %v1984_v2 = vadd.f32 %v1976_v49, %v1931_v42  ;;  %v1921_v38 = vmul.f32 %v4436_v45, %v3856_v22 }
 0x463   : > { %v4440_v61 = vpop.xlane.xlu0 %1916  ;;  %v4442_v46 = vpop.xlane.xlu1 %2044 }
 0x464   : > { %v1924_v50 = vmul.f32 %v4440_v61, %v3853_v33  ;;  %v1925_v29 = vmul.f32 %v4440_v61, %v3856_v22  ;;  %v2054_v45 = vmul.f32 %v4442_v46, %v4102_v12  ;;  %v2468_v61 = vpop.f32.mrf.mxu0 }
 0x467   : > { %v4450_v62 = vpop.xlane.xlu0 %1963  ;;  %v2117_v59 = vpop.xlane.xlu1 %2116 }
 0x468   : > { %v2127_v25 = vmul.f32 %v2117_v59, %v4077_v28  ;;  %v2128_v27 = vmul.f32 %v2117_v59, %v4065_v37  ;;  %v1850_v59 = vadd.f32 %v1842_v1, %v1772_v30  ;;  %v2053_v1 = vmul.f32 %v4442_v46, %v4099_v21 }
 0x469   : > { %v1973_v9 = vmul.f32 %v4450_v62, %v4137_v40  ;;  %v1974_v8 = vmul.f32 %v4450_v62, %v4122_v17  ;;  %v4518_v62 = vpop.f32.mrf.mxu1 }
 0x46a   : > { %v2135_v36 = vadd.f32 %v2127_v25, %v2057_v20  ;;  %v2136_v3 = vadd.f32 %v2128_v27, %v2058_v58  ;;  %v1928_v25 = vadd.f32 %v1920_v6, %v1850_v59  ;;  %v1929_v27 = vadd.f32 %v1921_v38, %v1851_v15 }
 0x46b   : > { %v4458_v4 = vpop.xlane.xlu0 %1969  ;;  %v4460_v52 = vpop.xlane.xlu1 %2122  ;;  %v1932_v20 = vadd.f32 %v1924_v50, %v1854_v48  ;;  %v1933_v58 = vadd.f32 %v1925_v29, %v1855_v10 }
 0x46c   : > { %v1977_v33 = vmul.f32 %v4458_v4, %v4137_v40  ;;  %v1978_v22 = vmul.f32 %v4458_v4, %v4122_v17  ;;  %v2131_v46 = vmul.f32 %v4460_v52, %v4077_v28  ;;  %v2132_v53 = vmul.f32 %v4460_v52, %v4065_v37 }
 0x46d   : > { %v1981_v40 = vadd.f32 %v1973_v9, %v1928_v25  ;;  %v1982_v56 = vadd.f32 %v1974_v8, %v1929_v27 }
 0x46e   : > { %v1985_v4 = vadd.f32 %v1977_v33, %v1932_v20  ;;  %v1986_v59 = vadd.f32 %v1978_v22, %v1933_v58 }
 0x46f   : > { %v4472_v19 = vpop.xlane.xlu0 %2041  ;;  %v2195_v41 = vpop.xlane.xlu1 %2194 }
 0x470   : > { %v2205_v24 = vmul.f32 %v2195_v41, %v4041_v11  ;;  %v2206_v26 = vmul.f32 %v2195_v41, %v4029_v43  ;;  %v2051_v15 = vmul.f32 %v4472_v19, %v4099_v21  ;;  %v2052_v52 = vmul.f32 %v4472_v19, %v4102_v12 }
 0x472   : > { %v2213_v54 = vadd.f32 %v2205_v24, %v2135_v36  ;;  %v2214_v14 = vadd.f32 %v2206_v26, %v2136_v3  ;;  %v2061_v24 = vadd.f32 %v2053_v1, %v1983_v13  ;;  %v2062_v26 = vadd.f32 %v2054_v45, %v1984_v2 }
 0x473   : > { %v4486_v60 = vpop.xlane.xlu0 %2047  ;;  %v4488_v63 = vpop.xlane.xlu1 %2200 }
 0x474   : > { %v2139_v3 = vadd.f32 %v2131_v46, %v2061_v24  ;;  %v2140_v48 = vadd.f32 %v2132_v53, %v2062_v26  ;;  %v2055_v6 = vmul.f32 %v4486_v60, %v4099_v21  ;;  %v2056_v38 = vmul.f32 %v4486_v60, %v4102_v12 }
 0x475   : > { %v2209_v19 = vmul.f32 %v4488_v63, %v4041_v11 }
 0x476   : > { %v2064_v25 = vadd.f32 %v2056_v38, %v1986_v59 }
 0x477   : > { %v2120_v32 = vpop.xlane.xlu0 %2119  ;;  %v2273_v41 = vpop.xlane.xlu1 %2272  ;;  %v2217_v45 = vadd.f32 %v2209_v19, %v2139_v3 }
 0x478   : > { %v2283_v30 = vmul.f32 %v4151_v57, %v2273_v41  ;;  %v2284_v0 = vmul.f32 %v4156_v39, %v2273_v41  ;;  %v2210_v41 = vmul.f32 %v4488_v63, %v4029_v43 }
 0x47a   : > { %v2291_v18 = vadd.f32 %v2283_v30, %v2213_v54  ;;  %v2292_v35 = vadd.f32 %v2284_v0, %v2214_v14  ;;  %v2129_v54 = vmul.f32 %v2120_v32, %v4077_v28  ;;  %v2130_v14 = vmul.f32 %v2120_v32, %v4065_v37 }
 0x47b   : > { %v2126_v44 = vpop.xlane.xlu0 %2125  ;;  %v2279_v2 = vpop.xlane.xlu1 %2278  ;;  %v2059_v30 = vadd.f32 %v2051_v15, %v1981_v40  ;;  %v2060_v0 = vadd.f32 %v2052_v52, %v1982_v56  ;;  %v2218_v9 = vadd.f32 %v2210_v41, %v2140_v48 }
 0x47c   : > { %v2414_v5 = vadd.f32 %v2413_v7, %v2291_v18  ;;  %v2416_v49 = vadd.f32 %v2415_v55, %v2292_v35  ;;  %v4524_v7 = vpop.f32.mrf.mxu0  ;;  %v2287_v21 = vmul.f32 %v4151_v57, %v2279_v2  ;;  %v2288_v12 = vmul.f32 %v4156_v39, %v2279_v2 }
 0x47d   : > { %v2133_v8 = vmul.f32 %v2126_v44, %v4077_v28  ;;  %v2134_v18 = vmul.f32 %v2126_v44, %v4065_v37  ;;  %v2063_v35 = vadd.f32 %v2055_v6, %v1985_v4  ;;  %v2137_v27 = vadd.f32 %v2129_v54, %v2059_v30 }
 0x47e   : > { %v2467_v42 = vadd.f32 %v2466_v51, %v2414_v5  ;;  %v2469_v17 = vadd.f32 %v2468_v61, %v2416_v49  ;;  %v2419_v51 = vpop.f32.mrf.mxu1  ;;  %v2472_v60 = vpop.f32.mrf.mxu0  ;;  %v2138_v33 = vadd.f32 %v2130_v14, %v2060_v0  ;;  %v2295_v22 = vadd.f32 %v2287_v21, %v2217_v45 }
 0x47f   : > { %v2198_v36 = vpop.xlane.xlu0 %2197  ;;  %v2296_v61 = vadd.f32 %v2288_v12, %v2218_v9  ;;  %v2141_v44 = vadd.f32 %v2133_v8, %v2063_v35  ;;  %v2142_v26 = vadd.f32 %v2134_v18, %v2064_v25 }
 0x480   : > { %v2509_v10 = vmul.f32 %v4202_v23, %v2467_v42  ;;  %v2510_v13 = vmul.f32 %v4202_v23, %v2469_v17  ;;  %v2423_v29 = vpop.f32.mrf.mxu1  ;;  %v2208_v1 = vmul.f32 %v2198_v36, %v4029_v43  ;;  %v2476_v46 = vpop.f32.mrf.mxu0 }
 0x481   : > { %v2424_v17 = vadd.f32 %v2423_v29, %v2295_v22  ;;  %v2539_v29 = vpop.permute.xlu1 %2538 }
 0x482   : > { %v2541_v23 = vadd.f32 %v4207_v31, %v2509_v10  ;;  %v2542_v55 = vadd.f32 %v4207_v31, %v2510_v13  ;;  %v2207_v31 = vmul.f32 %v2198_v36, %v4041_v11  ;;  %v2425_v20 = vpop.f32.mrf.mxu1  ;;  %v2216_v24 = vadd.f32 %v2208_v1, %v2138_v33  ;;  %v2478_v59 = vpop.f32.mrf.mxu0 }
 0x483   : > { %v2204_v63 = vpop.xlane.xlu0 %2203  ;;  %v2426_v4 = vadd.f32 %v2425_v20, %v2296_v61  ;;  %v2477_v19 = vadd.f32 %v2476_v46, %v2424_v17 }
 0x484   : > { %v2549_v32 = vmax.f32 %v2541_v23, 0.0  ;;  %v2550_v50 = vmax.f32 %v2542_v55, 0.0  ;;  %v2211_v53 = vmul.f32 %v2204_v63, %v4041_v11  ;;  %v2212_v5 = vmul.f32 %v2204_v63, %v4029_v43  ;;  %v2427_v40 = vpop.f32.mrf.mxu1  ;;  %v2480_v10 = vpop.f32.mrf.mxu0  ;;  %v4601_v63 = vld [vmem:[#allocation5_spill] sm:$0xff] }
 0x485   : > { %v2215_v58 = vadd.f32 %v2207_v31, %v2137_v27  ;;  %v2479_v41 = vadd.f32 %v2478_v59, %v2426_v4  ;;  %v2513_v21 = vmul.f32 %v4209_v16, %v2477_v19 }
 0x486   : > { %2557 = vst [vmem:[%s4544_s22] sm:$0xff] %v2549_v32  ;;  %2558 = vst [vmem:[%s4544_s22 + $0x8] sm:$0xff] %v2550_v50  ;;  %v2219_v15 = vadd.f32 %v2211_v53, %v2141_v44  ;;  %v2220_v11 = vadd.f32 %v2212_v5, %v2142_v26  ;;  %v2429_v54 = vpop.f32.mrf.mxu1 }
 0x487   : > { %v2276_v49 = vpop.xlane.xlu0 %2275  ;;  %v2514_v12 = vmul.f32 %v4209_v16, %v2479_v41 }
 0x488   : > { %v2285_v28 = vmul.f32 %v4151_v57, %v2276_v49  ;;  %v2286_v37 = vmul.f32 %v4156_v39, %v2276_v49 }
 0x48a   : > { %v2293_v56 = vadd.f32 %v2285_v28, %v2215_v58  ;;  %v2294_v42 = vadd.f32 %v2286_v37, %v2216_v24 }
 0x48b   : > { %v2282_v52 = vpop.xlane.xlu0 %2281 }
 0x48c   : > { %v2418_v43 = vadd.f32 %v4518_v62, %v2293_v56  ;;  %v2420_v36 = vadd.f32 %v2419_v51, %v2294_v42  ;;  %v2289_v3 = vmul.f32 %v4151_v57, %v2282_v52  ;;  %v2290_v48 = vmul.f32 %v4156_v39, %v2282_v52  ;;  %v2482_v51 = vpop.f32.mrf.mxu0 }
 0x48e   : > { %v2471_v13 = vadd.f32 %v4524_v7, %v2418_v43  ;;  %v2473_v2 = vadd.f32 %v2472_v60, %v2420_v36  ;;  %v2297_v6 = vadd.f32 %v2289_v3, %v2219_v15  ;;  %v2298_v38 = vadd.f32 %v2290_v48, %v2220_v11 }
 0x490   : > { %v2511_v14 = vmul.f32 %v4199_v47, %v2471_v13  ;;  %v2512_v23 = vmul.f32 %v4199_v47, %v2473_v2  ;;  %v2428_v55 = vadd.f32 %v2427_v40, %v2297_v6  ;;  %v2430_v62 = vadd.f32 %v2429_v54, %v2298_v38 }
 0x492   : > { %v2543_v57 = vadd.f32 %v4434_v34, %v2511_v14  ;;  %v2544_v39 = vadd.f32 %v4434_v34, %v2512_v23  ;;  %v2481_v7 = vadd.f32 %v2480_v10, %v2428_v55  ;;  %v2483_v30 = vadd.f32 %v2482_v51, %v2430_v62 }
 0x493   : > { %v2534_v0 = vpop.permute.xlu0 %2533 }
 0x494   : > { %v2551_v60 = vmax.f32 %v2543_v57, 0.0  ;;  %v2552_v47 = vmax.f32 %v2544_v39, 0.0  ;;  %v2515_v32 = vmul.f32 %v4601_v63, %v2481_v7  ;;  %v2516_v50 = vmul.f32 %v4601_v63, %v2483_v30 }
 0x495   : > { %v2545_v31 = vadd.f32 %v2534_v0, %v2513_v21  ;;  %v2546_v34 = vadd.f32 %v2534_v0, %v2514_v12 }
 0x496   : > { %2559 = vst [vmem:[%s4544_s22 + $0x10] sm:$0xff] %v2551_v60  ;;  %2560 = vst [vmem:[%s4544_s22 + $0x18] sm:$0xff] %v2552_v47  ;;  %v2547_v1 = vadd.f32 %v2539_v29, %v2515_v32  ;;  %v2548_v45 = vadd.f32 %v2539_v29, %v2516_v50 }
 0x497   : > { %v2553_v9 = vmax.f32 %v2545_v31, 0.0  ;;  %v2554_v8 = vmax.f32 %v2546_v34, 0.0 }
 0x498   : > { %v2555_v16 = vmax.f32 %v2547_v1, 0.0  ;;  %v2556_v18 = vmax.f32 %v2548_v45, 0.0 }
 0x499   : > { %2561 = vst [vmem:[%s4544_s22 + $0x20] sm:$0xff] %v2553_v9  ;;  %2562 = vst [vmem:[%s4544_s22 + $0x28] sm:$0xff] %v2554_v8 }
 0x49a   : > { %2563 = vst [vmem:[%s4544_s22 + $0x30] sm:$0xff] %v2555_v16  ;;  %2564 = vst [vmem:[%s4544_s22 + $0x38] sm:$0xff] %v2556_v18 }
 0x49b PF: > { %s27_s21 = sadd.s32 1, %s2831_s21  }
 0x49c   : > { %p24_p1 = scmp.ge.s32.totalorder %s27_s21, 4  }
 0x49e   :  { %26 = sbr.rel (!%p24_p1) target bundleno = 3 (0x3), region = 133 }
 0x4a3   :  { %2586 = vsyncpa [#allocation3], 1 }
 0x4a4   :  { %2588 = vsyncpa [#allocation3 + $0x1], 1 }

</bundles_post_ra>
